<compile_context>
chip_gen: v5e
topology: v5e:2x2
jax: 0.10.0
libtpu: 0.0.40
codegen_flags: <defaults>
</compile_context>

<pallas_src>
import jax
import jax.numpy as jnp
from jax import lax
from jax.experimental import pallas as pl
from jax.experimental.pallas import tpu as pltpu


HIDDEN_SEQ_DTYPE = jnp.float32   # flip to jnp.bfloat16 on v7x at production S*R*H (halves VMEM scratch)
GI_STORE_DTYPE = jnp.bfloat16    # bf16 gi storage halves the per-step DMA slabs (v5e HBM-bound)


# ----------------------------------------------------------------------------
# Fused kernel: time-blocked BiGRU recurrence (grid axis = time blocks,
# "arbitrary") + SelfAttention over the sequence, executed at the last grid
# step on the VMEM-resident hidden sequence.
# ----------------------------------------------------------------------------
def bigru_attention_kernel(gif_ref, gib_ref, whh_ref, bhh_ref,
                           watt_ref, batt_ref, uw_ref, ub_ref,
                           out_ref,
                           h_st, hsf_st, hsb_st):
    tb = pl.program_id(0)
    n_tb = pl.num_programs(0)
    T_b = gif_ref.shape[0]
    S = hsf_st.shape[0]
    R = h_st.shape[0]
    H = hsf_st.shape[2]

    # reset the recurrent state ([hf | hb]) at the first time block
    @pl.when(tb == 0)
    def _init():
        h_st[...] = jnp.zeros_like(h_st)

    t0 = tb * T_b

    def sub_step(j, h):
        # h: (R, 2H) = [hf | hb]; one fused block-diagonal matmul for both directions.
        hf = h[:, 0:H]
        hb = h[:, H:2 * H]
        gif = gif_ref[j].astype(jnp.float32)                  # forward input proj @ t0+j
        gib = gib_ref[T_b - 1 - j].astype(jnp.float32)        # backward input proj @ S-1-(t0+j)
        gh = jnp.dot(h, whh_ref[...], preferred_element_type=jnp.float32) + bhh_ref[...]  # (R, 6H)

        # PyTorch gate order r | z | n ; b_hh folded into gh so n uses r*(W_hn h + b_hn)
        r_f = jax.nn.sigmoid(gif[:, 0:H] + gh[:, 0:H])
        z_f = jax.nn.sigmoid(gif[:, H:2 * H] + gh[:, H:2 * H])
        n_f = jnp.tanh(gif[:, 2 * H:3 * H] + r_f * gh[:, 2 * H:3 * H])
        hf_new = (1.0 - z_f) * n_f + z_f * hf

        r_b = jax.nn.sigmoid(gib[:, 0:H] + gh[:, 3 * H:4 * H])
        z_b = jax.nn.sigmoid(gib[:, H:2 * H] + gh[:, 4 * H:5 * H])
        n_b = jnp.tanh(gib[:, 2 * H:3 * H] + r_b * gh[:, 5 * H:6 * H])
        hb_new = (1.0 - z_b) * n_b + z_b * hb

        hsf_st[t0 + j] = hf_new.astype(hsf_st.dtype)           # forward hidden @ time t0+j
        hsb_st[S - 1 - (t0 + j)] = hb_new.astype(hsb_st.dtype)  # backward hidden @ S-1-(t0+j)
        return jnp.concatenate([hf_new, hb_new], axis=-1)

    # T_b sub-steps per grid step, fully unrolled for LLO scheduler visibility.
    h_st[...] = lax.fori_loop(0, T_b, sub_step, h_st[...], unroll=True)

    # Fused self-attention once the full hidden sequence is in VMEM.
    # out_ref is only written here; its BlockSpec keeps the block resident across the grid.
    @pl.when(tb == n_tb - 1)
    def _attend():
        # TODO(synk): at production S*R*H switch to a chunked two-pass softmax over S to
        # bound vreg pressure (pass 1: scores/stats, pass 2: weighted sum).
        hf_seq = hsf_st[...].astype(jnp.float32)               # (S, R, H)
        hb_seq = hsb_st[...].astype(jnp.float32)
        cdt = watt_ref.dtype                                   # bf16 for the MXU projection
        hf2 = hf_seq.reshape(S * R, H).astype(cdt)
        hb2 = hb_seq.reshape(S * R, H).astype(cdt)
        # tanh(W [h_f ; h_b] + b) as two half-width matmuls (no in-kernel concat of the seq)
        u = jnp.tanh(
            jnp.dot(hf2, watt_ref[0:H, :], preferred_element_type=jnp.float32)
            + jnp.dot(hb2, watt_ref[H:2 * H, :], preferred_element_type=jnp.float32)
            + batt_ref[...])                                                 # (S*R, A)
        sc = jnp.sum(u * uw_ref[...], axis=-1, keepdims=True) + ub_ref[...]  # (S*R, 1)
        sc = sc.reshape(S, R, 1)
        sc = sc - jnp.max(sc, axis=0, keepdims=True)
        e = jnp.exp(sc)
        # approximate reciprocal lands on the otherwise-idle EUP slot
        a = e * pl.reciprocal(jnp.sum(e, axis=0, keepdims=True), approx=True)  # softmax over S
        wf = jnp.sum(a * hf_seq, axis=0)                        # (R, H)
        wb = jnp.sum(a * hb_seq, axis=0)                        # (R, H)
        pad = out_ref.shape[1] - 2 * H
        pieces = [wf, wb]
        if pad > 0:
            pieces.append(jnp.zeros((R, pad), jnp.float32))
        # single lane-dense store instead of two sub-128 masked slice stores
        out_ref[...] = jnp.concatenate(pieces, axis=-1).astype(out_ref.dtype)


# ----------------------------------------------------------------------------
# Wrapper: hoisted input-projection GEMMs (plain XLA, bf16) + one pallas_call
# ----------------------------------------------------------------------------
def comment_embedding_forward(x, p):
    """x: (B, C, S, E) float32 -> (B, C, 2H) float32."""
    B, C, S, E = x.shape
    H = p["w_hh_f"].shape[1]
    A = p["att_w"].shape[0]
    x = x.astype(jnp.float32)

    R = B * C
    R_pad = -(-R // 8) * 8                       # pad folded rows to a sublane multiple
    OUT_PAD = -(-(2 * H) // 128) * 128           # lane-dense output width

    # time-block size: largest divisor of S that is <= 8 (review: T_b ~ 8-16)
    T_b = next(t for t in (8, 4, 2, 1) if S % t == 0)
    NB = S // T_b

    # layout: (B, C, S, E) -> (S, B*C, E), b-major rows so the output reshapes to (B, C, 2H)
    x_rows = jnp.transpose(x, (2, 0, 1, 3)).reshape(S, R, E)
    if R_pad != R:
        x_rows = jnp.pad(x_rows, ((0, 0), (0, R_pad - R), (0, 0)))
    xb = x_rows.astype(jnp.bfloat16)

    # hoisted input projections: one big bf16 GEMM per direction, f32 accumulation,
    # stored bf16 to halve the per-step DMA traffic into the kernel.
    wih_f = p["w_ih_f"].T.astype(jnp.bfloat16)                 # (E, 3H)
    wih_b = p["w_ih_b"].T.astype(jnp.bfloat16)
    gi_f = (jnp.einsum("sre,ef->srf", xb, wih_f,
                       preferred_element_type=jnp.float32) + p["b_ih_f"]).astype(GI_STORE_DTYPE)
    gi_b = (jnp.einsum("sre,ef->srf", xb, wih_b,
                       preferred_element_type=jnp.float32) + p["b_ih_b"]).astype(GI_STORE_DTYPE)

    # block-diagonal recurrence weight: [hf | hb] @ whh_blk -> [fwd r|z|n , bwd r|z|n]
    whh_blk = jnp.zeros((2 * H, 6 * H), jnp.float32)
    whh_blk = whh_blk.at[0:H, 0:3 * H].set(p["w_hh_f"].T.astype(jnp.float32))
    whh_blk = whh_blk.at[H:2 * H, 3 * H:6 * H].set(p["w_hh_b"].T.astype(jnp.float32))
    bhh_cat = jnp.concatenate([p["b_hh_f"], p["b_hh_b"]]).reshape(1, 6 * H).astype(jnp.float32)

    watt = p["att_w"].T.astype(jnp.bfloat16)                   # (2H, A)
    batt = p["att_b"].reshape(1, A).astype(jnp.float32)
    uw = p["u_w"].reshape(1, A).astype(jnp.float32)
    ub = p["u_b"].reshape(1, 1).astype(jnp.float32)

    def full_spec(a):
        return pl.BlockSpec(a.shape, lambda tb, _n=a.ndim: (0,) * _n)

    out_rows = pl.pallas_call(
        bigru_attention_kernel,
        out_shape=jax.ShapeDtypeStruct((R_pad, OUT_PAD), jnp.float32),
        grid_spec=pltpu.PrefetchScalarGridSpec(
            num_scalar_prefetch=0,
            grid=(NB,),
            in_specs=[
                # forward gi chunk t0 .. t0+T_b-1
                pl.BlockSpec((T_b, R_pad, 3 * H), lambda tb: (tb, 0, 0)),
                # backward gi chunk, block-reversed; walked in reverse inside the kernel
                pl.BlockSpec((T_b, R_pad, 3 * H), lambda tb: (NB - 1 - tb, 0, 0)),
                full_spec(whh_blk), full_spec(bhh_cat),
                full_spec(watt), full_spec(batt), full_spec(uw), full_spec(ub),
            ],
            out_specs=pl.BlockSpec((R_pad, OUT_PAD), lambda tb: (0, 0)),
            scratch_shapes=[
                pltpu.VMEM((R_pad, 2 * H), jnp.float32),            # [hf | hb] carry
                pltpu.VMEM((S, R_pad, H), HIDDEN_SEQ_DTYPE),        # forward hidden sequence
                pltpu.VMEM((S, R_pad, H), HIDDEN_SEQ_DTYPE),        # backward hidden sequence
            ]),
        compiler_params=pltpu.CompilerParams(
            # time is sequential; on v7x add a leading "parallel" row-block axis to use both TCs
            dimension_semantics=("arbitrary",),
            vmem_limit_bytes=32 * 1024 * 1024,   # explicit; re-derive at production shapes (v7x: 64 MiB phys)
        ),
    )(gi_f, gi_b, whh_blk, bhh_cat, watt, batt, uw, ub)

    # drop row / lane padding; rows are b-major -> (B, C, 2H)
    return out_rows[:R, :2 * H].reshape(B, C, 2 * H)


# ----------------------------------------------------------------------------
# Pure-JAX reference (mirrors the PyTorch module) for a sanity check
# ----------------------------------------------------------------------------
def reference_forward(x, p):
    B, C, S, E = x.shape
    H = p["w_hh_f"].shape[1]

    def cell(xt, h, w_ih, w_hh, b_ih, b_hh):
        gi = xt @ w_ih.T + b_ih
        gh = h @ w_hh.T + b_hh
        r = jax.nn.sigmoid(gi[:, :H] + gh[:, :H])
        z = jax.nn.sigmoid(gi[:, H:2 * H] + gh[:, H:2 * H])
        n = jnp.tanh(gi[:, 2 * H:] + r * gh[:, 2 * H:])
        return (1.0 - z) * n + z * h

    outs = []
    for c in range(C):
        xc = x[:, c]                                    # (B, S, E)
        h = jnp.zeros((B, H), jnp.float32); hsf = []
        for t in range(S):
            h = cell(xc[:, t], h, p["w_ih_f"], p["w_hh_f"], p["b_ih_f"], p["b_hh_f"])
            hsf.append(h)
        h = jnp.zeros((B, H), jnp.float32); hsb = [None] * S
        for t in range(S - 1, -1, -1):
            h = cell(xc[:, t], h, p["w_ih_b"], p["w_hh_b"], p["b_ih_b"], p["b_hh_b"])
            hsb[t] = h
        hseq = jnp.concatenate([jnp.stack(hsf, axis=1), jnp.stack(hsb, axis=1)], axis=-1)
        u = jnp.tanh(hseq @ p["att_w"].T + p["att_b"])
        sc = u @ p["u_w"].T + p["u_b"]                  # (B, S, 1)
        a = jax.nn.softmax(sc, axis=1)
        outs.append(jnp.sum(a * hseq, axis=1)[:, None, :])
    return jnp.concatenate(outs, axis=1)                # (B, C, 2H)


if __name__ == "__main__":
    # small shapes: batch=2, num_comments=3, seq_len=16, embed_dim=32,
    #               hidden_size_lstm=16 (2H=32), hidden_size_att=16
    B, C, S, E, H, A = 2, 3, 16, 32, 16, 16

    key = jax.random.PRNGKey(0)
    ks = jax.random.split(key, 16)
    u01 = lambda k, shape, s: jax.random.uniform(k, shape, jnp.float32, -s, s)

    sH = 1.0 / jnp.sqrt(jnp.float32(H))
    params = {
        "w_ih_f": u01(ks[0], (3 * H, E), sH), "w_hh_f": u01(ks[1], (3 * H, H), sH),
        "b_ih_f": u01(ks[2], (3 * H,), sH),   "b_hh_f": u01(ks[3], (3 * H,), sH),
        "w_ih_b": u01(ks[4], (3 * H, E), sH), "w_hh_b": u01(ks[5], (3 * H, H), sH),
        "b_ih_b": u01(ks[6], (3 * H,), sH),   "b_hh_b": u01(ks[7], (3 * H,), sH),
        "att_w": u01(ks[8], (A, 2 * H), 0.2), "att_b": u01(ks[9], (A,), 0.2),
        "u_w":   u01(ks[10], (1, A), 0.2),    "u_b":   u01(ks[11], (1,), 0.2),
    }
    x = jax.random.normal(ks[12], (B, C, S, E), jnp.float32) * 0.5

    out = jax.jit(comment_embedding_forward)(x, params)
    out = jax.block_until_ready(out)

    ref = reference_forward(x, params)
    assert out.shape == (B, C, 2 * H), out.shape
    # Tolerance sized for the deliberate bf16 paths (input projection GEMM, bf16 gi storage,
    # attention projection) and the approx EUP reciprocal; the all-f32 build of this kernel
    # matches the reference to ~1e-6.
    if not jnp.allclose(out, ref, atol=2e-2, rtol=2e-2):
        err = float(jnp.max(jnp.abs(out - ref)))
        raise AssertionError(f"Pallas output does not match reference (max abs err {err})")

    print("KERNEL_OK")
</pallas_src>

<mosaic_0001>
module attributes {stable_mosaic.version = 11 : i64} {
  func.func @bigru_attention_kernel(%arg0: i32, %arg1: memref<8x8x48xbf16, #tpu.memory_space<vmem>>, %arg2: memref<8x8x48xbf16, #tpu.memory_space<vmem>>, %arg3: memref<32x96xf32, #tpu.memory_space<vmem>>, %arg4: memref<1x96xf32, #tpu.memory_space<vmem>>, %arg5: memref<32x16xbf16, #tpu.memory_space<vmem>>, %arg6: memref<1x16xf32, #tpu.memory_space<vmem>>, %arg7: memref<1x16xf32, #tpu.memory_space<vmem>>, %arg8: memref<1x1xf32, #tpu.memory_space<vmem>>, %arg9: memref<8x128xf32, #tpu.memory_space<vmem>>, %arg10: memref<8x32xf32, #tpu.memory_space<vmem>>, %arg11: memref<16x8x16xf32, #tpu.memory_space<vmem>>, %arg12: memref<16x8x16xf32, #tpu.memory_space<vmem>>) attributes {dimension_semantics = [#tpu.dimension_semantics<arbitrary>], iteration_bounds = array<i64: 2>, scalar_prefetch = 0 : i64, scratch_operands = 3 : i64, tpu.core_type = #tpu.core_type<tc>, window_params = [{transform_indices = @transform_0, window_bounds = array<i64: 8, 8, 48>}, {transform_indices = @transform_1, window_bounds = array<i64: 8, 8, 48>}, {pipeline_mode = #tpu.pipeline_mode<synchronous>, transform_indices = @transform_2, window_bounds = array<i64: 32, 96>}, {pipeline_mode = #tpu.pipeline_mode<synchronous>, transform_indices = @transform_3, window_bounds = array<i64: 1, 96>}, {pipeline_mode = #tpu.pipeline_mode<synchronous>, transform_indices = @transform_4, window_bounds = array<i64: 32, 16>}, {pipeline_mode = #tpu.pipeline_mode<synchronous>, transform_indices = @transform_5, window_bounds = array<i64: 1, 16>}, {pipeline_mode = #tpu.pipeline_mode<synchronous>, transform_indices = @transform_6, window_bounds = array<i64: 1, 16>}, {pipeline_mode = #tpu.pipeline_mode<synchronous>, transform_indices = @transform_7, window_bounds = array<i64: 1, 1>}, {pipeline_mode = #tpu.pipeline_mode<synchronous>, transform_indices = @transform_8, window_bounds = array<i64: 8, 128>}]} {
    %c0_i32 = arith.constant 0 : i32
    %0 = arith.cmpi eq, %arg0, %c0_i32 : i32
    %1 = arith.extui %0 : i1 to i32
    %c0_i32_0 = arith.constant 0 : i32
    %2 = arith.cmpi ne, %1, %c0_i32_0 : i32
    scf.if %2 {
      %cst_174 = arith.constant 0.000000e+00 : f32
      %649 = vector.broadcast %cst_174 : f32 to vector<8x32xf32>
      %c0_175 = arith.constant 0 : index
      %c0_176 = arith.constant 0 : index
      %650 = vector.load %arg10[%c0_175, %c0_176] : memref<8x32xf32, #tpu.memory_space<vmem>>, vector<8x32xf32>
      tpu.vector_store %arg10[%c0_175, %c0_176], %649 {strides = array<i32>} : memref<8x32xf32, #tpu.memory_space<vmem>>, vector<8x32xf32>,
    } else {
    }
    %c8_i32 = arith.constant 8 : i32
    %3 = arith.muli %arg0, %c8_i32 : i32
    %c0 = arith.constant 0 : index
    %c0_1 = arith.constant 0 : index
    %4 = vector.load %arg10[%c0, %c0_1] : memref<8x32xf32, #tpu.memory_space<vmem>>, vector<8x32xf32>
    %c0_i32_2 = arith.constant 0 : i32
    %5 = vector.extract_strided_slice %4 {offsets = [0, 0], sizes = [8, 16], strides = [1, 1]} : vector<8x32xf32> to vector<8x16xf32>
    %6 = vector.extract_strided_slice %4 {offsets = [0, 16], sizes = [8, 16], strides = [1, 1]} : vector<8x32xf32> to vector<8x16xf32>
    %7 = arith.index_cast %c0_i32_2 : i32 to index
    %c0_3 = arith.constant 0 : index
    %c0_4 = arith.constant 0 : index
    %8 = vector.load %arg1[%7, %c0_3, %c0_4] : memref<8x8x48xbf16, #tpu.memory_space<vmem>>, vector<1x8x48xbf16>
    %9 = vector.shape_cast %8 : vector<1x8x48xbf16> to vector<8x48xbf16>
    %10 = arith.extf %9 : vector<8x48xbf16> to vector<8x48xf32>
    %c7_i32 = arith.constant 7 : i32
    %11 = arith.subi %c7_i32, %c0_i32_2 : i32
    %12 = arith.index_cast %11 : i32 to index
    %c0_5 = arith.constant 0 : index
    %c0_6 = arith.constant 0 : index
    %13 = vector.load %arg2[%12, %c0_5, %c0_6] : memref<8x8x48xbf16, #tpu.memory_space<vmem>>, vector<1x8x48xbf16>
    %14 = vector.shape_cast %13 : vector<1x8x48xbf16> to vector<8x48xbf16>
    %15 = arith.extf %14 : vector<8x48xbf16> to vector<8x48xf32>
    %c0_7 = arith.constant 0 : index
    %c0_8 = arith.constant 0 : index
    %16 = vector.load %arg3[%c0_7, %c0_8] : memref<32x96xf32, #tpu.memory_space<vmem>>, vector<32x96xf32>
    %cst = arith.constant dense<0.000000e+00> : vector<8x96xf32>
    %17 = tpu.matmul %4, %16, %cst {dimension_numbers = #tpu.dot_dimension_numbers<[1], [0], [0], [1], [0, 0, 1, 1], [], []>} : vector<8x32xf32>, vector<32x96xf32>, vector<8x96xf32> -> vector<8x96xf32>
    %c0_9 = arith.constant 0 : index
    %c0_10 = arith.constant 0 : index
    %18 = vector.load %arg4[%c0_9, %c0_10] : memref<1x96xf32, #tpu.memory_space<vmem>>, vector<1x96xf32>
    %19 = vector.broadcast %18 : vector<1x96xf32> to vector<8x96xf32>
    %20 = arith.addf %17, %19 : vector<8x96xf32>
    %21 = vector.extract_strided_slice %10 {offsets = [0, 0], sizes = [8, 16], strides = [1, 1]} : vector<8x48xf32> to vector<8x16xf32>
    %22 = vector.extract_strided_slice %20 {offsets = [0, 0], sizes = [8, 16], strides = [1, 1]} : vector<8x96xf32> to vector<8x16xf32>
    %23 = arith.addf %21, %22 : vector<8x16xf32>
    %24 = arith.negf %23 : vector<8x16xf32>
    %25 = math.exp %24 : vector<8x16xf32>
    %cst_11 = arith.constant 1.000000e+00 : f32
    %26 = vector.broadcast %cst_11 : f32 to vector<8x16xf32>
    %27 = arith.addf %26, %25 : vector<8x16xf32>
    %28 = arith.divf %26, %27 : vector<8x16xf32>
    %29 = vector.extract_strided_slice %10 {offsets = [0, 16], sizes = [8, 16], strides = [1, 1]} : vector<8x48xf32> to vector<8x16xf32>
    %30 = vector.extract_strided_slice %20 {offsets = [0, 16], sizes = [8, 16], strides = [1, 1]} : vector<8x96xf32> to vector<8x16xf32>
    %31 = arith.addf %29, %30 : vector<8x16xf32>
    %32 = arith.negf %31 : vector<8x16xf32>
    %33 = math.exp %32 : vector<8x16xf32>
    %cst_12 = arith.constant 1.000000e+00 : f32
    %34 = vector.broadcast %cst_12 : f32 to vector<8x16xf32>
    %35 = arith.addf %34, %33 : vector<8x16xf32>
    %36 = arith.divf %34, %35 : vector<8x16xf32>
    %37 = vector.extract_strided_slice %10 {offsets = [0, 32], sizes = [8, 16], strides = [1, 1]} : vector<8x48xf32> to vector<8x16xf32>
    %38 = vector.extract_strided_slice %20 {offsets = [0, 32], sizes = [8, 16], strides = [1, 1]} : vector<8x96xf32> to vector<8x16xf32>
    %39 = arith.mulf %28, %38 : vector<8x16xf32>
    %40 = arith.addf %37, %39 : vector<8x16xf32>
    %41 = math.tanh %40 : vector<8x16xf32>
    %cst_13 = arith.constant 1.000000e+00 : f32
    %42 = vector.broadcast %cst_13 : f32 to vector<8x16xf32>
    %43 = arith.subf %42, %36 : vector<8x16xf32>
    %44 = arith.mulf %43, %41 : vector<8x16xf32>
    %45 = arith.mulf %36, %5 : vector<8x16xf32>
    %46 = arith.addf %44, %45 : vector<8x16xf32>
    %47 = vector.extract_strided_slice %15 {offsets = [0, 0], sizes = [8, 16], strides = [1, 1]} : vector<8x48xf32> to vector<8x16xf32>
    %48 = vector.extract_strided_slice %20 {offsets = [0, 48], sizes = [8, 16], strides = [1, 1]} : vector<8x96xf32> to vector<8x16xf32>
    %49 = arith.addf %47, %48 : vector<8x16xf32>
    %50 = arith.negf %49 : vector<8x16xf32>
    %51 = math.exp %50 : vector<8x16xf32>
    %cst_14 = arith.constant 1.000000e+00 : f32
    %52 = vector.broadcast %cst_14 : f32 to vector<8x16xf32>
    %53 = arith.addf %52, %51 : vector<8x16xf32>
    %54 = arith.divf %52, %53 : vector<8x16xf32>
    %55 = vector.extract_strided_slice %15 {offsets = [0, 16], sizes = [8, 16], strides = [1, 1]} : vector<8x48xf32> to vector<8x16xf32>
    %56 = vector.extract_strided_slice %20 {offsets = [0, 64], sizes = [8, 16], strides = [1, 1]} : vector<8x96xf32> to vector<8x16xf32>
    %57 = arith.addf %55, %56 : vector<8x16xf32>
    %58 = arith.negf %57 : vector<8x16xf32>
    %59 = math.exp %58 : vector<8x16xf32>
    %cst_15 = arith.constant 1.000000e+00 : f32
    %60 = vector.broadcast %cst_15 : f32 to vector<8x16xf32>
    %61 = arith.addf %60, %59 : vector<8x16xf32>
    %62 = arith.divf %60, %61 : vector<8x16xf32>
    %63 = vector.extract_strided_slice %15 {offsets = [0, 32], sizes = [8, 16], strides = [1, 1]} : vector<8x48xf32> to vector<8x16xf32>
    %64 = vector.extract_strided_slice %20 {offsets = [0, 80], sizes = [8, 16], strides = [1, 1]} : vector<8x96xf32> to vector<8x16xf32>
    %65 = arith.mulf %54, %64 : vector<8x16xf32>
    %66 = arith.addf %63, %65 : vector<8x16xf32>
    %67 = math.tanh %66 : vector<8x16xf32>
    %cst_16 = arith.constant 1.000000e+00 : f32
    %68 = vector.broadcast %cst_16 : f32 to vector<8x16xf32>
    %69 = arith.subf %68, %62 : vector<8x16xf32>
    %70 = arith.mulf %69, %67 : vector<8x16xf32>
    %71 = arith.mulf %62, %6 : vector<8x16xf32>
    %72 = arith.addf %70, %71 : vector<8x16xf32>
    %73 = arith.addi %3, %c0_i32_2 : i32
    %74 = arith.index_cast %73 : i32 to index
    %c0_17 = arith.constant 0 : index
    %c0_18 = arith.constant 0 : index
    %75 = vector.load %arg11[%74, %c0_17, %c0_18] : memref<16x8x16xf32, #tpu.memory_space<vmem>>, vector<1x8x16xf32>
    %76 = vector.shape_cast %75 : vector<1x8x16xf32> to vector<8x16xf32>
    %77 = vector.shape_cast %46 : vector<8x16xf32> to vector<1x8x16xf32>
    tpu.vector_store %arg11[%74, %c0_17, %c0_18], %77 {strides = array<i32>} : memref<16x8x16xf32, #tpu.memory_space<vmem>>, vector<1x8x16xf32>,
    %78 = arith.addi %3, %c0_i32_2 : i32
    %c15_i32 = arith.constant 15 : i32
    %79 = arith.subi %c15_i32, %78 : i32
    %80 = arith.index_cast %79 : i32 to index
    %c0_19 = arith.constant 0 : index
    %c0_20 = arith.constant 0 : index
    %81 = vector.load %arg12[%80, %c0_19, %c0_20] : memref<16x8x16xf32, #tpu.memory_space<vmem>>, vector<1x8x16xf32>
    %82 = vector.shape_cast %81 : vector<1x8x16xf32> to vector<8x16xf32>
    %83 = vector.shape_cast %72 : vector<8x16xf32> to vector<1x8x16xf32>
    tpu.vector_store %arg12[%80, %c0_19, %c0_20], %83 {strides = array<i32>} : memref<16x8x16xf32, #tpu.memory_space<vmem>>, vector<1x8x16xf32>,
    %84 = tpu.concatenate %46, %72 in 1 : vector<8x16xf32>, vector<8x16xf32> -> vector<8x32xf32>
    %c1_i32 = arith.constant 1 : i32
    %85 = vector.extract_strided_slice %84 {offsets = [0, 0], sizes = [8, 16], strides = [1, 1]} : vector<8x32xf32> to vector<8x16xf32>
    %86 = vector.extract_strided_slice %84 {offsets = [0, 16], sizes = [8, 16], strides = [1, 1]} : vector<8x32xf32> to vector<8x16xf32>
    %87 = arith.index_cast %c1_i32 : i32 to index
    %c0_21 = arith.constant 0 : index
    %c0_22 = arith.constant 0 : index
    %88 = vector.load %arg1[%87, %c0_21, %c0_22] : memref<8x8x48xbf16, #tpu.memory_space<vmem>>, vector<1x8x48xbf16>
    %89 = vector.shape_cast %88 : vector<1x8x48xbf16> to vector<8x48xbf16>
    %90 = arith.extf %89 : vector<8x48xbf16> to vector<8x48xf32>
    %c7_i32_23 = arith.constant 7 : i32
    %91 = arith.subi %c7_i32_23, %c1_i32 : i32
    %92 = arith.index_cast %91 : i32 to index
    %c0_24 = arith.constant 0 : index
    %c0_25 = arith.constant 0 : index
    %93 = vector.load %arg2[%92, %c0_24, %c0_25] : memref<8x8x48xbf16, #tpu.memory_space<vmem>>, vector<1x8x48xbf16>
    %94 = vector.shape_cast %93 : vector<1x8x48xbf16> to vector<8x48xbf16>
    %95 = arith.extf %94 : vector<8x48xbf16> to vector<8x48xf32>
    %c0_26 = arith.constant 0 : index
    %c0_27 = arith.constant 0 : index
    %96 = vector.load %arg3[%c0_26, %c0_27] : memref<32x96xf32, #tpu.memory_space<vmem>>, vector<32x96xf32>
    %cst_28 = arith.constant dense<0.000000e+00> : vector<8x96xf32>
    %97 = tpu.matmul %84, %96, %cst_28 {dimension_numbers = #tpu.dot_dimension_numbers<[1], [0], [0], [1], [0, 0, 1, 1], [], []>} : vector<8x32xf32>, vector<32x96xf32>, vector<8x96xf32> -> vector<8x96xf32>
    %c0_29 = arith.constant 0 : index
    %c0_30 = arith.constant 0 : index
    %98 = vector.load %arg4[%c0_29, %c0_30] : memref<1x96xf32, #tpu.memory_space<vmem>>, vector<1x96xf32>
    %99 = vector.broadcast %98 : vector<1x96xf32> to vector<8x96xf32>
    %100 = arith.addf %97, %99 : vector<8x96xf32>
    %101 = vector.extract_strided_slice %90 {offsets = [0, 0], sizes = [8, 16], strides = [1, 1]} : vector<8x48xf32> to vector<8x16xf32>
    %102 = vector.extract_strided_slice %100 {offsets = [0, 0], sizes = [8, 16], strides = [1, 1]} : vector<8x96xf32> to vector<8x16xf32>
    %103 = arith.addf %101, %102 : vector<8x16xf32>
    %104 = arith.negf %103 : vector<8x16xf32>
    %105 = math.exp %104 : vector<8x16xf32>
    %cst_31 = arith.constant 1.000000e+00 : f32
    %106 = vector.broadcast %cst_31 : f32 to vector<8x16xf32>
    %107 = arith.addf %106, %105 : vector<8x16xf32>
    %108 = arith.divf %106, %107 : vector<8x16xf32>
    %109 = vector.extract_strided_slice %90 {offsets = [0, 16], sizes = [8, 16], strides = [1, 1]} : vector<8x48xf32> to vector<8x16xf32>
    %110 = vector.extract_strided_slice %100 {offsets = [0, 16], sizes = [8, 16], strides = [1, 1]} : vector<8x96xf32> to vector<8x16xf32>
    %111 = arith.addf %109, %110 : vector<8x16xf32>
    %112 = arith.negf %111 : vector<8x16xf32>
    %113 = math.exp %112 : vector<8x16xf32>
    %cst_32 = arith.constant 1.000000e+00 : f32
    %114 = vector.broadcast %cst_32 : f32 to vector<8x16xf32>
    %115 = arith.addf %114, %113 : vector<8x16xf32>
    %116 = arith.divf %114, %115 : vector<8x16xf32>
    %117 = vector.extract_strided_slice %90 {offsets = [0, 32], sizes = [8, 16], strides = [1, 1]} : vector<8x48xf32> to vector<8x16xf32>
    %118 = vector.extract_strided_slice %100 {offsets = [0, 32], sizes = [8, 16], strides = [1, 1]} : vector<8x96xf32> to vector<8x16xf32>
    %119 = arith.mulf %108, %118 : vector<8x16xf32>
    %120 = arith.addf %117, %119 : vector<8x16xf32>
    %121 = math.tanh %120 : vector<8x16xf32>
    %cst_33 = arith.constant 1.000000e+00 : f32
    %122 = vector.broadcast %cst_33 : f32 to vector<8x16xf32>
    %123 = arith.subf %122, %116 : vector<8x16xf32>
    %124 = arith.mulf %123, %121 : vector<8x16xf32>
    %125 = arith.mulf %116, %85 : vector<8x16xf32>
    %126 = arith.addf %124, %125 : vector<8x16xf32>
    %127 = vector.extract_strided_slice %95 {offsets = [0, 0], sizes = [8, 16], strides = [1, 1]} : vector<8x48xf32> to vector<8x16xf32>
    %128 = vector.extract_strided_slice %100 {offsets = [0, 48], sizes = [8, 16], strides = [1, 1]} : vector<8x96xf32> to vector<8x16xf32>
    %129 = arith.addf %127, %128 : vector<8x16xf32>
    %130 = arith.negf %129 : vector<8x16xf32>
    %131 = math.exp %130 : vector<8x16xf32>
    %cst_34 = arith.constant 1.000000e+00 : f32
    %132 = vector.broadcast %cst_34 : f32 to vector<8x16xf32>
    %133 = arith.addf %132, %131 : vector<8x16xf32>
    %134 = arith.divf %132, %133 : vector<8x16xf32>
    %135 = vector.extract_strided_slice %95 {offsets = [0, 16], sizes = [8, 16], strides = [1, 1]} : vector<8x48xf32> to vector<8x16xf32>
    %136 = vector.extract_strided_slice %100 {offsets = [0, 64], sizes = [8, 16], strides = [1, 1]} : vector<8x96xf32> to vector<8x16xf32>
    %137 = arith.addf %135, %136 : vector<8x16xf32>
    %138 = arith.negf %137 : vector<8x16xf32>
    %139 = math.exp %138 : vector<8x16xf32>
    %cst_35 = arith.constant 1.000000e+00 : f32
    %140 = vector.broadcast %cst_35 : f32 to vector<8x16xf32>
    %141 = arith.addf %140, %139 : vector<8x16xf32>
    %142 = arith.divf %140, %141 : vector<8x16xf32>
    %143 = vector.extract_strided_slice %95 {offsets = [0, 32], sizes = [8, 16], strides = [1, 1]} : vector<8x48xf32> to vector<8x16xf32>
    %144 = vector.extract_strided_slice %100 {offsets = [0, 80], sizes = [8, 16], strides = [1, 1]} : vector<8x96xf32> to vector<8x16xf32>
    %145 = arith.mulf %134, %144 : vector<8x16xf32>
    %146 = arith.addf %143, %145 : vector<8x16xf32>
    %147 = math.tanh %146 : vector<8x16xf32>
    %cst_36 = arith.constant 1.000000e+00 : f32
    %148 = vector.broadcast %cst_36 : f32 to vector<8x16xf32>
    %149 = arith.subf %148, %142 : vector<8x16xf32>
    %150 = arith.mulf %149, %147 : vector<8x16xf32>
    %151 = arith.mulf %142, %86 : vector<8x16xf32>
    %152 = arith.addf %150, %151 : vector<8x16xf32>
    %153 = arith.addi %3, %c1_i32 : i32
    %154 = arith.index_cast %153 : i32 to index
    %c0_37 = arith.constant 0 : index
    %c0_38 = arith.constant 0 : index
    %155 = vector.load %arg11[%154, %c0_37, %c0_38] : memref<16x8x16xf32, #tpu.memory_space<vmem>>, vector<1x8x16xf32>
    %156 = vector.shape_cast %155 : vector<1x8x16xf32> to vector<8x16xf32>
    %157 = vector.shape_cast %126 : vector<8x16xf32> to vector<1x8x16xf32>
    tpu.vector_store %arg11[%154, %c0_37, %c0_38], %157 {strides = array<i32>} : memref<16x8x16xf32, #tpu.memory_space<vmem>>, vector<1x8x16xf32>,
    %158 = arith.addi %3, %c1_i32 : i32
    %c15_i32_39 = arith.constant 15 : i32
    %159 = arith.subi %c15_i32_39, %158 : i32
    %160 = arith.index_cast %159 : i32 to index
    %c0_40 = arith.constant 0 : index
    %c0_41 = arith.constant 0 : index
    %161 = vector.load %arg12[%160, %c0_40, %c0_41] : memref<16x8x16xf32, #tpu.memory_space<vmem>>, vector<1x8x16xf32>
    %162 = vector.shape_cast %161 : vector<1x8x16xf32> to vector<8x16xf32>
    %163 = vector.shape_cast %152 : vector<8x16xf32> to vector<1x8x16xf32>
    tpu.vector_store %arg12[%160, %c0_40, %c0_41], %163 {strides = array<i32>} : memref<16x8x16xf32, #tpu.memory_space<vmem>>, vector<1x8x16xf32>,
    %164 = tpu.concatenate %126, %152 in 1 : vector<8x16xf32>, vector<8x16xf32> -> vector<8x32xf32>
    %c2_i32 = arith.constant 2 : i32
    %165 = vector.extract_strided_slice %164 {offsets = [0, 0], sizes = [8, 16], strides = [1, 1]} : vector<8x32xf32> to vector<8x16xf32>
    %166 = vector.extract_strided_slice %164 {offsets = [0, 16], sizes = [8, 16], strides = [1, 1]} : vector<8x32xf32> to vector<8x16xf32>
    %167 = arith.index_cast %c2_i32 : i32 to index
    %c0_42 = arith.constant 0 : index
    %c0_43 = arith.constant 0 : index
    %168 = vector.load %arg1[%167, %c0_42, %c0_43] : memref<8x8x48xbf16, #tpu.memory_space<vmem>>, vector<1x8x48xbf16>
    %169 = vector.shape_cast %168 : vector<1x8x48xbf16> to vector<8x48xbf16>
    %170 = arith.extf %169 : vector<8x48xbf16> to vector<8x48xf32>
    %c7_i32_44 = arith.constant 7 : i32
    %171 = arith.subi %c7_i32_44, %c2_i32 : i32
    %172 = arith.index_cast %171 : i32 to index
    %c0_45 = arith.constant 0 : index
    %c0_46 = arith.constant 0 : index
    %173 = vector.load %arg2[%172, %c0_45, %c0_46] : memref<8x8x48xbf16, #tpu.memory_space<vmem>>, vector<1x8x48xbf16>
    %174 = vector.shape_cast %173 : vector<1x8x48xbf16> to vector<8x48xbf16>
    %175 = arith.extf %174 : vector<8x48xbf16> to vector<8x48xf32>
    %c0_47 = arith.constant 0 : index
    %c0_48 = arith.constant 0 : index
    %176 = vector.load %arg3[%c0_47, %c0_48] : memref<32x96xf32, #tpu.memory_space<vmem>>, vector<32x96xf32>
    %cst_49 = arith.constant dense<0.000000e+00> : vector<8x96xf32>
    %177 = tpu.matmul %164, %176, %cst_49 {dimension_numbers = #tpu.dot_dimension_numbers<[1], [0], [0], [1], [0, 0, 1, 1], [], []>} : vector<8x32xf32>, vector<32x96xf32>, vector<8x96xf32> -> vector<8x96xf32>
    %c0_50 = arith.constant 0 : index
    %c0_51 = arith.constant 0 : index
    %178 = vector.load %arg4[%c0_50, %c0_51] : memref<1x96xf32, #tpu.memory_space<vmem>>, vector<1x96xf32>
    %179 = vector.broadcast %178 : vector<1x96xf32> to vector<8x96xf32>
    %180 = arith.addf %177, %179 : vector<8x96xf32>
    %181 = vector.extract_strided_slice %170 {offsets = [0, 0], sizes = [8, 16], strides = [1, 1]} : vector<8x48xf32> to vector<8x16xf32>
    %182 = vector.extract_strided_slice %180 {offsets = [0, 0], sizes = [8, 16], strides = [1, 1]} : vector<8x96xf32> to vector<8x16xf32>
    %183 = arith.addf %181, %182 : vector<8x16xf32>
    %184 = arith.negf %183 : vector<8x16xf32>
    %185 = math.exp %184 : vector<8x16xf32>
    %cst_52 = arith.constant 1.000000e+00 : f32
    %186 = vector.broadcast %cst_52 : f32 to vector<8x16xf32>
    %187 = arith.addf %186, %185 : vector<8x16xf32>
    %188 = arith.divf %186, %187 : vector<8x16xf32>
    %189 = vector.extract_strided_slice %170 {offsets = [0, 16], sizes = [8, 16], strides = [1, 1]} : vector<8x48xf32> to vector<8x16xf32>
    %190 = vector.extract_strided_slice %180 {offsets = [0, 16], sizes = [8, 16], strides = [1, 1]} : vector<8x96xf32> to vector<8x16xf32>
    %191 = arith.addf %189, %190 : vector<8x16xf32>
    %192 = arith.negf %191 : vector<8x16xf32>
    %193 = math.exp %192 : vector<8x16xf32>
    %cst_53 = arith.constant 1.000000e+00 : f32
    %194 = vector.broadcast %cst_53 : f32 to vector<8x16xf32>
    %195 = arith.addf %194, %193 : vector<8x16xf32>
    %196 = arith.divf %194, %195 : vector<8x16xf32>
    %197 = vector.extract_strided_slice %170 {offsets = [0, 32], sizes = [8, 16], strides = [1, 1]} : vector<8x48xf32> to vector<8x16xf32>
    %198 = vector.extract_strided_slice %180 {offsets = [0, 32], sizes = [8, 16], strides = [1, 1]} : vector<8x96xf32> to vector<8x16xf32>
    %199 = arith.mulf %188, %198 : vector<8x16xf32>
    %200 = arith.addf %197, %199 : vector<8x16xf32>
    %201 = math.tanh %200 : vector<8x16xf32>
    %cst_54 = arith.constant 1.000000e+00 : f32
    %202 = vector.broadcast %cst_54 : f32 to vector<8x16xf32>
    %203 = arith.subf %202, %196 : vector<8x16xf32>
    %204 = arith.mulf %203, %201 : vector<8x16xf32>
    %205 = arith.mulf %196, %165 : vector<8x16xf32>
    %206 = arith.addf %204, %205 : vector<8x16xf32>
    %207 = vector.extract_strided_slice %175 {offsets = [0, 0], sizes = [8, 16], strides = [1, 1]} : vector<8x48xf32> to vector<8x16xf32>
    %208 = vector.extract_strided_slice %180 {offsets = [0, 48], sizes = [8, 16], strides = [1, 1]} : vector<8x96xf32> to vector<8x16xf32>
    %209 = arith.addf %207, %208 : vector<8x16xf32>
    %210 = arith.negf %209 : vector<8x16xf32>
    %211 = math.exp %210 : vector<8x16xf32>
    %cst_55 = arith.constant 1.000000e+00 : f32
    %212 = vector.broadcast %cst_55 : f32 to vector<8x16xf32>
    %213 = arith.addf %212, %211 : vector<8x16xf32>
    %214 = arith.divf %212, %213 : vector<8x16xf32>
    %215 = vector.extract_strided_slice %175 {offsets = [0, 16], sizes = [8, 16], strides = [1, 1]} : vector<8x48xf32> to vector<8x16xf32>
    %216 = vector.extract_strided_slice %180 {offsets = [0, 64], sizes = [8, 16], strides = [1, 1]} : vector<8x96xf32> to vector<8x16xf32>
    %217 = arith.addf %215, %216 : vector<8x16xf32>
    %218 = arith.negf %217 : vector<8x16xf32>
    %219 = math.exp %218 : vector<8x16xf32>
    %cst_56 = arith.constant 1.000000e+00 : f32
    %220 = vector.broadcast %cst_56 : f32 to vector<8x16xf32>
    %221 = arith.addf %220, %219 : vector<8x16xf32>
    %222 = arith.divf %220, %221 : vector<8x16xf32>
    %223 = vector.extract_strided_slice %175 {offsets = [0, 32], sizes = [8, 16], strides = [1, 1]} : vector<8x48xf32> to vector<8x16xf32>
    %224 = vector.extract_strided_slice %180 {offsets = [0, 80], sizes = [8, 16], strides = [1, 1]} : vector<8x96xf32> to vector<8x16xf32>
    %225 = arith.mulf %214, %224 : vector<8x16xf32>
    %226 = arith.addf %223, %225 : vector<8x16xf32>
    %227 = math.tanh %226 : vector<8x16xf32>
    %cst_57 = arith.constant 1.000000e+00 : f32
    %228 = vector.broadcast %cst_57 : f32 to vector<8x16xf32>
    %229 = arith.subf %228, %222 : vector<8x16xf32>
    %230 = arith.mulf %229, %227 : vector<8x16xf32>
    %231 = arith.mulf %222, %166 : vector<8x16xf32>
    %232 = arith.addf %230, %231 : vector<8x16xf32>
    %233 = arith.addi %3, %c2_i32 : i32
    %234 = arith.index_cast %233 : i32 to index
    %c0_58 = arith.constant 0 : index
    %c0_59 = arith.constant 0 : index
    %235 = vector.load %arg11[%234, %c0_58, %c0_59] : memref<16x8x16xf32, #tpu.memory_space<vmem>>, vector<1x8x16xf32>
    %236 = vector.shape_cast %235 : vector<1x8x16xf32> to vector<8x16xf32>
    %237 = vector.shape_cast %206 : vector<8x16xf32> to vector<1x8x16xf32>
    tpu.vector_store %arg11[%234, %c0_58, %c0_59], %237 {strides = array<i32>} : memref<16x8x16xf32, #tpu.memory_space<vmem>>, vector<1x8x16xf32>,
    %238 = arith.addi %3, %c2_i32 : i32
    %c15_i32_60 = arith.constant 15 : i32
    %239 = arith.subi %c15_i32_60, %238 : i32
    %240 = arith.index_cast %239 : i32 to index
    %c0_61 = arith.constant 0 : index
    %c0_62 = arith.constant 0 : index
    %241 = vector.load %arg12[%240, %c0_61, %c0_62] : memref<16x8x16xf32, #tpu.memory_space<vmem>>, vector<1x8x16xf32>
    %242 = vector.shape_cast %241 : vector<1x8x16xf32> to vector<8x16xf32>
    %243 = vector.shape_cast %232 : vector<8x16xf32> to vector<1x8x16xf32>
    tpu.vector_store %arg12[%240, %c0_61, %c0_62], %243 {strides = array<i32>} : memref<16x8x16xf32, #tpu.memory_space<vmem>>, vector<1x8x16xf32>,
    %244 = tpu.concatenate %206, %232 in 1 : vector<8x16xf32>, vector<8x16xf32> -> vector<8x32xf32>
    %c3_i32 = arith.constant 3 : i32
    %245 = vector.extract_strided_slice %244 {offsets = [0, 0], sizes = [8, 16], strides = [1, 1]} : vector<8x32xf32> to vector<8x16xf32>
    %246 = vector.extract_strided_slice %244 {offsets = [0, 16], sizes = [8, 16], strides = [1, 1]} : vector<8x32xf32> to vector<8x16xf32>
    %247 = arith.index_cast %c3_i32 : i32 to index
    %c0_63 = arith.constant 0 : index
    %c0_64 = arith.constant 0 : index
    %248 = vector.load %arg1[%247, %c0_63, %c0_64] : memref<8x8x48xbf16, #tpu.memory_space<vmem>>, vector<1x8x48xbf16>
    %249 = vector.shape_cast %248 : vector<1x8x48xbf16> to vector<8x48xbf16>
    %250 = arith.extf %249 : vector<8x48xbf16> to vector<8x48xf32>
    %c7_i32_65 = arith.constant 7 : i32
    %251 = arith.subi %c7_i32_65, %c3_i32 : i32
    %252 = arith.index_cast %251 : i32 to index
    %c0_66 = arith.constant 0 : index
    %c0_67 = arith.constant 0 : index
    %253 = vector.load %arg2[%252, %c0_66, %c0_67] : memref<8x8x48xbf16, #tpu.memory_space<vmem>>, vector<1x8x48xbf16>
    %254 = vector.shape_cast %253 : vector<1x8x48xbf16> to vector<8x48xbf16>
    %255 = arith.extf %254 : vector<8x48xbf16> to vector<8x48xf32>
    %c0_68 = arith.constant 0 : index
    %c0_69 = arith.constant 0 : index
    %256 = vector.load %arg3[%c0_68, %c0_69] : memref<32x96xf32, #tpu.memory_space<vmem>>, vector<32x96xf32>
    %cst_70 = arith.constant dense<0.000000e+00> : vector<8x96xf32>
    %257 = tpu.matmul %244, %256, %cst_70 {dimension_numbers = #tpu.dot_dimension_numbers<[1], [0], [0], [1], [0, 0, 1, 1], [], []>} : vector<8x32xf32>, vector<32x96xf32>, vector<8x96xf32> -> vector<8x96xf32>
    %c0_71 = arith.constant 0 : index
    %c0_72 = arith.constant 0 : index
    %258 = vector.load %arg4[%c0_71, %c0_72] : memref<1x96xf32, #tpu.memory_space<vmem>>, vector<1x96xf32>
    %259 = vector.broadcast %258 : vector<1x96xf32> to vector<8x96xf32>
    %260 = arith.addf %257, %259 : vector<8x96xf32>
    %261 = vector.extract_strided_slice %250 {offsets = [0, 0], sizes = [8, 16], strides = [1, 1]} : vector<8x48xf32> to vector<8x16xf32>
    %262 = vector.extract_strided_slice %260 {offsets = [0, 0], sizes = [8, 16], strides = [1, 1]} : vector<8x96xf32> to vector<8x16xf32>
    %263 = arith.addf %261, %262 : vector<8x16xf32>
    %264 = arith.negf %263 : vector<8x16xf32>
    %265 = math.exp %264 : vector<8x16xf32>
    %cst_73 = arith.constant 1.000000e+00 : f32
    %266 = vector.broadcast %cst_73 : f32 to vector<8x16xf32>
    %267 = arith.addf %266, %265 : vector<8x16xf32>
    %268 = arith.divf %266, %267 : vector<8x16xf32>
    %269 = vector.extract_strided_slice %250 {offsets = [0, 16], sizes = [8, 16], strides = [1, 1]} : vector<8x48xf32> to vector<8x16xf32>
    %270 = vector.extract_strided_slice %260 {offsets = [0, 16], sizes = [8, 16], strides = [1, 1]} : vector<8x96xf32> to vector<8x16xf32>
    %271 = arith.addf %269, %270 : vector<8x16xf32>
    %272 = arith.negf %271 : vector<8x16xf32>
    %273 = math.exp %272 : vector<8x16xf32>
    %cst_74 = arith.constant 1.000000e+00 : f32
    %274 = vector.broadcast %cst_74 : f32 to vector<8x16xf32>
    %275 = arith.addf %274, %273 : vector<8x16xf32>
    %276 = arith.divf %274, %275 : vector<8x16xf32>
    %277 = vector.extract_strided_slice %250 {offsets = [0, 32], sizes = [8, 16], strides = [1, 1]} : vector<8x48xf32> to vector<8x16xf32>
    %278 = vector.extract_strided_slice %260 {offsets = [0, 32], sizes = [8, 16], strides = [1, 1]} : vector<8x96xf32> to vector<8x16xf32>
    %279 = arith.mulf %268, %278 : vector<8x16xf32>
    %280 = arith.addf %277, %279 : vector<8x16xf32>
    %281 = math.tanh %280 : vector<8x16xf32>
    %cst_75 = arith.constant 1.000000e+00 : f32
    %282 = vector.broadcast %cst_75 : f32 to vector<8x16xf32>
    %283 = arith.subf %282, %276 : vector<8x16xf32>
    %284 = arith.mulf %283, %281 : vector<8x16xf32>
    %285 = arith.mulf %276, %245 : vector<8x16xf32>
    %286 = arith.addf %284, %285 : vector<8x16xf32>
    %287 = vector.extract_strided_slice %255 {offsets = [0, 0], sizes = [8, 16], strides = [1, 1]} : vector<8x48xf32> to vector<8x16xf32>
    %288 = vector.extract_strided_slice %260 {offsets = [0, 48], sizes = [8, 16], strides = [1, 1]} : vector<8x96xf32> to vector<8x16xf32>
    %289 = arith.addf %287, %288 : vector<8x16xf32>
    %290 = arith.negf %289 : vector<8x16xf32>
    %291 = math.exp %290 : vector<8x16xf32>
    %cst_76 = arith.constant 1.000000e+00 : f32
    %292 = vector.broadcast %cst_76 : f32 to vector<8x16xf32>
    %293 = arith.addf %292, %291 : vector<8x16xf32>
    %294 = arith.divf %292, %293 : vector<8x16xf32>
    %295 = vector.extract_strided_slice %255 {offsets = [0, 16], sizes = [8, 16], strides = [1, 1]} : vector<8x48xf32> to vector<8x16xf32>
    %296 = vector.extract_strided_slice %260 {offsets = [0, 64], sizes = [8, 16], strides = [1, 1]} : vector<8x96xf32> to vector<8x16xf32>
    %297 = arith.addf %295, %296 : vector<8x16xf32>
    %298 = arith.negf %297 : vector<8x16xf32>
    %299 = math.exp %298 : vector<8x16xf32>
    %cst_77 = arith.constant 1.000000e+00 : f32
    %300 = vector.broadcast %cst_77 : f32 to vector<8x16xf32>
    %301 = arith.addf %300, %299 : vector<8x16xf32>
    %302 = arith.divf %300, %301 : vector<8x16xf32>
    %303 = vector.extract_strided_slice %255 {offsets = [0, 32], sizes = [8, 16], strides = [1, 1]} : vector<8x48xf32> to vector<8x16xf32>
    %304 = vector.extract_strided_slice %260 {offsets = [0, 80], sizes = [8, 16], strides = [1, 1]} : vector<8x96xf32> to vector<8x16xf32>
    %305 = arith.mulf %294, %304 : vector<8x16xf32>
    %306 = arith.addf %303, %305 : vector<8x16xf32>
    %307 = math.tanh %306 : vector<8x16xf32>
    %cst_78 = arith.constant 1.000000e+00 : f32
    %308 = vector.broadcast %cst_78 : f32 to vector<8x16xf32>
    %309 = arith.subf %308, %302 : vector<8x16xf32>
    %310 = arith.mulf %309, %307 : vector<8x16xf32>
    %311 = arith.mulf %302, %246 : vector<8x16xf32>
    %312 = arith.addf %310, %311 : vector<8x16xf32>
    %313 = arith.addi %3, %c3_i32 : i32
    %314 = arith.index_cast %313 : i32 to index
    %c0_79 = arith.constant 0 : index
    %c0_80 = arith.constant 0 : index
    %315 = vector.load %arg11[%314, %c0_79, %c0_80] : memref<16x8x16xf32, #tpu.memory_space<vmem>>, vector<1x8x16xf32>
    %316 = vector.shape_cast %315 : vector<1x8x16xf32> to vector<8x16xf32>
    %317 = vector.shape_cast %286 : vector<8x16xf32> to vector<1x8x16xf32>
    tpu.vector_store %arg11[%314, %c0_79, %c0_80], %317 {strides = array<i32>} : memref<16x8x16xf32, #tpu.memory_space<vmem>>, vector<1x8x16xf32>,
    %318 = arith.addi %3, %c3_i32 : i32
    %c15_i32_81 = arith.constant 15 : i32
    %319 = arith.subi %c15_i32_81, %318 : i32
    %320 = arith.index_cast %319 : i32 to index
    %c0_82 = arith.constant 0 : index
    %c0_83 = arith.constant 0 : index
    %321 = vector.load %arg12[%320, %c0_82, %c0_83] : memref<16x8x16xf32, #tpu.memory_space<vmem>>, vector<1x8x16xf32>
    %322 = vector.shape_cast %321 : vector<1x8x16xf32> to vector<8x16xf32>
    %323 = vector.shape_cast %312 : vector<8x16xf32> to vector<1x8x16xf32>
    tpu.vector_store %arg12[%320, %c0_82, %c0_83], %323 {strides = array<i32>} : memref<16x8x16xf32, #tpu.memory_space<vmem>>, vector<1x8x16xf32>,
    %324 = tpu.concatenate %286, %312 in 1 : vector<8x16xf32>, vector<8x16xf32> -> vector<8x32xf32>
    %c4_i32 = arith.constant 4 : i32
    %325 = vector.extract_strided_slice %324 {offsets = [0, 0], sizes = [8, 16], strides = [1, 1]} : vector<8x32xf32> to vector<8x16xf32>
    %326 = vector.extract_strided_slice %324 {offsets = [0, 16], sizes = [8, 16], strides = [1, 1]} : vector<8x32xf32> to vector<8x16xf32>
    %327 = arith.index_cast %c4_i32 : i32 to index
    %c0_84 = arith.constant 0 : index
    %c0_85 = arith.constant 0 : index
    %328 = vector.load %arg1[%327, %c0_84, %c0_85] : memref<8x8x48xbf16, #tpu.memory_space<vmem>>, vector<1x8x48xbf16>
    %329 = vector.shape_cast %328 : vector<1x8x48xbf16> to vector<8x48xbf16>
    %330 = arith.extf %329 : vector<8x48xbf16> to vector<8x48xf32>
    %c7_i32_86 = arith.constant 7 : i32
    %331 = arith.subi %c7_i32_86, %c4_i32 : i32
    %332 = arith.index_cast %331 : i32 to index
    %c0_87 = arith.constant 0 : index
    %c0_88 = arith.constant 0 : index
    %333 = vector.load %arg2[%332, %c0_87, %c0_88] : memref<8x8x48xbf16, #tpu.memory_space<vmem>>, vector<1x8x48xbf16>
    %334 = vector.shape_cast %333 : vector<1x8x48xbf16> to vector<8x48xbf16>
    %335 = arith.extf %334 : vector<8x48xbf16> to vector<8x48xf32>
    %c0_89 = arith.constant 0 : index
    %c0_90 = arith.constant 0 : index
    %336 = vector.load %arg3[%c0_89, %c0_90] : memref<32x96xf32, #tpu.memory_space<vmem>>, vector<32x96xf32>
    %cst_91 = arith.constant dense<0.000000e+00> : vector<8x96xf32>
    %337 = tpu.matmul %324, %336, %cst_91 {dimension_numbers = #tpu.dot_dimension_numbers<[1], [0], [0], [1], [0, 0, 1, 1], [], []>} : vector<8x32xf32>, vector<32x96xf32>, vector<8x96xf32> -> vector<8x96xf32>
    %c0_92 = arith.constant 0 : index
    %c0_93 = arith.constant 0 : index
    %338 = vector.load %arg4[%c0_92, %c0_93] : memref<1x96xf32, #tpu.memory_space<vmem>>, vector<1x96xf32>
    %339 = vector.broadcast %338 : vector<1x96xf32> to vector<8x96xf32>
    %340 = arith.addf %337, %339 : vector<8x96xf32>
    %341 = vector.extract_strided_slice %330 {offsets = [0, 0], sizes = [8, 16], strides = [1, 1]} : vector<8x48xf32> to vector<8x16xf32>
    %342 = vector.extract_strided_slice %340 {offsets = [0, 0], sizes = [8, 16], strides = [1, 1]} : vector<8x96xf32> to vector<8x16xf32>
    %343 = arith.addf %341, %342 : vector<8x16xf32>
    %344 = arith.negf %343 : vector<8x16xf32>
    %345 = math.exp %344 : vector<8x16xf32>
    %cst_94 = arith.constant 1.000000e+00 : f32
    %346 = vector.broadcast %cst_94 : f32 to vector<8x16xf32>
    %347 = arith.addf %346, %345 : vector<8x16xf32>
    %348 = arith.divf %346, %347 : vector<8x16xf32>
    %349 = vector.extract_strided_slice %330 {offsets = [0, 16], sizes = [8, 16], strides = [1, 1]} : vector<8x48xf32> to vector<8x16xf32>
    %350 = vector.extract_strided_slice %340 {offsets = [0, 16], sizes = [8, 16], strides = [1, 1]} : vector<8x96xf32> to vector<8x16xf32>
    %351 = arith.addf %349, %350 : vector<8x16xf32>
    %352 = arith.negf %351 : vector<8x16xf32>
    %353 = math.exp %352 : vector<8x16xf32>
    %cst_95 = arith.constant 1.000000e+00 : f32
    %354 = vector.broadcast %cst_95 : f32 to vector<8x16xf32>
    %355 = arith.addf %354, %353 : vector<8x16xf32>
    %356 = arith.divf %354, %355 : vector<8x16xf32>
    %357 = vector.extract_strided_slice %330 {offsets = [0, 32], sizes = [8, 16], strides = [1, 1]} : vector<8x48xf32> to vector<8x16xf32>
    %358 = vector.extract_strided_slice %340 {offsets = [0, 32], sizes = [8, 16], strides = [1, 1]} : vector<8x96xf32> to vector<8x16xf32>
    %359 = arith.mulf %348, %358 : vector<8x16xf32>
    %360 = arith.addf %357, %359 : vector<8x16xf32>
    %361 = math.tanh %360 : vector<8x16xf32>
    %cst_96 = arith.constant 1.000000e+00 : f32
    %362 = vector.broadcast %cst_96 : f32 to vector<8x16xf32>
    %363 = arith.subf %362, %356 : vector<8x16xf32>
    %364 = arith.mulf %363, %361 : vector<8x16xf32>
    %365 = arith.mulf %356, %325 : vector<8x16xf32>
    %366 = arith.addf %364, %365 : vector<8x16xf32>
    %367 = vector.extract_strided_slice %335 {offsets = [0, 0], sizes = [8, 16], strides = [1, 1]} : vector<8x48xf32> to vector<8x16xf32>
    %368 = vector.extract_strided_slice %340 {offsets = [0, 48], sizes = [8, 16], strides = [1, 1]} : vector<8x96xf32> to vector<8x16xf32>
    %369 = arith.addf %367, %368 : vector<8x16xf32>
    %370 = arith.negf %369 : vector<8x16xf32>
    %371 = math.exp %370 : vector<8x16xf32>
    %cst_97 = arith.constant 1.000000e+00 : f32
    %372 = vector.broadcast %cst_97 : f32 to vector<8x16xf32>
    %373 = arith.addf %372, %371 : vector<8x16xf32>
    %374 = arith.divf %372, %373 : vector<8x16xf32>
    %375 = vector.extract_strided_slice %335 {offsets = [0, 16], sizes = [8, 16], strides = [1, 1]} : vector<8x48xf32> to vector<8x16xf32>
    %376 = vector.extract_strided_slice %340 {offsets = [0, 64], sizes = [8, 16], strides = [1, 1]} : vector<8x96xf32> to vector<8x16xf32>
    %377 = arith.addf %375, %376 : vector<8x16xf32>
    %378 = arith.negf %377 : vector<8x16xf32>
    %379 = math.exp %378 : vector<8x16xf32>
    %cst_98 = arith.constant 1.000000e+00 : f32
    %380 = vector.broadcast %cst_98 : f32 to vector<8x16xf32>
    %381 = arith.addf %380, %379 : vector<8x16xf32>
    %382 = arith.divf %380, %381 : vector<8x16xf32>
    %383 = vector.extract_strided_slice %335 {offsets = [0, 32], sizes = [8, 16], strides = [1, 1]} : vector<8x48xf32> to vector<8x16xf32>
    %384 = vector.extract_strided_slice %340 {offsets = [0, 80], sizes = [8, 16], strides = [1, 1]} : vector<8x96xf32> to vector<8x16xf32>
    %385 = arith.mulf %374, %384 : vector<8x16xf32>
    %386 = arith.addf %383, %385 : vector<8x16xf32>
    %387 = math.tanh %386 : vector<8x16xf32>
    %cst_99 = arith.constant 1.000000e+00 : f32
    %388 = vector.broadcast %cst_99 : f32 to vector<8x16xf32>
    %389 = arith.subf %388, %382 : vector<8x16xf32>
    %390 = arith.mulf %389, %387 : vector<8x16xf32>
    %391 = arith.mulf %382, %326 : vector<8x16xf32>
    %392 = arith.addf %390, %391 : vector<8x16xf32>
    %393 = arith.addi %3, %c4_i32 : i32
    %394 = arith.index_cast %393 : i32 to index
    %c0_100 = arith.constant 0 : index
    %c0_101 = arith.constant 0 : index
    %395 = vector.load %arg11[%394, %c0_100, %c0_101] : memref<16x8x16xf32, #tpu.memory_space<vmem>>, vector<1x8x16xf32>
    %396 = vector.shape_cast %395 : vector<1x8x16xf32> to vector<8x16xf32>
    %397 = vector.shape_cast %366 : vector<8x16xf32> to vector<1x8x16xf32>
    tpu.vector_store %arg11[%394, %c0_100, %c0_101], %397 {strides = array<i32>} : memref<16x8x16xf32, #tpu.memory_space<vmem>>, vector<1x8x16xf32>,
    %398 = arith.addi %3, %c4_i32 : i32
    %c15_i32_102 = arith.constant 15 : i32
    %399 = arith.subi %c15_i32_102, %398 : i32
    %400 = arith.index_cast %399 : i32 to index
    %c0_103 = arith.constant 0 : index
    %c0_104 = arith.constant 0 : index
    %401 = vector.load %arg12[%400, %c0_103, %c0_104] : memref<16x8x16xf32, #tpu.memory_space<vmem>>, vector<1x8x16xf32>
    %402 = vector.shape_cast %401 : vector<1x8x16xf32> to vector<8x16xf32>
    %403 = vector.shape_cast %392 : vector<8x16xf32> to vector<1x8x16xf32>
    tpu.vector_store %arg12[%400, %c0_103, %c0_104], %403 {strides = array<i32>} : memref<16x8x16xf32, #tpu.memory_space<vmem>>, vector<1x8x16xf32>,
    %404 = tpu.concatenate %366, %392 in 1 : vector<8x16xf32>, vector<8x16xf32> -> vector<8x32xf32>
    %c5_i32 = arith.constant 5 : i32
    %405 = vector.extract_strided_slice %404 {offsets = [0, 0], sizes = [8, 16], strides = [1, 1]} : vector<8x32xf32> to vector<8x16xf32>
    %406 = vector.extract_strided_slice %404 {offsets = [0, 16], sizes = [8, 16], strides = [1, 1]} : vector<8x32xf32> to vector<8x16xf32>
    %407 = arith.index_cast %c5_i32 : i32 to index
    %c0_105 = arith.constant 0 : index
    %c0_106 = arith.constant 0 : index
    %408 = vector.load %arg1[%407, %c0_105, %c0_106] : memref<8x8x48xbf16, #tpu.memory_space<vmem>>, vector<1x8x48xbf16>
    %409 = vector.shape_cast %408 : vector<1x8x48xbf16> to vector<8x48xbf16>
    %410 = arith.extf %409 : vector<8x48xbf16> to vector<8x48xf32>
    %c7_i32_107 = arith.constant 7 : i32
    %411 = arith.subi %c7_i32_107, %c5_i32 : i32
    %412 = arith.index_cast %411 : i32 to index
    %c0_108 = arith.constant 0 : index
    %c0_109 = arith.constant 0 : index
    %413 = vector.load %arg2[%412, %c0_108, %c0_109] : memref<8x8x48xbf16, #tpu.memory_space<vmem>>, vector<1x8x48xbf16>
    %414 = vector.shape_cast %413 : vector<1x8x48xbf16> to vector<8x48xbf16>
    %415 = arith.extf %414 : vector<8x48xbf16> to vector<8x48xf32>
    %c0_110 = arith.constant 0 : index
    %c0_111 = arith.constant 0 : index
    %416 = vector.load %arg3[%c0_110, %c0_111] : memref<32x96xf32, #tpu.memory_space<vmem>>, vector<32x96xf32>
    %cst_112 = arith.constant dense<0.000000e+00> : vector<8x96xf32>
    %417 = tpu.matmul %404, %416, %cst_112 {dimension_numbers = #tpu.dot_dimension_numbers<[1], [0], [0], [1], [0, 0, 1, 1], [], []>} : vector<8x32xf32>, vector<32x96xf32>, vector<8x96xf32> -> vector<8x96xf32>
    %c0_113 = arith.constant 0 : index
    %c0_114 = arith.constant 0 : index
    %418 = vector.load %arg4[%c0_113, %c0_114] : memref<1x96xf32, #tpu.memory_space<vmem>>, vector<1x96xf32>
    %419 = vector.broadcast %418 : vector<1x96xf32> to vector<8x96xf32>
    %420 = arith.addf %417, %419 : vector<8x96xf32>
    %421 = vector.extract_strided_slice %410 {offsets = [0, 0], sizes = [8, 16], strides = [1, 1]} : vector<8x48xf32> to vector<8x16xf32>
    %422 = vector.extract_strided_slice %420 {offsets = [0, 0], sizes = [8, 16], strides = [1, 1]} : vector<8x96xf32> to vector<8x16xf32>
    %423 = arith.addf %421, %422 : vector<8x16xf32>
    %424 = arith.negf %423 : vector<8x16xf32>
    %425 = math.exp %424 : vector<8x16xf32>
    %cst_115 = arith.constant 1.000000e+00 : f32
    %426 = vector.broadcast %cst_115 : f32 to vector<8x16xf32>
    %427 = arith.addf %426, %425 : vector<8x16xf32>
    %428 = arith.divf %426, %427 : vector<8x16xf32>
    %429 = vector.extract_strided_slice %410 {offsets = [0, 16], sizes = [8, 16], strides = [1, 1]} : vector<8x48xf32> to vector<8x16xf32>
    %430 = vector.extract_strided_slice %420 {offsets = [0, 16], sizes = [8, 16], strides = [1, 1]} : vector<8x96xf32> to vector<8x16xf32>
    %431 = arith.addf %429, %430 : vector<8x16xf32>
    %432 = arith.negf %431 : vector<8x16xf32>
    %433 = math.exp %432 : vector<8x16xf32>
    %cst_116 = arith.constant 1.000000e+00 : f32
    %434 = vector.broadcast %cst_116 : f32 to vector<8x16xf32>
    %435 = arith.addf %434, %433 : vector<8x16xf32>
    %436 = arith.divf %434, %435 : vector<8x16xf32>
    %437 = vector.extract_strided_slice %410 {offsets = [0, 32], sizes = [8, 16], strides = [1, 1]} : vector<8x48xf32> to vector<8x16xf32>
    %438 = vector.extract_strided_slice %420 {offsets = [0, 32], sizes = [8, 16], strides = [1, 1]} : vector<8x96xf32> to vector<8x16xf32>
    %439 = arith.mulf %428, %438 : vector<8x16xf32>
    %440 = arith.addf %437, %439 : vector<8x16xf32>
    %441 = math.tanh %440 : vector<8x16xf32>
    %cst_117 = arith.constant 1.000000e+00 : f32
    %442 = vector.broadcast %cst_117 : f32 to vector<8x16xf32>
    %443 = arith.subf %442, %436 : vector<8x16xf32>
    %444 = arith.mulf %443, %441 : vector<8x16xf32>
    %445 = arith.mulf %436, %405 : vector<8x16xf32>
    %446 = arith.addf %444, %445 : vector<8x16xf32>
    %447 = vector.extract_strided_slice %415 {offsets = [0, 0], sizes = [8, 16], strides = [1, 1]} : vector<8x48xf32> to vector<8x16xf32>
    %448 = vector.extract_strided_slice %420 {offsets = [0, 48], sizes = [8, 16], strides = [1, 1]} : vector<8x96xf32> to vector<8x16xf32>
    %449 = arith.addf %447, %448 : vector<8x16xf32>
    %450 = arith.negf %449 : vector<8x16xf32>
    %451 = math.exp %450 : vector<8x16xf32>
    %cst_118 = arith.constant 1.000000e+00 : f32
    %452 = vector.broadcast %cst_118 : f32 to vector<8x16xf32>
    %453 = arith.addf %452, %451 : vector<8x16xf32>
    %454 = arith.divf %452, %453 : vector<8x16xf32>
    %455 = vector.extract_strided_slice %415 {offsets = [0, 16], sizes = [8, 16], strides = [1, 1]} : vector<8x48xf32> to vector<8x16xf32>
    %456 = vector.extract_strided_slice %420 {offsets = [0, 64], sizes = [8, 16], strides = [1, 1]} : vector<8x96xf32> to vector<8x16xf32>
    %457 = arith.addf %455, %456 : vector<8x16xf32>
    %458 = arith.negf %457 : vector<8x16xf32>
    %459 = math.exp %458 : vector<8x16xf32>
    %cst_119 = arith.constant 1.000000e+00 : f32
    %460 = vector.broadcast %cst_119 : f32 to vector<8x16xf32>
    %461 = arith.addf %460, %459 : vector<8x16xf32>
    %462 = arith.divf %460, %461 : vector<8x16xf32>
    %463 = vector.extract_strided_slice %415 {offsets = [0, 32], sizes = [8, 16], strides = [1, 1]} : vector<8x48xf32> to vector<8x16xf32>
    %464 = vector.extract_strided_slice %420 {offsets = [0, 80], sizes = [8, 16], strides = [1, 1]} : vector<8x96xf32> to vector<8x16xf32>
    %465 = arith.mulf %454, %464 : vector<8x16xf32>
    %466 = arith.addf %463, %465 : vector<8x16xf32>
    %467 = math.tanh %466 : vector<8x16xf32>
    %cst_120 = arith.constant 1.000000e+00 : f32
    %468 = vector.broadcast %cst_120 : f32 to vector<8x16xf32>
    %469 = arith.subf %468, %462 : vector<8x16xf32>
    %470 = arith.mulf %469, %467 : vector<8x16xf32>
    %471 = arith.mulf %462, %406 : vector<8x16xf32>
    %472 = arith.addf %470, %471 : vector<8x16xf32>
    %473 = arith.addi %3, %c5_i32 : i32
    %474 = arith.index_cast %473 : i32 to index
    %c0_121 = arith.constant 0 : index
    %c0_122 = arith.constant 0 : index
    %475 = vector.load %arg11[%474, %c0_121, %c0_122] : memref<16x8x16xf32, #tpu.memory_space<vmem>>, vector<1x8x16xf32>
    %476 = vector.shape_cast %475 : vector<1x8x16xf32> to vector<8x16xf32>
    %477 = vector.shape_cast %446 : vector<8x16xf32> to vector<1x8x16xf32>
    tpu.vector_store %arg11[%474, %c0_121, %c0_122], %477 {strides = array<i32>} : memref<16x8x16xf32, #tpu.memory_space<vmem>>, vector<1x8x16xf32>,
    %478 = arith.addi %3, %c5_i32 : i32
    %c15_i32_123 = arith.constant 15 : i32
    %479 = arith.subi %c15_i32_123, %478 : i32
    %480 = arith.index_cast %479 : i32 to index
    %c0_124 = arith.constant 0 : index
    %c0_125 = arith.constant 0 : index
    %481 = vector.load %arg12[%480, %c0_124, %c0_125] : memref<16x8x16xf32, #tpu.memory_space<vmem>>, vector<1x8x16xf32>
    %482 = vector.shape_cast %481 : vector<1x8x16xf32> to vector<8x16xf32>
    %483 = vector.shape_cast %472 : vector<8x16xf32> to vector<1x8x16xf32>
    tpu.vector_store %arg12[%480, %c0_124, %c0_125], %483 {strides = array<i32>} : memref<16x8x16xf32, #tpu.memory_space<vmem>>, vector<1x8x16xf32>,
    %484 = tpu.concatenate %446, %472 in 1 : vector<8x16xf32>, vector<8x16xf32> -> vector<8x32xf32>
    %c6_i32 = arith.constant 6 : i32
    %485 = vector.extract_strided_slice %484 {offsets = [0, 0], sizes = [8, 16], strides = [1, 1]} : vector<8x32xf32> to vector<8x16xf32>
    %486 = vector.extract_strided_slice %484 {offsets = [0, 16], sizes = [8, 16], strides = [1, 1]} : vector<8x32xf32> to vector<8x16xf32>
    %487 = arith.index_cast %c6_i32 : i32 to index
    %c0_126 = arith.constant 0 : index
    %c0_127 = arith.constant 0 : index
    %488 = vector.load %arg1[%487, %c0_126, %c0_127] : memref<8x8x48xbf16, #tpu.memory_space<vmem>>, vector<1x8x48xbf16>
    %489 = vector.shape_cast %488 : vector<1x8x48xbf16> to vector<8x48xbf16>
    %490 = arith.extf %489 : vector<8x48xbf16> to vector<8x48xf32>
    %c7_i32_128 = arith.constant 7 : i32
    %491 = arith.subi %c7_i32_128, %c6_i32 : i32
    %492 = arith.index_cast %491 : i32 to index
    %c0_129 = arith.constant 0 : index
    %c0_130 = arith.constant 0 : index
    %493 = vector.load %arg2[%492, %c0_129, %c0_130] : memref<8x8x48xbf16, #tpu.memory_space<vmem>>, vector<1x8x48xbf16>
    %494 = vector.shape_cast %493 : vector<1x8x48xbf16> to vector<8x48xbf16>
    %495 = arith.extf %494 : vector<8x48xbf16> to vector<8x48xf32>
    %c0_131 = arith.constant 0 : index
    %c0_132 = arith.constant 0 : index
    %496 = vector.load %arg3[%c0_131, %c0_132] : memref<32x96xf32, #tpu.memory_space<vmem>>, vector<32x96xf32>
    %cst_133 = arith.constant dense<0.000000e+00> : vector<8x96xf32>
    %497 = tpu.matmul %484, %496, %cst_133 {dimension_numbers = #tpu.dot_dimension_numbers<[1], [0], [0], [1], [0, 0, 1, 1], [], []>} : vector<8x32xf32>, vector<32x96xf32>, vector<8x96xf32> -> vector<8x96xf32>
    %c0_134 = arith.constant 0 : index
    %c0_135 = arith.constant 0 : index
    %498 = vector.load %arg4[%c0_134, %c0_135] : memref<1x96xf32, #tpu.memory_space<vmem>>, vector<1x96xf32>
    %499 = vector.broadcast %498 : vector<1x96xf32> to vector<8x96xf32>
    %500 = arith.addf %497, %499 : vector<8x96xf32>
    %501 = vector.extract_strided_slice %490 {offsets = [0, 0], sizes = [8, 16], strides = [1, 1]} : vector<8x48xf32> to vector<8x16xf32>
    %502 = vector.extract_strided_slice %500 {offsets = [0, 0], sizes = [8, 16], strides = [1, 1]} : vector<8x96xf32> to vector<8x16xf32>
    %503 = arith.addf %501, %502 : vector<8x16xf32>
    %504 = arith.negf %503 : vector<8x16xf32>
    %505 = math.exp %504 : vector<8x16xf32>
    %cst_136 = arith.constant 1.000000e+00 : f32
    %506 = vector.broadcast %cst_136 : f32 to vector<8x16xf32>
    %507 = arith.addf %506, %505 : vector<8x16xf32>
    %508 = arith.divf %506, %507 : vector<8x16xf32>
    %509 = vector.extract_strided_slice %490 {offsets = [0, 16], sizes = [8, 16], strides = [1, 1]} : vector<8x48xf32> to vector<8x16xf32>
    %510 = vector.extract_strided_slice %500 {offsets = [0, 16], sizes = [8, 16], strides = [1, 1]} : vector<8x96xf32> to vector<8x16xf32>
    %511 = arith.addf %509, %510 : vector<8x16xf32>
    %512 = arith.negf %511 : vector<8x16xf32>
    %513 = math.exp %512 : vector<8x16xf32>
    %cst_137 = arith.constant 1.000000e+00 : f32
    %514 = vector.broadcast %cst_137 : f32 to vector<8x16xf32>
    %515 = arith.addf %514, %513 : vector<8x16xf32>
    %516 = arith.divf %514, %515 : vector<8x16xf32>
    %517 = vector.extract_strided_slice %490 {offsets = [0, 32], sizes = [8, 16], strides = [1, 1]} : vector<8x48xf32> to vector<8x16xf32>
    %518 = vector.extract_strided_slice %500 {offsets = [0, 32], sizes = [8, 16], strides = [1, 1]} : vector<8x96xf32> to vector<8x16xf32>
    %519 = arith.mulf %508, %518 : vector<8x16xf32>
    %520 = arith.addf %517, %519 : vector<8x16xf32>
    %521 = math.tanh %520 : vector<8x16xf32>
    %cst_138 = arith.constant 1.000000e+00 : f32
    %522 = vector.broadcast %cst_138 : f32 to vector<8x16xf32>
    %523 = arith.subf %522, %516 : vector<8x16xf32>
    %524 = arith.mulf %523, %521 : vector<8x16xf32>
    %525 = arith.mulf %516, %485 : vector<8x16xf32>
    %526 = arith.addf %524, %525 : vector<8x16xf32>
    %527 = vector.extract_strided_slice %495 {offsets = [0, 0], sizes = [8, 16], strides = [1, 1]} : vector<8x48xf32> to vector<8x16xf32>
    %528 = vector.extract_strided_slice %500 {offsets = [0, 48], sizes = [8, 16], strides = [1, 1]} : vector<8x96xf32> to vector<8x16xf32>
    %529 = arith.addf %527, %528 : vector<8x16xf32>
    %530 = arith.negf %529 : vector<8x16xf32>
    %531 = math.exp %530 : vector<8x16xf32>
    %cst_139 = arith.constant 1.000000e+00 : f32
    %532 = vector.broadcast %cst_139 : f32 to vector<8x16xf32>
    %533 = arith.addf %532, %531 : vector<8x16xf32>
    %534 = arith.divf %532, %533 : vector<8x16xf32>
    %535 = vector.extract_strided_slice %495 {offsets = [0, 16], sizes = [8, 16], strides = [1, 1]} : vector<8x48xf32> to vector<8x16xf32>
    %536 = vector.extract_strided_slice %500 {offsets = [0, 64], sizes = [8, 16], strides = [1, 1]} : vector<8x96xf32> to vector<8x16xf32>
    %537 = arith.addf %535, %536 : vector<8x16xf32>
    %538 = arith.negf %537 : vector<8x16xf32>
    %539 = math.exp %538 : vector<8x16xf32>
    %cst_140 = arith.constant 1.000000e+00 : f32
    %540 = vector.broadcast %cst_140 : f32 to vector<8x16xf32>
    %541 = arith.addf %540, %539 : vector<8x16xf32>
    %542 = arith.divf %540, %541 : vector<8x16xf32>
    %543 = vector.extract_strided_slice %495 {offsets = [0, 32], sizes = [8, 16], strides = [1, 1]} : vector<8x48xf32> to vector<8x16xf32>
    %544 = vector.extract_strided_slice %500 {offsets = [0, 80], sizes = [8, 16], strides = [1, 1]} : vector<8x96xf32> to vector<8x16xf32>
    %545 = arith.mulf %534, %544 : vector<8x16xf32>
    %546 = arith.addf %543, %545 : vector<8x16xf32>
    %547 = math.tanh %546 : vector<8x16xf32>
    %cst_141 = arith.constant 1.000000e+00 : f32
    %548 = vector.broadcast %cst_141 : f32 to vector<8x16xf32>
    %549 = arith.subf %548, %542 : vector<8x16xf32>
    %550 = arith.mulf %549, %547 : vector<8x16xf32>
    %551 = arith.mulf %542, %486 : vector<8x16xf32>
    %552 = arith.addf %550, %551 : vector<8x16xf32>
    %553 = arith.addi %3, %c6_i32 : i32
    %554 = arith.index_cast %553 : i32 to index
    %c0_142 = arith.constant 0 : index
    %c0_143 = arith.constant 0 : index
    %555 = vector.load %arg11[%554, %c0_142, %c0_143] : memref<16x8x16xf32, #tpu.memory_space<vmem>>, vector<1x8x16xf32>
    %556 = vector.shape_cast %555 : vector<1x8x16xf32> to vector<8x16xf32>
    %557 = vector.shape_cast %526 : vector<8x16xf32> to vector<1x8x16xf32>
    tpu.vector_store %arg11[%554, %c0_142, %c0_143], %557 {strides = array<i32>} : memref<16x8x16xf32, #tpu.memory_space<vmem>>, vector<1x8x16xf32>,
    %558 = arith.addi %3, %c6_i32 : i32
    %c15_i32_144 = arith.constant 15 : i32
    %559 = arith.subi %c15_i32_144, %558 : i32
    %560 = arith.index_cast %559 : i32 to index
    %c0_145 = arith.constant 0 : index
    %c0_146 = arith.constant 0 : index
    %561 = vector.load %arg12[%560, %c0_145, %c0_146] : memref<16x8x16xf32, #tpu.memory_space<vmem>>, vector<1x8x16xf32>
    %562 = vector.shape_cast %561 : vector<1x8x16xf32> to vector<8x16xf32>
    %563 = vector.shape_cast %552 : vector<8x16xf32> to vector<1x8x16xf32>
    tpu.vector_store %arg12[%560, %c0_145, %c0_146], %563 {strides = array<i32>} : memref<16x8x16xf32, #tpu.memory_space<vmem>>, vector<1x8x16xf32>,
    %564 = tpu.concatenate %526, %552 in 1 : vector<8x16xf32>, vector<8x16xf32> -> vector<8x32xf32>
    %c7_i32_147 = arith.constant 7 : i32
    %565 = vector.extract_strided_slice %564 {offsets = [0, 0], sizes = [8, 16], strides = [1, 1]} : vector<8x32xf32> to vector<8x16xf32>
    %566 = vector.extract_strided_slice %564 {offsets = [0, 16], sizes = [8, 16], strides = [1, 1]} : vector<8x32xf32> to vector<8x16xf32>
    %567 = arith.index_cast %c7_i32_147 : i32 to index
    %c0_148 = arith.constant 0 : index
    %c0_149 = arith.constant 0 : index
    %568 = vector.load %arg1[%567, %c0_148, %c0_149] : memref<8x8x48xbf16, #tpu.memory_space<vmem>>, vector<1x8x48xbf16>
    %569 = vector.shape_cast %568 : vector<1x8x48xbf16> to vector<8x48xbf16>
    %570 = arith.extf %569 : vector<8x48xbf16> to vector<8x48xf32>
    %c7_i32_150 = arith.constant 7 : i32
    %571 = arith.subi %c7_i32_150, %c7_i32_147 : i32
    %572 = arith.index_cast %571 : i32 to index
    %c0_151 = arith.constant 0 : index
    %c0_152 = arith.constant 0 : index
    %573 = vector.load %arg2[%572, %c0_151, %c0_152] : memref<8x8x48xbf16, #tpu.memory_space<vmem>>, vector<1x8x48xbf16>
    %574 = vector.shape_cast %573 : vector<1x8x48xbf16> to vector<8x48xbf16>
    %575 = arith.extf %574 : vector<8x48xbf16> to vector<8x48xf32>
    %c0_153 = arith.constant 0 : index
    %c0_154 = arith.constant 0 : index
    %576 = vector.load %arg3[%c0_153, %c0_154] : memref<32x96xf32, #tpu.memory_space<vmem>>, vector<32x96xf32>
    %cst_155 = arith.constant dense<0.000000e+00> : vector<8x96xf32>
    %577 = tpu.matmul %564, %576, %cst_155 {dimension_numbers = #tpu.dot_dimension_numbers<[1], [0], [0], [1], [0, 0, 1, 1], [], []>} : vector<8x32xf32>, vector<32x96xf32>, vector<8x96xf32> -> vector<8x96xf32>
    %c0_156 = arith.constant 0 : index
    %c0_157 = arith.constant 0 : index
    %578 = vector.load %arg4[%c0_156, %c0_157] : memref<1x96xf32, #tpu.memory_space<vmem>>, vector<1x96xf32>
    %579 = vector.broadcast %578 : vector<1x96xf32> to vector<8x96xf32>
    %580 = arith.addf %577, %579 : vector<8x96xf32>
    %581 = vector.extract_strided_slice %570 {offsets = [0, 0], sizes = [8, 16], strides = [1, 1]} : vector<8x48xf32> to vector<8x16xf32>
    %582 = vector.extract_strided_slice %580 {offsets = [0, 0], sizes = [8, 16], strides = [1, 1]} : vector<8x96xf32> to vector<8x16xf32>
    %583 = arith.addf %581, %582 : vector<8x16xf32>
    %584 = arith.negf %583 : vector<8x16xf32>
    %585 = math.exp %584 : vector<8x16xf32>
    %cst_158 = arith.constant 1.000000e+00 : f32
    %586 = vector.broadcast %cst_158 : f32 to vector<8x16xf32>
    %587 = arith.addf %586, %585 : vector<8x16xf32>
    %588 = arith.divf %586, %587 : vector<8x16xf32>
    %589 = vector.extract_strided_slice %570 {offsets = [0, 16], sizes = [8, 16], strides = [1, 1]} : vector<8x48xf32> to vector<8x16xf32>
    %590 = vector.extract_strided_slice %580 {offsets = [0, 16], sizes = [8, 16], strides = [1, 1]} : vector<8x96xf32> to vector<8x16xf32>
    %591 = arith.addf %589, %590 : vector<8x16xf32>
    %592 = arith.negf %591 : vector<8x16xf32>
    %593 = math.exp %592 : vector<8x16xf32>
    %cst_159 = arith.constant 1.000000e+00 : f32
    %594 = vector.broadcast %cst_159 : f32 to vector<8x16xf32>
    %595 = arith.addf %594, %593 : vector<8x16xf32>
    %596 = arith.divf %594, %595 : vector<8x16xf32>
    %597 = vector.extract_strided_slice %570 {offsets = [0, 32], sizes = [8, 16], strides = [1, 1]} : vector<8x48xf32> to vector<8x16xf32>
    %598 = vector.extract_strided_slice %580 {offsets = [0, 32], sizes = [8, 16], strides = [1, 1]} : vector<8x96xf32> to vector<8x16xf32>
    %599 = arith.mulf %588, %598 : vector<8x16xf32>
    %600 = arith.addf %597, %599 : vector<8x16xf32>
    %601 = math.tanh %600 : vector<8x16xf32>
    %cst_160 = arith.constant 1.000000e+00 : f32
    %602 = vector.broadcast %cst_160 : f32 to vector<8x16xf32>
    %603 = arith.subf %602, %596 : vector<8x16xf32>
    %604 = arith.mulf %603, %601 : vector<8x16xf32>
    %605 = arith.mulf %596, %565 : vector<8x16xf32>
    %606 = arith.addf %604, %605 : vector<8x16xf32>
    %607 = vector.extract_strided_slice %575 {offsets = [0, 0], sizes = [8, 16], strides = [1, 1]} : vector<8x48xf32> to vector<8x16xf32>
    %608 = vector.extract_strided_slice %580 {offsets = [0, 48], sizes = [8, 16], strides = [1, 1]} : vector<8x96xf32> to vector<8x16xf32>
    %609 = arith.addf %607, %608 : vector<8x16xf32>
    %610 = arith.negf %609 : vector<8x16xf32>
    %611 = math.exp %610 : vector<8x16xf32>
    %cst_161 = arith.constant 1.000000e+00 : f32
    %612 = vector.broadcast %cst_161 : f32 to vector<8x16xf32>
    %613 = arith.addf %612, %611 : vector<8x16xf32>
    %614 = arith.divf %612, %613 : vector<8x16xf32>
    %615 = vector.extract_strided_slice %575 {offsets = [0, 16], sizes = [8, 16], strides = [1, 1]} : vector<8x48xf32> to vector<8x16xf32>
    %616 = vector.extract_strided_slice %580 {offsets = [0, 64], sizes = [8, 16], strides = [1, 1]} : vector<8x96xf32> to vector<8x16xf32>
    %617 = arith.addf %615, %616 : vector<8x16xf32>
    %618 = arith.negf %617 : vector<8x16xf32>
    %619 = math.exp %618 : vector<8x16xf32>
    %cst_162 = arith.constant 1.000000e+00 : f32
    %620 = vector.broadcast %cst_162 : f32 to vector<8x16xf32>
    %621 = arith.addf %620, %619 : vector<8x16xf32>
    %622 = arith.divf %620, %621 : vector<8x16xf32>
    %623 = vector.extract_strided_slice %575 {offsets = [0, 32], sizes = [8, 16], strides = [1, 1]} : vector<8x48xf32> to vector<8x16xf32>
    %624 = vector.extract_strided_slice %580 {offsets = [0, 80], sizes = [8, 16], strides = [1, 1]} : vector<8x96xf32> to vector<8x16xf32>
    %625 = arith.mulf %614, %624 : vector<8x16xf32>
    %626 = arith.addf %623, %625 : vector<8x16xf32>
    %627 = math.tanh %626 : vector<8x16xf32>
    %cst_163 = arith.constant 1.000000e+00 : f32
    %628 = vector.broadcast %cst_163 : f32 to vector<8x16xf32>
    %629 = arith.subf %628, %622 : vector<8x16xf32>
    %630 = arith.mulf %629, %627 : vector<8x16xf32>
    %631 = arith.mulf %622, %566 : vector<8x16xf32>
    %632 = arith.addf %630, %631 : vector<8x16xf32>
    %633 = arith.addi %3, %c7_i32_147 : i32
    %634 = arith.index_cast %633 : i32 to index
    %c0_164 = arith.constant 0 : index
    %c0_165 = arith.constant 0 : index
    %635 = vector.load %arg11[%634, %c0_164, %c0_165] : memref<16x8x16xf32, #tpu.memory_space<vmem>>, vector<1x8x16xf32>
    %636 = vector.shape_cast %635 : vector<1x8x16xf32> to vector<8x16xf32>
    %637 = vector.shape_cast %606 : vector<8x16xf32> to vector<1x8x16xf32>
    tpu.vector_store %arg11[%634, %c0_164, %c0_165], %637 {strides = array<i32>} : memref<16x8x16xf32, #tpu.memory_space<vmem>>, vector<1x8x16xf32>,
    %638 = arith.addi %3, %c7_i32_147 : i32
    %c15_i32_166 = arith.constant 15 : i32
    %639 = arith.subi %c15_i32_166, %638 : i32
    %640 = arith.index_cast %639 : i32 to index
    %c0_167 = arith.constant 0 : index
    %c0_168 = arith.constant 0 : index
    %641 = vector.load %arg12[%640, %c0_167, %c0_168] : memref<16x8x16xf32, #tpu.memory_space<vmem>>, vector<1x8x16xf32>
    %642 = vector.shape_cast %641 : vector<1x8x16xf32> to vector<8x16xf32>
    %643 = vector.shape_cast %632 : vector<8x16xf32> to vector<1x8x16xf32>
    tpu.vector_store %arg12[%640, %c0_167, %c0_168], %643 {strides = array<i32>} : memref<16x8x16xf32, #tpu.memory_space<vmem>>, vector<1x8x16xf32>,
    %644 = tpu.concatenate %606, %632 in 1 : vector<8x16xf32>, vector<8x16xf32> -> vector<8x32xf32>
    %c8_i32_169 = arith.constant 8 : i32
    %c0_170 = arith.constant 0 : index
    %c0_171 = arith.constant 0 : index
    %645 = vector.load %arg10[%c0_170, %c0_171] : memref<8x32xf32, #tpu.memory_space<vmem>>, vector<8x32xf32>
    tpu.vector_store %arg10[%c0_170, %c0_171], %644 {strides = array<i32>} : memref<8x32xf32, #tpu.memory_space<vmem>>, vector<8x32xf32>,
    %c1_i32_172 = arith.constant 1 : i32
    %646 = arith.cmpi eq, %arg0, %c1_i32_172 : i32
    %647 = arith.extui %646 : i1 to i32
    %c0_i32_173 = arith.constant 0 : i32
    %648 = arith.cmpi ne, %647, %c0_i32_173 : i32
    scf.if %648 {
      %c0_174 = arith.constant 0 : index
      %c0_175 = arith.constant 0 : index
      %c0_176 = arith.constant 0 : index
      %649 = vector.load %arg11[%c0_174, %c0_175, %c0_176] : memref<16x8x16xf32, #tpu.memory_space<vmem>>, vector<16x8x16xf32>
      %c0_177 = arith.constant 0 : index
      %c0_178 = arith.constant 0 : index
      %c0_179 = arith.constant 0 : index
      %650 = vector.load %arg12[%c0_177, %c0_178, %c0_179] : memref<16x8x16xf32, #tpu.memory_space<vmem>>, vector<16x8x16xf32>
      %651 = vector.shape_cast %649 : vector<16x8x16xf32> to vector<128x16xf32>
      %652 = arith.truncf %651 : vector<128x16xf32> to vector<128x16xbf16>
      %653 = vector.shape_cast %650 : vector<16x8x16xf32> to vector<128x16xf32>
      %654 = arith.truncf %653 : vector<128x16xf32> to vector<128x16xbf16>
      %c0_180 = arith.constant 0 : index
      %c0_181 = arith.constant 0 : index
      %655 = vector.load %arg5[%c0_180, %c0_181] : memref<32x16xbf16, #tpu.memory_space<vmem>>, vector<16x16xbf16>
      %cst_182 = arith.constant dense<0.000000e+00> : vector<128x16xf32>
      %656 = tpu.matmul %652, %655, %cst_182 {dimension_numbers = #tpu.dot_dimension_numbers<[1], [0], [0], [1], [0, 0, 1, 1], [], []>} : vector<128x16xbf16>, vector<16x16xbf16>, vector<128x16xf32> -> vector<128x16xf32>
      %c16 = arith.constant 16 : index
      %c0_183 = arith.constant 0 : index
      %657 = vector.load %arg5[%c16, %c0_183] : memref<32x16xbf16, #tpu.memory_space<vmem>>, vector<16x16xbf16>
      %cst_184 = arith.constant dense<0.000000e+00> : vector<128x16xf32>
      %658 = tpu.matmul %654, %657, %cst_184 {dimension_numbers = #tpu.dot_dimension_numbers<[1], [0], [0], [1], [0, 0, 1, 1], [], []>} : vector<128x16xbf16>, vector<16x16xbf16>, vector<128x16xf32> -> vector<128x16xf32>
      %659 = arith.addf %656, %658 : vector<128x16xf32>
      %c0_185 = arith.constant 0 : index
      %c0_186 = arith.constant 0 : index
      %660 = vector.load %arg6[%c0_185, %c0_186] : memref<1x16xf32, #tpu.memory_space<vmem>>, vector<1x16xf32>
      %661 = vector.broadcast %660 : vector<1x16xf32> to vector<128x16xf32>
      %662 = arith.addf %659, %661 : vector<128x16xf32>
      %663 = math.tanh %662 : vector<128x16xf32>
      %c0_187 = arith.constant 0 : index
      %c0_188 = arith.constant 0 : index
      %664 = vector.load %arg7[%c0_187, %c0_188] : memref<1x16xf32, #tpu.memory_space<vmem>>, vector<1x16xf32>
      %665 = vector.broadcast %664 : vector<1x16xf32> to vector<128x16xf32>
      %666 = arith.mulf %663, %665 : vector<128x16xf32>
      %cst_189 = arith.constant dense<0.000000e+00> : vector<128xf32>
      %667 = vector.multi_reduction <add>, %666, %cst_189 [1] : vector<128x16xf32> to vector<128xf32>
      %668 = vector.shape_cast %667 : vector<128xf32> to vector<128x1xf32>
      %c0_190 = arith.constant 0 : index
      %c0_191 = arith.constant 0 : index
      %669 = vector.load %arg8[%c0_190, %c0_191] : memref<1x1xf32, #tpu.memory_space<vmem>>, vector<1x1xf32>
      %670 = vector.broadcast %669 : vector<1x1xf32> to vector<128x1xf32>
      %671 = arith.addf %668, %670 : vector<128x1xf32>
      %672 = vector.shape_cast %671 : vector<128x1xf32> to vector<16x8x1xf32>
      %cst_192 = arith.constant dense<0xFF800000> : vector<8x1xf32>
      %673 = vector.multi_reduction <maximumf>, %672, %cst_192 [0] : vector<16x8x1xf32> to vector<8x1xf32>
      %674 = vector.shape_cast %673 : vector<8x1xf32> to vector<1x8x1xf32>
      %675 = vector.broadcast %674 : vector<1x8x1xf32> to vector<16x8x1xf32>
      %676 = arith.subf %672, %675 : vector<16x8x1xf32>
      %677 = math.exp %676 : vector<16x8x1xf32>
      %cst_193 = arith.constant dense<0.000000e+00> : vector<8x1xf32>
      %678 = vector.multi_reduction <add>, %677, %cst_193 [0] : vector<16x8x1xf32> to vector<8x1xf32>
      %679 = vector.shape_cast %678 : vector<8x1xf32> to vector<1x8x1xf32>
      %680 = tpu.reciprocal %679 {approx = true} : vector<1x8x1xf32> -> vector<1x8x1xf32>
      %681 = vector.broadcast %680 : vector<1x8x1xf32> to vector<16x8x1xf32>
      %682 = arith.mulf %677, %681 : vector<16x8x1xf32>
      %683 = vector.broadcast %682 : vector<16x8x1xf32> to vector<16x8x16xf32>
      %684 = arith.mulf %683, %649 : vector<16x8x16xf32>
      %cst_194 = arith.constant dense<0.000000e+00> : vector<8x16xf32>
      %685 = vector.multi_reduction <add>, %684, %cst_194 [0] : vector<16x8x16xf32> to vector<8x16xf32>
      %686 = vector.broadcast %682 : vector<16x8x1xf32> to vector<16x8x16xf32>
      %687 = arith.mulf %686, %650 : vector<16x8x16xf32>
      %cst_195 = arith.constant dense<0.000000e+00> : vector<8x16xf32>
      %688 = vector.multi_reduction <add>, %687, %cst_195 [0] : vector<16x8x16xf32> to vector<8x16xf32>
      %cst_196 = arith.constant 0.000000e+00 : f32
      %689 = vector.broadcast %cst_196 : f32 to vector<8x96xf32>
      %690 = tpu.concatenate %685, %688, %689 in 1 : vector<8x16xf32>, vector<8x16xf32>, vector<8x96xf32> -> vector<8x128xf32>
      %c0_197 = arith.constant 0 : index
      %c0_198 = arith.constant 0 : index
      %691 = vector.load %arg9[%c0_197, %c0_198] : memref<8x128xf32, #tpu.memory_space<vmem>>, vector<8x128xf32>
      tpu.vector_store %arg9[%c0_197, %c0_198], %690 {strides = array<i32>} : memref<8x128xf32, #tpu.memory_space<vmem>>, vector<8x128xf32>,
    } else {
    }
    return
  }
  func.func @transform_0(%arg0: i32) -> (i32, i32, i32) {
    %c0_i32 = arith.constant 0 : i32
    %c0_i32_0 = arith.constant 0 : i32
    %c0_i32_1 = arith.constant 0 : i32
    return %arg0, %c0_i32, %c0_i32_0 : i32, i32, i32
  }
  func.func @transform_1(%arg0: i32) -> (i32, i32, i32) {
    %c1_i32 = arith.constant 1 : i32
    %0 = arith.subi %c1_i32, %arg0 : i32
    %c0_i32 = arith.constant 0 : i32
    %c0_i32_0 = arith.constant 0 : i32
    %c0_i32_1 = arith.constant 0 : i32
    return %0, %c0_i32, %c0_i32_0 : i32, i32, i32
  }
  func.func @transform_2(%arg0: i32) -> (i32, i32) {
    %c0_i32 = arith.constant 0 : i32
    %c0_i32_0 = arith.constant 0 : i32
    %c0_i32_1 = arith.constant 0 : i32
    return %c0_i32, %c0_i32_0 : i32, i32
  }
  func.func @transform_3(%arg0: i32) -> (i32, i32) {
    %c0_i32 = arith.constant 0 : i32
    %c0_i32_0 = arith.constant 0 : i32
    %c0_i32_1 = arith.constant 0 : i32
    return %c0_i32, %c0_i32_0 : i32, i32
  }
  func.func @transform_4(%arg0: i32) -> (i32, i32) {
    %c0_i32 = arith.constant 0 : i32
    %c0_i32_0 = arith.constant 0 : i32
    %c0_i32_1 = arith.constant 0 : i32
    return %c0_i32, %c0_i32_0 : i32, i32
  }
  func.func @transform_5(%arg0: i32) -> (i32, i32) {
    %c0_i32 = arith.constant 0 : i32
    %c0_i32_0 = arith.constant 0 : i32
    %c0_i32_1 = arith.constant 0 : i32
    return %c0_i32, %c0_i32_0 : i32, i32
  }
  func.func @transform_6(%arg0: i32) -> (i32, i32) {
    %c0_i32 = arith.constant 0 : i32
    %c0_i32_0 = arith.constant 0 : i32
    %c0_i32_1 = arith.constant 0 : i32
    return %c0_i32, %c0_i32_0 : i32, i32
  }
  func.func @transform_7(%arg0: i32) -> (i32, i32) {
    %c0_i32 = arith.constant 0 : i32
    %c0_i32_0 = arith.constant 0 : i32
    %c0_i32_1 = arith.constant 0 : i32
    return %c0_i32, %c0_i32_0 : i32, i32
  }
  func.func @transform_8(%arg0: i32) -> (i32, i32) {
    %c0_i32 = arith.constant 0 : i32
    %c0_i32_0 = arith.constant 0 : i32
    %c0_i32_1 = arith.constant 0 : i32
    return %c0_i32, %c0_i32_0 : i32, i32
  }
}

</mosaic_0001>

<bundles_post_ra>
// kernel: comment_embedding_forward.1
= control target key start
LH: loop header
LB: loop body
LE: loop exit
PB: predicated region body
PF: predicated region fallthrough
CT: control target
= control target key end

     0   :  { %s2537_s29 = smov 0   ;;  %s3231_s0 = inlined_call_operand.vmem [shape: bf16[16,8,48], index: 0, kind: input, shape index: {}]   ;;  %s3232_s1 = inlined_call_operand.vmem [shape: bf16[16,8,48], index: 1, kind: input, shape index: {}]   ;;  %s3233_s2 = inlined_call_operand.vmem [shape: f32[32,96], index: 2, kind: input, shape index: {}]   ;;  %s3234_s3 = inlined_call_operand.vmem [shape: f32[1,96], index: 3, kind: input, shape index: {}]   ;;  %s3235_s4 = inlined_call_operand.vmem [shape: bf16[32,16], index: 4, kind: input, shape index: {}]   ;;  %s3236_s5 = inlined_call_operand.vmem [shape: f32[1,16], index: 5, kind: input, shape index: {}]   ;;  %s3237_s6 = inlined_call_operand.vmem [shape: f32[1,16], index: 6, kind: input, shape index: {}]   ;;  %s3238_s7 = inlined_call_operand.<no memory space> [shape: f32[1,1], index: 7, kind: input, shape index: {}]   ;;  %s3239_s8 = inlined_call_operand.vmem [shape: f32[8,128], index: 8, kind: output, shape index: {}]  }
   0x1   :  { %v13_v0 = vstv %s3238_s7 }
   0x2   :  { %14 = vst [vmem:[#allocation5] sm:$0x1] %v13_v0 }
   0x3 LB: > { %s2543_s30 = sadd.s32 4294967295, %s2478_s29   ;;  %p2165_p0 = scmp.ge.s32.totalorder %s2478_s29, 1  ;;  %s2478_s29 = sphi %s2537_s29, %s20_s29  }
   0x4   : > { %p275_p1 = scmp.lt.s32.totalorder %s2478_s29, 3 }
   0x6   : > { %p276_p2 = pnand %p2165_p0, %p275_p1 }
   0x7   : > { %s2548_s7 = sshll.u32 (!%p276_p2), %s2543_s30, 3  ;;  %s316_s9 = ssub.s32 (!%p276_p2), 1, %s2543_s30 }
   0x8   : > { %279 = sbr.rel (%p276_p2) target bundleno = 5233 (0x1471), region = 52  ;;  %p311_p3 = scmp.lt.s32.totalorder (!%p276_p2), %s2548_s7, 15 }
   0x9   : > { %s2168_s10 = sshll.u32 (!%p276_p2), %s316_s9, 3  ;;  %p2170_p5 = scmp.ne.s32.totalorder (!%p276_p2), %s2543_s30, 0 }
   0xa   : > { %p318_p4 = scmp.lt.s32.totalorder (!%p276_p2), %s2168_s10, 15 }
   0xd   : > { %s312_s11 = scalar_select %p311_p3, %s2548_s7, 15 }
   0xe   : > { %s3259_s10 = smov (!%p318_p4, %s2168_s10), 15  ;;  %328 = sbr.rel (%p2170_p5) target bundleno = 21 (0x15), region = 56 }
   0xf   : > { %s2167_s12 = sshll.u32 %s312_s11, 2  ;;  %s2169_s16 = sshll.u32 %s3259_s10, 2 }
  0x10   : > { %s2556_s15 = scalar_lea.vmem %s3231_s0, %s2167_s12  ;;  %s2561_s19 = scalar_lea.vmem %s3232_s1, %s2169_s16 }
  0x13   : > { %vm329_vm0 = vcmask 261120   ;;  %v2480_v1 = vmov 0.0  }
  0x14   : > { %330 = vst.msk [vmem:[#allocation2] sm:$0xff] %vm329_vm0, %v2480_v1 }
  0x15 PF: > { %v341_v2 = vld [vmem:[%s3233_s2 + $0x18] sm:$0xff]  ;;  %v340_v3 = vld [vmem:[%s3233_s2 + $0x10] sm:$0xff]  ;;  %v339_v4 = vld [vmem:[%s3233_s2 + $0x8] sm:$0xff]  ;;  %vm346_vm1 = vcmask 261120   ;;  %s2481_s10 = smov 48   ;;  %s2482_s11 = smov 96  }
  0x16   : > { %362 = vmatpush.msra.mxu0 %v341_v2  ;;  %499 = vmatpush.msra.mxu1 %v341_v2  ;;  %v338_v5 = vld [vmem:[%s3233_s2] sm:$0xff]  ;;  %s2483_s12 = smov 80   ;;  %s2484_s13 = smov 16   ;;  %v2593_v28 = vld [vmem:[%s2561_s19 + $0x18] sm:$0xff]   ;;  %vm459_vm10 = vcmask 130048  }
  0x17   : > { %636 = vmatpush.msra.mxu2 %v341_v2  ;;  %773 = vmatpush.msra.mxu3 %v341_v2  ;;  %v2296_v7 = vld [vmem:[%s3234_s3] ss:$0 sm:$0xff]  ;;  %s2485_s14 = smov 32   ;;  %v337_v29 = vunpack.c.h.bf16 %v2593_v28  ;;  %s2486_s16 = smov 112  }
  0x18   : > { %363 = vmatpush.msra.mxu0 %v340_v3  ;;  %500 = vmatpush.msra.mxu1 %v340_v3  ;;  %v2589_v10 = vld [vmem:[%s2556_s15] sm:$0xff]   ;;  %s2267_s17 = sshll.u32 %s2543_s30, 6  ;;  %s872_s20 = ssub.s32 12, %s2548_s7 }
  0x19   : > { %637 = vmatpush.msra.mxu2 %v340_v3  ;;  %774 = vmatpush.msra.mxu3 %v340_v3  ;;  %v334_v11 = vunpack.c.l.bf16 %v2589_v10  ;;  %s2605_s18 = scalar_lea.vmem [#allocation3], %s2267_s17  ;;  %s735_s17 = ssub.s32 13, %s2548_s7 }
  0x1a   : > { %364 = vmatpush.msra.mxu0 %v339_v4  ;;  %501 = vmatpush.msra.mxu1 %v339_v4  ;;  %s1009_s21 = ssub.s32 11, %s2548_s7  ;;  %s2195_s22 = sshll.u32 %s735_s17, 3 }
  0x1b   : > { %v2576_v6 = vld [vmem:[#allocation2] sm:$0xff]  ;;  %638 = vmatpush.msra.mxu2 %v339_v4  ;;  %775 = vmatpush.msra.mxu3 %v339_v4  ;;  %s2204_s23 = sshll.u32 %s872_s20, 3  ;;  %s2213_s24 = sshll.u32 %s1009_s21, 3 }
  0x1c   : > { %365 = vmatpush.msra.mxu0 %v338_v5  ;;  %502 = vmatpush.msra.mxu1 %v338_v5  ;;  %s1146_s25 = ssub.s32 10, %s2548_s7  ;;  %s741_s26 = scalar_lea.vmem [#allocation4], %s2195_s22 }
  0x1d   : > { %2173 = vmatmul.msk.f32.vlgmr.msra.gmra.mxu0 %vm346_vm1, %v2576_v6  ;;  %639 = vmatpush.msra.mxu2 %v338_v5  ;;  %s1283_s27 = ssub.s32 9, %s2548_s7  ;;  %s878_s28 = scalar_lea.vmem [#allocation4], %s2204_s23 }
  0x1e   : > { %776 = vmatpush.msra.mxu3 %v338_v5  ;;  %910 = vmatpush.msrb.mxu0 %v341_v2  ;;  %p2240_p6 = scmp.ne.s32.totalorder %s2543_s30, 1 }
  0x1f   : > { %1047 = vmatpush.msrb.mxu1 %v341_v2  ;;  %v2297_v2 = vld [vmem:[%s3234_s3] ss:$0 sm:$0xff] }
  0x20   : > { %911 = vmatpush.msrb.mxu0 %v340_v3 }
  0x21   : > { %1048 = vmatpush.msrb.mxu1 %v340_v3 }
  0x22   : > { %912 = vmatpush.msrb.mxu0 %v339_v4 }
  0x23   : > { %1049 = vmatpush.msrb.mxu1 %v339_v4 }
  0x24   : > { %913 = vmatpush.msrb.mxu0 %v338_v5 }
  0x25   : > { %1050 = vmatpush.msrb.mxu1 %v338_v5  ;;  %v472_v5 = vunpack.c.h.bf16 %v2589_v10 }
  0x9a   : > { %v367_v8 = vpop.f32.mrf.mxu0 }
  0x9b   : > { %v368_v9 = vadd.f32 %v2296_v7, %v367_v8 }
  0x9d   : > { %435 = vrot.lane.b32.xlu1 %v368_v9, %s2481_s10  ;;  %391 = vrot.lane.b32.xlu0 %v368_v9, %s2482_s11  ;;  %v370_v12 = vadd.f32 %v368_v9, %v334_v11 }
  0x9f   : > { %v2174_v13 = vmul.f32 -1.442695, %v370_v12 }
  0xa1   : > { %2304 = vpow2.f32 %v2174_v13 }
  0xa5   : > { %412 = vrot.lane.b32.xlu0 %v368_v9, %s2483_s12 }
  0xa7   : > { %v2305_v14 = vpop.eup %2304 }
  0xa8   : > { %v374_v15 = vadd.f32 1.0, %v2305_v14 }
  0xaa   : > { %2306 = vrcp.f32 %v374_v15  ;;  %v386_v21 = vand.u32 2147483648, %v374_v15  ;;  %vm380_vm3 = vweird.f32 %v374_v15  ;;  %v384_v22 = vand.u32 2147483647, %v374_v15 }
  0xac   : > { %v387_v24 = vor.u32 1.1754944e-38, %v386_v21  ;;  %vm385_vm5 = vcmp.eq.f32.partialorder %v384_v22, 8.507059e+37 }
  0xad   : > { %407 = vrot.lane.b32.xlu0 %v2576_v6, %s2484_s13 }
  0xb0   : > { %v2307_v16 = vpop.eup %2306 }
  0xb1   : > { %v376_v17 = vmul.f32 %v2307_v16, %v374_v15  ;;  %vm381_vm2 = vweird.f32 %v2307_v16 }
  0xb2   : > { %vm382_vm4 = vmor %vm380_vm3, %vm381_vm2 }
  0xb3   : > { %v377_v18 = vsub.f32 1.0, %v376_v17 }
  0xb5   : > { %v378_v19 = vmul.f32 %v2307_v16, %v377_v18  ;;  %v475_v18 = vunpack.c.l.bf16 %v2593_v28 }
  0xb7   : > { %v379_v20 = vadd.f32 %v2307_v16, %v378_v19 }
  0xb9   : > { %v383_v23 = vsel %vm382_vm4, %v2307_v16, %v379_v20 }
  0xba   : > { %v388_v26 = vsel %vm385_vm5, %v387_v24, %v383_v23 }
  0xbb   : > { %v401_v54 = vsub.f32 1.0, %v388_v26 }
 0x10f   : > { %v392_v25 = vpop.permute.xlu0 %391  ;;  %v436_v44 = vpop.permute.xlu1 %435 }
 0x110   : > { %v394_v27 = vmul.f32 %v392_v25, %v388_v26 }
 0x112   : > { %396 = vrot.lane.b32.xlu1 %v394_v27, %s2485_s14 }
 0x117   : > { %v413_v30 = vpop.permute.xlu0 %412 }
 0x118   : > { %v415_v31 = vadd.f32 %v413_v30, %v337_v29 }
 0x11a   : > { %v2175_v32 = vmul.f32 -1.442695, %v415_v31 }
 0x11c   : > { %2308 = vpow2.f32 %v2175_v32 }
 0x11f   : > { %v408_v53 = vpop.permute.xlu0 %407 }
 0x120   : > { %v410_v56 = vmul.f32 %v408_v53, %v388_v26 }
 0x122   : > { %v2309_v33 = vpop.eup %2308 }
 0x123   : > { %v419_v34 = vadd.f32 1.0, %v2309_v33 }
 0x125   : > { %2310 = vrcp.f32 %v419_v34  ;;  %v431_v38 = vand.u32 2147483648, %v419_v34  ;;  %v429_v40 = vand.u32 2147483647, %v419_v34  ;;  %vm425_vm7 = vweird.f32 %v419_v34 }
 0x127   : > { %v432_v42 = vor.u32 1.1754944e-38, %v431_v38  ;;  %vm430_vm9 = vcmp.eq.f32.partialorder %v429_v40, 8.507059e+37 }
 0x12b   : > { %v2311_v35 = vpop.eup %2310 }
 0x12c   : > { %v421_v36 = vmul.f32 %v2311_v35, %v419_v34  ;;  %vm426_vm6 = vweird.f32 %v2311_v35 }
 0x12d   : > { %vm427_vm8 = vmor %vm425_vm7, %vm426_vm6 }
 0x12e   : > { %v422_v37 = vsub.f32 1.0, %v421_v36 }
 0x130   : > { %v423_v39 = vmul.f32 %v2311_v35, %v422_v37 }
 0x132   : > { %v424_v41 = vadd.f32 %v2311_v35, %v423_v39 }
 0x134   : > { %v428_v43 = vsel %vm427_vm8, %v2311_v35, %v424_v41 }
 0x135   : > { %v433_v45 = vsel %vm430_vm9, %v432_v42, %v428_v43 }
 0x136   : > { %v438_v46 = vmul.f32 %v436_v44, %v433_v45  ;;  %v445_v60 = vsub.f32 1.0, %v433_v45  ;;  %v451_v62 = vmul.f32 %v433_v45, %v2576_v6 }
 0x138   : > { %440 = vrot.lane.b32.xlu2 %v438_v46, %s2485_s14 }
 0x184   : > { %v397_v47 = vpop.permute.xlu1 %396 }
 0x185   : > { %v399_v48 = vadd.f32 %v397_v47, %v334_v11 }
 0x187   : > { %2312 = vtanh.f32 %v399_v48 }
 0x18d   : > { %v2313_v49 = vpop.eup %2312 }
 0x18e   : > { %403 = vrot.lane.b32.xlu2 %v2313_v49, %s2486_s16 }
 0x192   : > { %v441_v50 = vpop.permute.xlu2 %440 }
 0x193   : > { %v443_v51 = vadd.f32 %v441_v50, %v337_v29 }
 0x195   : > { %2314 = vtanh.f32 %v443_v51 }
 0x19b   : > { %v2315_v52 = vpop.eup %2314 }
 0x19c   : > { %447 = vrot.lane.b32.xlu1 %v2315_v52, %s2486_s16 }
 0x1e8   : > { %v404_v55 = vpop.permute.xlu2 %403 }
 0x1e9   : > { %v406_v57 = vmul.f32 %v404_v55, %v401_v54 }
 0x1eb   : > { %v411_v58 = vadd.f32 %v410_v56, %v406_v57 }
 0x1ed   : > { %454 = vrot.lane.b32.xlu2 %v411_v58, %s2486_s16 }
 0x20e   : > { %v448_v59 = vpop.permute.xlu1 %447 }
 0x20f   : > { %v450_v61 = vmul.f32 %v448_v59, %v445_v60  ;;  %v2298_v59 = vld [vmem:[%s3234_s3] ss:$0 sm:$0xff] }
 0x211   : > { %v2603_v63 = vadd.f32 %v451_v62, %v450_v61  ;;  %v2648_v62 = vld [vmem:[%s2556_s15 + $0x8] sm:$0xff]  }
 0x247   : > { %v455_v0 = vpop.permute.xlu2 %454 }
 0x248   : > { %460 = vst.msk [vmem:[%s2605_s18] sm:$0xff] %vm459_vm10, %v455_v0  ;;  %v2611_v1 = vsel %vm459_vm10, %v455_v0, %v2603_v63  ;;  %v609_v0 = vunpack.c.l.bf16 %v2648_v62 }
 0x249   : > { %2180 = vmatmul.msk.f32.vlgmr.msra.gmra.mxu1 %vm346_vm1, %v2611_v1 }
 0x2c6   : > { %v504_v3 = vpop.f32.mrf.mxu1 }
 0x2c7   : > { %v505_v4 = vadd.f32 %v2297_v2, %v504_v3 }
 0x2c9   : > { %572 = vrot.lane.b32.xlu2 %v505_v4, %s2481_s10  ;;  %549 = vrot.lane.b32.xlu1 %v505_v4, %s2483_s12  ;;  %v507_v6 = vadd.f32 %v505_v4, %v472_v5 }
 0x2ca   : > { %528 = vrot.lane.b32.xlu0 %v505_v4, %s2482_s11 }
 0x2cb   : > { %v2181_v7 = vmul.f32 -1.442695, %v507_v6 }
 0x2cd   : > { %2316 = vpow2.f32 %v2181_v7 }
 0x2d3   : > { %v2317_v8 = vpop.eup %2316 }
 0x2d4   : > { %v511_v9 = vadd.f32 1.0, %v2317_v8 }
 0x2d6   : > { %2318 = vrcp.f32 %v511_v9  ;;  %v523_v16 = vand.u32 2147483648, %v511_v9  ;;  %vm517_vm12 = vweird.f32 %v511_v9  ;;  %v521_v17 = vand.u32 2147483647, %v511_v9 }
 0x2d8   : > { %v524_v10 = vor.u32 1.1754944e-38, %v523_v16  ;;  %vm522_vm14 = vcmp.eq.f32.partialorder %v521_v17, 8.507059e+37 }
 0x2dc   : > { %v2319_v11 = vpop.eup %2318 }
 0x2dd   : > { %v513_v12 = vmul.f32 %v2319_v11, %v511_v9  ;;  %vm518_vm11 = vweird.f32 %v2319_v11  ;;  %v2652_v9 = vld [vmem:[%s2561_s19 + $0x10] sm:$0xff]  }
 0x2de   : > { %vm519_vm13 = vmor %vm517_vm12, %vm518_vm11 }
 0x2df   : > { %v514_v13 = vsub.f32 1.0, %v513_v12 }
 0x2e1   : > { %v515_v14 = vmul.f32 %v2319_v11, %v514_v13 }
 0x2e3   : > { %v516_v15 = vadd.f32 %v2319_v11, %v515_v14  ;;  %v612_v14 = vunpack.c.h.bf16 %v2652_v9 }
 0x2e5   : > { %v520_v19 = vsel %vm519_vm13, %v2319_v11, %v516_v15 }
 0x2e6   : > { %v525_v23 = vsel %vm522_vm14, %v524_v10, %v520_v19 }
 0x2e7   : > { %v538_v47 = vsub.f32 1.0, %v525_v23 }
 0x323   : > { %v573_v37 = vpop.permute.xlu2 %572 }
 0x33b   : > { %v550_v20 = vpop.permute.xlu1 %549 }
 0x33c   : > { %v552_v21 = vadd.f32 %v550_v20, %v475_v18  ;;  %v529_v22 = vpop.permute.xlu0 %528 }
 0x33d   : > { %v531_v24 = vmul.f32 %v529_v22, %v525_v23 }
 0x33e   : > { %v2182_v25 = vmul.f32 -1.442695, %v552_v21 }
 0x33f   : > { %533 = vrot.lane.b32.xlu0 %v531_v24, %s2485_s14 }
 0x340   : > { %2320 = vpow2.f32 %v2182_v25 }
 0x346   : > { %v2321_v26 = vpop.eup %2320 }
 0x347   : > { %v556_v27 = vadd.f32 1.0, %v2321_v26  ;;  %544 = vrot.lane.b32.xlu0 %v2611_v1, %s2484_s13 }
 0x349   : > { %2322 = vrcp.f32 %v556_v27  ;;  %v568_v31 = vand.u32 2147483648, %v556_v27  ;;  %v566_v33 = vand.u32 2147483647, %v556_v27  ;;  %vm562_vm0 = vweird.f32 %v556_v27 }
 0x34b   : > { %v569_v35 = vor.u32 1.1754944e-38, %v568_v31  ;;  %vm567_vm3 = vcmp.eq.f32.partialorder %v566_v33, 8.507059e+37 }
 0x34f   : > { %v2323_v28 = vpop.eup %2322 }
 0x350   : > { %v558_v29 = vmul.f32 %v2323_v28, %v556_v27  ;;  %vm563_vm15 = vweird.f32 %v2323_v28 }
 0x351   : > { %vm564_vm2 = vmor %vm562_vm0, %vm563_vm15 }
 0x352   : > { %v559_v30 = vsub.f32 1.0, %v558_v29 }
 0x354   : > { %v560_v32 = vmul.f32 %v2323_v28, %v559_v30 }
 0x356   : > { %v561_v34 = vadd.f32 %v2323_v28, %v560_v32 }
 0x358   : > { %v565_v36 = vsel %vm564_vm2, %v2323_v28, %v561_v34 }
 0x359   : > { %v570_v38 = vsel %vm567_vm3, %v569_v35, %v565_v36 }
 0x35a   : > { %v575_v39 = vmul.f32 %v573_v37, %v570_v38  ;;  %v582_v53 = vsub.f32 1.0, %v570_v38  ;;  %v588_v55 = vmul.f32 %v570_v38, %v2611_v1 }
 0x35c   : > { %577 = vrot.lane.b32.xlu1 %v575_v39, %s2485_s14 }
 0x3b1   : > { %v534_v40 = vpop.permute.xlu0 %533 }
 0x3b2   : > { %v536_v41 = vadd.f32 %v534_v40, %v472_v5 }
 0x3b4   : > { %2324 = vtanh.f32 %v536_v41 }
 0x3b9   : > { %v545_v46 = vpop.permute.xlu0 %544 }
 0x3ba   : > { %v2325_v42 = vpop.eup %2324  ;;  %v547_v49 = vmul.f32 %v545_v46, %v525_v23 }
 0x3bb   : > { %540 = vrot.lane.b32.xlu2 %v2325_v42, %s2486_s16 }
 0x3ce   : > { %v578_v43 = vpop.permute.xlu1 %577 }
 0x3cf   : > { %v580_v44 = vadd.f32 %v578_v43, %v475_v18 }
 0x3d1   : > { %2326 = vtanh.f32 %v580_v44 }
 0x3d7   : > { %v2327_v45 = vpop.eup %2326 }
 0x3d8   : > { %584 = vrot.lane.b32.xlu1 %v2327_v45, %s2486_s16 }
 0x415   : > { %v541_v48 = vpop.permute.xlu2 %540 }
 0x416   : > { %v543_v50 = vmul.f32 %v541_v48, %v538_v47 }
 0x418   : > { %v548_v51 = vadd.f32 %v547_v49, %v543_v50 }
 0x41a   : > { %592 = vrot.lane.b32.xlu2 %v548_v51, %s2486_s16 }
 0x44a   : > { %v585_v52 = vpop.permute.xlu1 %584 }
 0x44b   : > { %v587_v54 = vmul.f32 %v585_v52, %v582_v53 }
 0x44d   : > { %v2631_v56 = vadd.f32 %v588_v55, %v587_v54  ;;  %v2299_v55 = vld [vmem:[%s3234_s3] ss:$0 sm:$0xff] }
 0x474   : > { %v593_v57 = vpop.permute.xlu2 %592 }
 0x475   : > { %2185 = vst.msk [vmem:[%s2605_s18 + $0x8] sm:$0xff] %vm459_vm10, %v593_v57  ;;  %v2637_v58 = vsel %vm459_vm10, %v593_v57, %v2631_v56 }
 0x476   : > { %2189 = vmatmul.msk.f32.vlgmr.msra.gmra.mxu2 %vm346_vm1, %v2637_v58 }
 0x4f9   : > { %v641_v60 = vpop.f32.mrf.mxu2 }
 0x4fa   : > { %v642_v61 = vadd.f32 %v2298_v59, %v641_v60 }
 0x4fc   : > { %709 = vrot.lane.b32.xlu2 %v642_v61, %s2481_s10  ;;  %686 = vrot.lane.b32.xlu1 %v642_v61, %s2483_s12  ;;  %v644_v1 = vadd.f32 %v642_v61, %v609_v0 }
 0x4fd   : > { %665 = vrot.lane.b32.xlu0 %v642_v61, %s2482_s11 }
 0x4fe   : > { %v2190_v2 = vmul.f32 -1.442695, %v644_v1 }
 0x500   : > { %2328 = vpow2.f32 %v2190_v2 }
 0x506   : > { %v2329_v3 = vpop.eup %2328 }
 0x507   : > { %v648_v4 = vadd.f32 1.0, %v2329_v3 }
 0x509   : > { %2330 = vrcp.f32 %v648_v4  ;;  %v660_v12 = vand.u32 2147483648, %v648_v4  ;;  %vm654_vm5 = vweird.f32 %v648_v4  ;;  %v658_v13 = vand.u32 2147483647, %v648_v4 }
 0x50b   : > { %v661_v16 = vor.u32 1.1754944e-38, %v660_v12  ;;  %vm659_vm7 = vcmp.eq.f32.partialorder %v658_v13, 8.507059e+37 }
 0x50f   : > { %v2331_v5 = vpop.eup %2330 }
 0x510   : > { %v650_v6 = vmul.f32 %v2331_v5, %v648_v4  ;;  %vm655_vm4 = vweird.f32 %v2331_v5 }
 0x511   : > { %vm656_vm6 = vmor %vm654_vm5, %vm655_vm4 }
 0x512   : > { %v651_v7 = vsub.f32 1.0, %v650_v6 }
 0x514   : > { %v652_v8 = vmul.f32 %v2331_v5, %v651_v7 }
 0x516   : > { %v653_v11 = vadd.f32 %v2331_v5, %v652_v8 }
 0x518   : > { %v657_v15 = vsel %vm656_vm6, %v2331_v5, %v653_v11  ;;  %v749_v11 = vunpack.c.l.bf16 %v2652_v9 }
 0x519   : > { %v662_v10 = vsel %vm659_vm7, %v661_v16, %v657_v15 }
 0x51a   : > { %v675_v43 = vsub.f32 1.0, %v662_v10 }
 0x556   : > { %v710_v33 = vpop.permute.xlu2 %709 }
 0x56e   : > { %v687_v17 = vpop.permute.xlu1 %686 }
 0x56f   : > { %v689_v18 = vadd.f32 %v687_v17, %v612_v14  ;;  %v666_v19 = vpop.permute.xlu0 %665 }
 0x570   : > { %v668_v20 = vmul.f32 %v666_v19, %v662_v10 }
 0x571   : > { %v2191_v21 = vmul.f32 -1.442695, %v689_v18 }
 0x572   : > { %670 = vrot.lane.b32.xlu0 %v668_v20, %s2485_s14 }
 0x573   : > { %2332 = vpow2.f32 %v2191_v21 }
 0x579   : > { %v2333_v22 = vpop.eup %2332 }
 0x57a   : > { %v693_v23 = vadd.f32 1.0, %v2333_v22  ;;  %681 = vrot.lane.b32.xlu0 %v2637_v58, %s2484_s13 }
 0x57c   : > { %2334 = vrcp.f32 %v693_v23  ;;  %v705_v27 = vand.u32 2147483648, %v693_v23  ;;  %v703_v29 = vand.u32 2147483647, %v693_v23  ;;  %vm699_vm9 = vweird.f32 %v693_v23 }
 0x57e   : > { %v706_v31 = vor.u32 1.1754944e-38, %v705_v27  ;;  %vm704_vm12 = vcmp.eq.f32.partialorder %v703_v29, 8.507059e+37 }
 0x582   : > { %v2335_v24 = vpop.eup %2334 }
 0x583   : > { %v695_v25 = vmul.f32 %v2335_v24, %v693_v23  ;;  %vm700_vm8 = vweird.f32 %v2335_v24 }
 0x584   : > { %vm701_vm11 = vmor %vm699_vm9, %vm700_vm8 }
 0x585   : > { %v696_v26 = vsub.f32 1.0, %v695_v25 }
 0x587   : > { %v697_v28 = vmul.f32 %v2335_v24, %v696_v26 }
 0x589   : > { %v698_v30 = vadd.f32 %v2335_v24, %v697_v28 }
 0x58b   : > { %v702_v32 = vsel %vm701_vm11, %v2335_v24, %v698_v30 }
 0x58c   : > { %v707_v34 = vsel %vm704_vm12, %v706_v31, %v702_v32 }
 0x58d   : > { %v712_v35 = vmul.f32 %v710_v33, %v707_v34  ;;  %v719_v49 = vsub.f32 1.0, %v707_v34  ;;  %v725_v51 = vmul.f32 %v707_v34, %v2637_v58  ;;  %v746_v58 = vunpack.c.h.bf16 %v2648_v62 }
 0x58f   : > { %714 = vrot.lane.b32.xlu1 %v712_v35, %s2485_s14 }
 0x5e4   : > { %v671_v36 = vpop.permute.xlu0 %670 }
 0x5e5   : > { %v673_v37 = vadd.f32 %v671_v36, %v609_v0 }
 0x5e7   : > { %2336 = vtanh.f32 %v673_v37 }
 0x5ec   : > { %v682_v42 = vpop.permute.xlu0 %681 }
 0x5ed   : > { %v2337_v38 = vpop.eup %2336  ;;  %v684_v45 = vmul.f32 %v682_v42, %v662_v10 }
 0x5ee   : > { %677 = vrot.lane.b32.xlu2 %v2337_v38, %s2486_s16 }
 0x601   : > { %v715_v39 = vpop.permute.xlu1 %714 }
 0x602   : > { %v717_v40 = vadd.f32 %v715_v39, %v612_v14 }
 0x604   : > { %2338 = vtanh.f32 %v717_v40 }
 0x60a   : > { %v2339_v41 = vpop.eup %2338 }
 0x60b   : > { %721 = vrot.lane.b32.xlu1 %v2339_v41, %s2486_s16 }
 0x648   : > { %v678_v44 = vpop.permute.xlu2 %677 }
 0x649   : > { %v680_v46 = vmul.f32 %v678_v44, %v675_v43 }
 0x64b   : > { %v685_v47 = vadd.f32 %v684_v45, %v680_v46 }
 0x64d   : > { %729 = vrot.lane.b32.xlu2 %v685_v47, %s2486_s16 }
 0x67d   : > { %v722_v48 = vpop.permute.xlu1 %721 }
 0x67e   : > { %v724_v50 = vmul.f32 %v722_v48, %v719_v49 }
 0x680   : > { %v2663_v52 = vadd.f32 %v725_v51, %v724_v50  ;;  %v2300_v50 = vld [vmem:[%s3234_s3] ss:$0 sm:$0xff] }
 0x6a7   : > { %v730_v53 = vpop.permute.xlu2 %729 }
 0x6a8   : > { %2194 = vst.msk [vmem:[%s2605_s18 + $0x10] sm:$0xff] %vm459_vm10, %v730_v53  ;;  %v2669_v54 = vsel %vm459_vm10, %v730_v53, %v2663_v52 }
 0x6a9   : > { %2198 = vmatmul.msk.f32.vlgmr.msra.gmra.mxu3 %vm346_vm1, %v2669_v54 }
 0x72c   : > { %v778_v57 = vpop.f32.mrf.mxu3 }
 0x72d   : > { %v779_v59 = vadd.f32 %v2299_v55, %v778_v57 }
 0x72f   : > { %846 = vrot.lane.b32.xlu2 %v779_v59, %s2481_s10  ;;  %823 = vrot.lane.b32.xlu1 %v779_v59, %s2483_s12  ;;  %v781_v60 = vadd.f32 %v779_v59, %v746_v58 }
 0x730   : > { %802 = vrot.lane.b32.xlu0 %v779_v59, %s2482_s11 }
 0x731   : > { %v2199_v61 = vmul.f32 -1.442695, %v781_v60 }
 0x733   : > { %2340 = vpow2.f32 %v2199_v61 }
 0x739   : > { %v2341_v0 = vpop.eup %2340 }
 0x73a   : > { %v785_v1 = vadd.f32 1.0, %v2341_v0 }
 0x73c   : > { %2342 = vrcp.f32 %v785_v1  ;;  %v797_v7 = vand.u32 2147483648, %v785_v1  ;;  %vm791_vm14 = vweird.f32 %v785_v1  ;;  %v795_v8 = vand.u32 2147483647, %v785_v1 }
 0x73e   : > { %v798_v62 = vor.u32 1.1754944e-38, %v797_v7  ;;  %vm796_vm0 = vcmp.eq.f32.partialorder %v795_v8, 8.507059e+37 }
 0x742   : > { %v2343_v2 = vpop.eup %2342 }
 0x743   : > { %v787_v3 = vmul.f32 %v2343_v2, %v785_v1  ;;  %vm792_vm13 = vweird.f32 %v2343_v2 }
 0x744   : > { %vm793_vm15 = vmor %vm791_vm14, %vm792_vm13 }
 0x745   : > { %v788_v4 = vsub.f32 1.0, %v787_v3  ;;  %v2710_v3 = vld [vmem:[%s2561_s19 + $0x8] sm:$0xff]  }
 0x746   : > { %v886_v7 = vunpack.c.h.bf16 %v2710_v3 }
 0x747   : > { %v789_v5 = vmul.f32 %v2343_v2, %v788_v4 }
 0x749   : > { %v790_v6 = vadd.f32 %v2343_v2, %v789_v5 }
 0x74b   : > { %v794_v12 = vsel %vm793_vm15, %v2343_v2, %v790_v6 }
 0x74c   : > { %v799_v16 = vsel %vm796_vm0, %v798_v62, %v794_v12 }
 0x74d   : > { %v812_v38 = vsub.f32 1.0, %v799_v16 }
 0x789   : > { %v847_v28 = vpop.permute.xlu2 %846 }
 0x7a1   : > { %v824_v13 = vpop.permute.xlu1 %823 }
 0x7a2   : > { %v826_v14 = vadd.f32 %v824_v13, %v749_v11  ;;  %v803_v15 = vpop.permute.xlu0 %802 }
 0x7a3   : > { %v805_v17 = vmul.f32 %v803_v15, %v799_v16 }
 0x7a4   : > { %v2200_v18 = vmul.f32 -1.442695, %v826_v14 }
 0x7a5   : > { %807 = vrot.lane.b32.xlu0 %v805_v17, %s2485_s14 }
 0x7a6   : > { %2344 = vpow2.f32 %v2200_v18 }
 0x7ac   : > { %v2345_v19 = vpop.eup %2344 }
 0x7ad   : > { %v830_v10 = vadd.f32 1.0, %v2345_v19  ;;  %818 = vrot.lane.b32.xlu0 %v2669_v54, %s2484_s13 }
 0x7af   : > { %2346 = vrcp.f32 %v830_v10  ;;  %v842_v22 = vand.u32 2147483648, %v830_v10  ;;  %v840_v24 = vand.u32 2147483647, %v830_v10  ;;  %vm836_vm3 = vweird.f32 %v830_v10 }
 0x7b1   : > { %v843_v26 = vor.u32 1.1754944e-38, %v842_v22  ;;  %vm841_vm5 = vcmp.eq.f32.partialorder %v840_v24, 8.507059e+37 }
 0x7b5   : > { %v2347_v9 = vpop.eup %2346 }
 0x7b6   : > { %v832_v20 = vmul.f32 %v2347_v9, %v830_v10  ;;  %vm837_vm2 = vweird.f32 %v2347_v9 }
 0x7b7   : > { %vm838_vm4 = vmor %vm836_vm3, %vm837_vm2 }
 0x7b8   : > { %v833_v21 = vsub.f32 1.0, %v832_v20 }
 0x7ba   : > { %v834_v23 = vmul.f32 %v2347_v9, %v833_v21 }
 0x7bc   : > { %v835_v25 = vadd.f32 %v2347_v9, %v834_v23 }
 0x7be   : > { %v839_v27 = vsel %vm838_vm4, %v2347_v9, %v835_v25 }
 0x7bf   : > { %v844_v29 = vsel %vm841_vm5, %v843_v26, %v839_v27 }
 0x7c0   : > { %v849_v30 = vmul.f32 %v847_v28, %v844_v29  ;;  %v856_v44 = vsub.f32 1.0, %v844_v29  ;;  %v862_v46 = vmul.f32 %v844_v29, %v2669_v54  ;;  %v2706_v54 = vld [vmem:[%s2556_s15 + $0x10] sm:$0xff]  }
 0x7c1   : > { %v883_v55 = vunpack.c.l.bf16 %v2706_v54 }
 0x7c2   : > { %851 = vrot.lane.b32.xlu1 %v849_v30, %s2485_s14 }
 0x817   : > { %v808_v31 = vpop.permute.xlu0 %807 }
 0x818   : > { %v810_v32 = vadd.f32 %v808_v31, %v746_v58 }
 0x81a   : > { %2348 = vtanh.f32 %v810_v32 }
 0x81f   : > { %v819_v37 = vpop.permute.xlu0 %818 }
 0x820   : > { %v2349_v33 = vpop.eup %2348  ;;  %v821_v40 = vmul.f32 %v819_v37, %v799_v16 }
 0x821   : > { %814 = vrot.lane.b32.xlu2 %v2349_v33, %s2486_s16 }
 0x834   : > { %v852_v34 = vpop.permute.xlu1 %851 }
 0x835   : > { %v854_v35 = vadd.f32 %v852_v34, %v749_v11 }
 0x837   : > { %2350 = vtanh.f32 %v854_v35 }
 0x83d   : > { %v2351_v36 = vpop.eup %2350 }
 0x83e   : > { %858 = vrot.lane.b32.xlu1 %v2351_v36, %s2486_s16 }
 0x87b   : > { %v815_v39 = vpop.permute.xlu2 %814 }
 0x87c   : > { %v817_v41 = vmul.f32 %v815_v39, %v812_v38 }
 0x87e   : > { %v822_v42 = vadd.f32 %v821_v40, %v817_v41 }
 0x880   : > { %866 = vrot.lane.b32.xlu2 %v822_v42, %s2486_s16 }
 0x8b0   : > { %v859_v43 = vpop.permute.xlu1 %858 }
 0x8b1   : > { %v861_v45 = vmul.f32 %v859_v43, %v856_v44 }
 0x8b3   : > { %v2689_v47 = vadd.f32 %v862_v46, %v861_v45 }
 0x8da   : > { %v867_v48 = vpop.permute.xlu2 %866 }
 0x8db   : > { %2203 = vst.msk [vmem:[%s2605_s18 + $0x18] sm:$0xff] %vm459_vm10, %v867_v48  ;;  %v2695_v49 = vsel %vm459_vm10, %v867_v48, %v2689_v47 }
 0x8dc   : > { %2207 = vmatmul.msk.f32.vlgmr.msrb.gmra.mxu0 %vm346_vm1, %v2695_v49 }
 0x959   : > { %v915_v51 = vpop.f32.mrf.mxu0 }
 0x95a   : > { %v916_v53 = vadd.f32 %v2300_v50, %v915_v51  ;;  %v2301_v50 = vld [vmem:[%s3234_s3] ss:$0 sm:$0xff] }
 0x95c   : > { %983 = vrot.lane.b32.xlu2 %v916_v53, %s2481_s10  ;;  %960 = vrot.lane.b32.xlu1 %v916_v53, %s2483_s12  ;;  %v918_v57 = vadd.f32 %v916_v53, %v883_v55 }
 0x95d   : > { %939 = vrot.lane.b32.xlu0 %v916_v53, %s2482_s11 }
 0x95e   : > { %v2208_v59 = vmul.f32 -1.442695, %v918_v57 }
 0x960   : > { %2352 = vpow2.f32 %v2208_v59 }
 0x966   : > { %v2353_v58 = vpop.eup %2352 }
 0x967   : > { %v922_v60 = vadd.f32 1.0, %v2353_v58 }
 0x969   : > { %2354 = vrcp.f32 %v922_v60  ;;  %v934_v5 = vand.u32 2147483648, %v922_v60  ;;  %vm928_vm7 = vweird.f32 %v922_v60  ;;  %v932_v6 = vand.u32 2147483647, %v922_v60 }
 0x96b   : > { %v935_v11 = vor.u32 1.1754944e-38, %v934_v5  ;;  %vm933_vm9 = vcmp.eq.f32.partialorder %v932_v6, 8.507059e+37  ;;  %v1023_v6 = vunpack.c.l.bf16 %v2710_v3 }
 0x96f   : > { %v2355_v61 = vpop.eup %2354 }
 0x970   : > { %v924_v0 = vmul.f32 %v2355_v61, %v922_v60  ;;  %vm929_vm6 = vweird.f32 %v2355_v61 }
 0x971   : > { %vm930_vm8 = vmor %vm928_vm7, %vm929_vm6 }
 0x972   : > { %v925_v1 = vsub.f32 1.0, %v924_v0 }
 0x974   : > { %v926_v2 = vmul.f32 %v2355_v61, %v925_v1 }
 0x976   : > { %v927_v4 = vadd.f32 %v2355_v61, %v926_v2 }
 0x978   : > { %v931_v8 = vsel %vm930_vm8, %v2355_v61, %v927_v4 }
 0x979   : > { %v936_v14 = vsel %vm933_vm9, %v935_v11, %v931_v8 }
 0x97a   : > { %v949_v36 = vsub.f32 1.0, %v936_v14 }
 0x9b6   : > { %v984_v26 = vpop.permute.xlu2 %983 }
 0x9ce   : > { %v961_v12 = vpop.permute.xlu1 %960 }
 0x9cf   : > { %v963_v62 = vadd.f32 %v961_v12, %v886_v7  ;;  %v940_v13 = vpop.permute.xlu0 %939 }
 0x9d0   : > { %v942_v15 = vmul.f32 %v940_v13, %v936_v14 }
 0x9d1   : > { %v2209_v16 = vmul.f32 -1.442695, %v963_v62 }
 0x9d2   : > { %944 = vrot.lane.b32.xlu0 %v942_v15, %s2485_s14 }
 0x9d3   : > { %2356 = vpow2.f32 %v2209_v16 }
 0x9d9   : > { %v2357_v17 = vpop.eup %2356 }
 0x9da   : > { %v967_v18 = vadd.f32 1.0, %v2357_v17  ;;  %955 = vrot.lane.b32.xlu0 %v2695_v49, %s2484_s13 }
 0x9dc   : > { %2358 = vrcp.f32 %v967_v18  ;;  %v979_v20 = vand.u32 2147483648, %v967_v18  ;;  %v977_v22 = vand.u32 2147483647, %v967_v18  ;;  %vm973_vm12 = vweird.f32 %v967_v18 }
 0x9de   : > { %v980_v24 = vor.u32 1.1754944e-38, %v979_v20  ;;  %vm978_vm14 = vcmp.eq.f32.partialorder %v977_v22, 8.507059e+37 }
 0x9e2   : > { %v2359_v19 = vpop.eup %2358 }
 0x9e3   : > { %v969_v10 = vmul.f32 %v2359_v19, %v967_v18  ;;  %vm974_vm11 = vweird.f32 %v2359_v19 }
 0x9e4   : > { %vm975_vm13 = vmor %vm973_vm12, %vm974_vm11 }
 0x9e5   : > { %v970_v9 = vsub.f32 1.0, %v969_v10 }
 0x9e7   : > { %v971_v21 = vmul.f32 %v2359_v19, %v970_v9 }
 0x9e9   : > { %v972_v23 = vadd.f32 %v2359_v19, %v971_v21 }
 0x9eb   : > { %v976_v25 = vsel %vm975_vm13, %v2359_v19, %v972_v23 }
 0x9ec   : > { %v981_v27 = vsel %vm978_vm14, %v980_v24, %v976_v25 }
 0x9ed   : > { %v986_v28 = vmul.f32 %v984_v26, %v981_v27  ;;  %v993_v42 = vsub.f32 1.0, %v981_v27  ;;  %v999_v44 = vmul.f32 %v981_v27, %v2695_v49  ;;  %v1020_v49 = vunpack.c.h.bf16 %v2706_v54 }
 0x9ef   : > { %988 = vrot.lane.b32.xlu1 %v986_v28, %s2485_s14 }
 0xa44   : > { %v945_v29 = vpop.permute.xlu0 %944 }
 0xa45   : > { %v947_v30 = vadd.f32 %v945_v29, %v883_v55 }
 0xa47   : > { %2360 = vtanh.f32 %v947_v30 }
 0xa4c   : > { %v956_v35 = vpop.permute.xlu0 %955 }
 0xa4d   : > { %v2361_v31 = vpop.eup %2360  ;;  %v958_v38 = vmul.f32 %v956_v35, %v936_v14 }
 0xa4e   : > { %951 = vrot.lane.b32.xlu2 %v2361_v31, %s2486_s16 }
 0xa61   : > { %v989_v32 = vpop.permute.xlu1 %988 }
 0xa62   : > { %v991_v33 = vadd.f32 %v989_v32, %v886_v7 }
 0xa64   : > { %2362 = vtanh.f32 %v991_v33 }
 0xa6a   : > { %v2363_v34 = vpop.eup %2362 }
 0xa6b   : > { %995 = vrot.lane.b32.xlu1 %v2363_v34, %s2486_s16 }
 0xaa8   : > { %v952_v37 = vpop.permute.xlu2 %951 }
 0xaa9   : > { %v954_v39 = vmul.f32 %v952_v37, %v949_v36 }
 0xaab   : > { %v959_v40 = vadd.f32 %v958_v38, %v954_v39  ;;  %v1164_v38 = vld [vmem:[%s3233_s2 + $0x18] sm:$0xff]  ;;  %v1163_v39 = vld [vmem:[%s3233_s2 + $0x10] sm:$0xff] }
 0xaac   : > { %1184 = vmatpush.msrb.mxu2 %v1164_v38  ;;  %1320 = vmatpush.msrb.mxu3 %v1164_v38 }
 0xaad   : > { %1003 = vrot.lane.b32.xlu2 %v959_v40, %s2486_s16  ;;  %v1162_v40 = vld [vmem:[%s3233_s2 + $0x8] sm:$0xff] }
 0xaae   : > { %1185 = vmatpush.msrb.mxu2 %v1163_v39  ;;  %1321 = vmatpush.msrb.mxu3 %v1163_v39 }
 0xab0   : > { %1186 = vmatpush.msrb.mxu2 %v1162_v40  ;;  %1322 = vmatpush.msrb.mxu3 %v1162_v40 }
 0xadd   : > { %v996_v41 = vpop.permute.xlu1 %995 }
 0xade   : > { %v998_v43 = vmul.f32 %v996_v41, %v993_v42  ;;  %v1161_v41 = vld [vmem:[%s3233_s2] sm:$0xff] }
 0xadf   : > { %1187 = vmatpush.msrb.mxu2 %v1161_v41  ;;  %1323 = vmatpush.msrb.mxu3 %v1161_v41 }
 0xae0   : > { %v2721_v45 = vadd.f32 %v999_v44, %v998_v43 }
 0xb07   : > { %v1004_v46 = vpop.permute.xlu2 %1003 }
 0xb08   : > { %2212 = vst.msk [vmem:[%s2605_s18 + $0x20] sm:$0xff] %vm459_vm10, %v1004_v46  ;;  %v2727_v48 = vsel %vm459_vm10, %v1004_v46, %v2721_v45 }
 0xb09   : > { %2216 = vmatmul.msk.f32.vlgmr.msrb.gmra.mxu1 %vm346_vm1, %v2727_v48 }
 0xb86   : > { %v1052_v51 = vpop.f32.mrf.mxu1 }
 0xb87   : > { %v1053_v53 = vadd.f32 %v2301_v50, %v1052_v51 }
 0xb89   : > { %1120 = vrot.lane.b32.xlu2 %v1053_v53, %s2481_s10  ;;  %1097 = vrot.lane.b32.xlu1 %v1053_v53, %s2483_s12  ;;  %v1055_v55 = vadd.f32 %v1053_v53, %v1020_v49 }
 0xb8a   : > { %1076 = vrot.lane.b32.xlu0 %v1053_v53, %s2482_s11 }
 0xb8b   : > { %v2217_v57 = vmul.f32 -1.442695, %v1055_v55 }
 0xb8d   : > { %2364 = vpow2.f32 %v2217_v57 }
 0xb93   : > { %v2365_v59 = vpop.eup %2364 }
 0xb94   : > { %v1059_v58 = vadd.f32 1.0, %v2365_v59 }
 0xb96   : > { %2366 = vrcp.f32 %v1059_v58  ;;  %v1071_v4 = vand.u32 2147483648, %v1059_v58  ;;  %vm1065_vm0 = vweird.f32 %v1059_v58  ;;  %v1069_v5 = vand.u32 2147483647, %v1059_v58 }
 0xb98   : > { %v1072_v54 = vor.u32 1.1754944e-38, %v1071_v4  ;;  %vm1070_vm3 = vcmp.eq.f32.partialorder %v1069_v5, 8.507059e+37 }
 0xb9c   : > { %v2367_v60 = vpop.eup %2366 }
 0xb9d   : > { %v1061_v61 = vmul.f32 %v2367_v60, %v1059_v58  ;;  %vm1066_vm15 = vweird.f32 %v2367_v60 }
 0xb9e   : > { %vm1067_vm2 = vmor %vm1065_vm0, %vm1066_vm15 }
 0xb9f   : > { %v1062_v0 = vsub.f32 1.0, %v1061_v61 }
 0xba1   : > { %v1063_v1 = vmul.f32 %v2367_v60, %v1062_v0 }
 0xba3   : > { %v1064_v2 = vadd.f32 %v2367_v60, %v1063_v1 }
 0xba5   : > { %v1068_v7 = vsel %vm1067_vm2, %v2367_v60, %v1064_v2 }
 0xba6   : > { %v1073_v62 = vsel %vm1070_vm3, %v1072_v54, %v1068_v7 }
 0xba7   : > { %v1086_v33 = vsub.f32 1.0, %v1073_v62 }
 0xbe3   : > { %v1121_v23 = vpop.permute.xlu2 %1120 }
 0xbfb   : > { %v1098_v8 = vpop.permute.xlu1 %1097 }
 0xbfc   : > { %v1100_v11 = vadd.f32 %v1098_v8, %v1023_v6  ;;  %v1077_v12 = vpop.permute.xlu0 %1076 }
 0xbfd   : > { %v1079_v13 = vmul.f32 %v1077_v12, %v1073_v62 }
 0xbfe   : > { %v2218_v14 = vmul.f32 -1.442695, %v1100_v11 }
 0xbff   : > { %1081 = vrot.lane.b32.xlu0 %v1079_v13, %s2485_s14 }
 0xc00   : > { %2368 = vpow2.f32 %v2218_v14 }
 0xc06   : > { %v2369_v15 = vpop.eup %2368 }
 0xc07   : > { %v1104_v16 = vadd.f32 1.0, %v2369_v15  ;;  %1092 = vrot.lane.b32.xlu0 %v2727_v48, %s2484_s13 }
 0xc09   : > { %2370 = vrcp.f32 %v1104_v16  ;;  %v1116_v19 = vand.u32 2147483648, %v1104_v16  ;;  %v1114_v9 = vand.u32 2147483647, %v1104_v16  ;;  %vm1110_vm5 = vweird.f32 %v1104_v16 }
 0xc0b   : > { %v1117_v21 = vor.u32 1.1754944e-38, %v1116_v19  ;;  %vm1115_vm7 = vcmp.eq.f32.partialorder %v1114_v9, 8.507059e+37 }
 0xc0f   : > { %v2371_v3 = vpop.eup %2370 }
 0xc10   : > { %v1106_v17 = vmul.f32 %v2371_v3, %v1104_v16  ;;  %vm1111_vm4 = vweird.f32 %v2371_v3 }
 0xc11   : > { %vm1112_vm6 = vmor %vm1110_vm5, %vm1111_vm4 }
 0xc12   : > { %v1107_v18 = vsub.f32 1.0, %v1106_v17 }
 0xc14   : > { %v1108_v10 = vmul.f32 %v2371_v3, %v1107_v18 }
 0xc16   : > { %v1109_v20 = vadd.f32 %v2371_v3, %v1108_v10 }
 0xc18   : > { %v1113_v22 = vsel %vm1112_vm6, %v2371_v3, %v1109_v20 }
 0xc19   : > { %v1118_v24 = vsel %vm1115_vm7, %v1117_v21, %v1113_v22 }
 0xc1a   : > { %v1123_v25 = vmul.f32 %v1121_v23, %v1118_v24  ;;  %v1130_v43 = vsub.f32 1.0, %v1118_v24  ;;  %v1136_v46 = vmul.f32 %v1118_v24, %v2727_v48  ;;  %v2776_v48 = vld [vmem:[%s2556_s15 + $0x18] sm:$0xff]   ;;  %s1015_s15 = scalar_lea.vmem [#allocation4], %s2213_s24 }
 0xc1b   : > { %v1157_v59 = vunpack.c.l.bf16 %v2776_v48 }
 0xc1c   : > { %1125 = vrot.lane.b32.xlu1 %v1123_v25, %s2485_s14 }
 0xc71   : > { %v1082_v26 = vpop.permute.xlu0 %1081 }
 0xc72   : > { %v1084_v27 = vadd.f32 %v1082_v26, %v1020_v49  ;;  %v2302_v49 = vld [vmem:[%s3234_s3] ss:$0 sm:$0xff] }
 0xc74   : > { %2372 = vtanh.f32 %v1084_v27 }
 0xc79   : > { %v1093_v32 = vpop.permute.xlu0 %1092 }
 0xc7a   : > { %v2373_v28 = vpop.eup %2372  ;;  %v1095_v35 = vmul.f32 %v1093_v32, %v1073_v62 }
 0xc7b   : > { %1088 = vrot.lane.b32.xlu2 %v2373_v28, %s2486_s16 }
 0xc8e   : > { %v1126_v29 = vpop.permute.xlu1 %1125 }
 0xc8f   : > { %v1128_v30 = vadd.f32 %v1126_v29, %v1023_v6  ;;  %v2780_v6 = vld [vmem:[%s2561_s19] sm:$0xff]   ;;  %s2222_s19 = sshll.u32 %s1146_s25, 3 }
 0xc90   : > { %v1160_v11 = vunpack.c.h.bf16 %v2780_v6 }
 0xc91   : > { %2374 = vtanh.f32 %v1128_v30 }
 0xc97   : > { %v2375_v31 = vpop.eup %2374 }
 0xc98   : > { %1132 = vrot.lane.b32.xlu1 %v2375_v31, %s2486_s16 }
 0xcd5   : > { %v1089_v34 = vpop.permute.xlu2 %1088 }
 0xcd6   : > { %v1091_v36 = vmul.f32 %v1089_v34, %v1086_v33 }
 0xcd8   : > { %v1096_v37 = vadd.f32 %v1095_v35, %v1091_v36 }
 0xcda   : > { %1140 = vrot.lane.b32.xlu2 %v1096_v37, %s2486_s16 }
 0xd0a   : > { %v1133_v42 = vpop.permute.xlu1 %1132 }
 0xd0b   : > { %v1135_v44 = vmul.f32 %v1133_v42, %v1130_v43 }
 0xd0d   : > { %v2759_v50 = vadd.f32 %v1136_v46, %v1135_v44 }
 0xd34   : > { %v1141_v51 = vpop.permute.xlu2 %1140 }
 0xd35   : > { %2221 = vst.msk [vmem:[%s2605_s18 + $0x28] sm:$0xff] %vm459_vm10, %v1141_v51  ;;  %v2765_v53 = vsel %vm459_vm10, %v1141_v51, %v2759_v50 }
 0xd36   : > { %2225 = vmatmul.msk.f32.vlgmr.msrb.gmra.mxu2 %vm346_vm1, %v2765_v53 }
 0xdb9   : > { %v1189_v55 = vpop.f32.mrf.mxu2 }
 0xdba   : > { %v1190_v57 = vadd.f32 %v2302_v49, %v1189_v55 }
 0xdbc   : > { %1257 = vrot.lane.b32.xlu2 %v1190_v57, %s2481_s10  ;;  %1234 = vrot.lane.b32.xlu1 %v1190_v57, %s2483_s12  ;;  %v1192_v58 = vadd.f32 %v1190_v57, %v1157_v59 }
 0xdbd   : > { %1213 = vrot.lane.b32.xlu0 %v1190_v57, %s2482_s11  ;;  %v2303_v57 = vld [vmem:[%s3234_s3] ss:$0 sm:$0xff] }
 0xdbe   : > { %v2226_v60 = vmul.f32 -1.442695, %v1192_v58 }
 0xdc0   : > { %2376 = vpow2.f32 %v2226_v60 }
 0xdc6   : > { %v2377_v61 = vpop.eup %2376 }
 0xdc7   : > { %v1196_v0 = vadd.f32 1.0, %v2377_v61 }
 0xdc9   : > { %2378 = vrcp.f32 %v1196_v0  ;;  %v1208_v54 = vand.u32 2147483648, %v1196_v0  ;;  %vm1202_vm9 = vweird.f32 %v1196_v0  ;;  %v1206_v8 = vand.u32 2147483647, %v1196_v0 }
 0xdcb   : > { %v1209_v62 = vor.u32 1.1754944e-38, %v1208_v54  ;;  %vm1207_vm12 = vcmp.eq.f32.partialorder %v1206_v8, 8.507059e+37 }
 0xdcf   : > { %v2379_v1 = vpop.eup %2378 }
 0xdd0   : > { %v1198_v2 = vmul.f32 %v2379_v1, %v1196_v0  ;;  %vm1203_vm8 = vweird.f32 %v2379_v1 }
 0xdd1   : > { %vm1204_vm11 = vmor %vm1202_vm9, %vm1203_vm8 }
 0xdd2   : > { %v1199_v4 = vsub.f32 1.0, %v1198_v2 }
 0xdd4   : > { %v1200_v5 = vmul.f32 %v2379_v1, %v1199_v4 }
 0xdd6   : > { %v1201_v7 = vadd.f32 %v2379_v1, %v1200_v5 }
 0xdd8   : > { %v1205_v12 = vsel %vm1204_vm11, %v2379_v1, %v1201_v7 }
 0xdd9   : > { %v1210_v16 = vsel %vm1207_vm12, %v1209_v62, %v1205_v12 }
 0xdda   : > { %v1223_v37 = vsub.f32 1.0, %v1210_v16 }
 0xe16   : > { %v1258_v27 = vpop.permute.xlu2 %1257 }
 0xe2e   : > { %v1235_v13 = vpop.permute.xlu1 %1234 }
 0xe2f   : > { %v1237_v14 = vadd.f32 %v1235_v13, %v1160_v11  ;;  %v1214_v15 = vpop.permute.xlu0 %1213 }
 0xe30   : > { %v1216_v3 = vmul.f32 %v1214_v15, %v1210_v16 }
 0xe31   : > { %v2227_v17 = vmul.f32 -1.442695, %v1237_v14 }
 0xe32   : > { %1218 = vrot.lane.b32.xlu0 %v1216_v3, %s2485_s14 }
 0xe33   : > { %2380 = vpow2.f32 %v2227_v17 }
 0xe39   : > { %v2381_v18 = vpop.eup %2380 }
 0xe3a   : > { %v1241_v19 = vadd.f32 1.0, %v2381_v18  ;;  %1229 = vrot.lane.b32.xlu0 %v2765_v53, %s2484_s13 }
 0xe3c   : > { %2382 = vrcp.f32 %v1241_v19  ;;  %v1253_v21 = vand.u32 2147483648, %v1241_v19  ;;  %v1251_v23 = vand.u32 2147483647, %v1241_v19  ;;  %vm1247_vm14 = vweird.f32 %v1241_v19 }
 0xe3e   : > { %v1254_v25 = vor.u32 1.1754944e-38, %v1253_v21  ;;  %vm1252_vm0 = vcmp.eq.f32.partialorder %v1251_v23, 8.507059e+37 }
 0xe42   : > { %v2383_v10 = vpop.eup %2382 }
 0xe43   : > { %v1243_v9 = vmul.f32 %v2383_v10, %v1241_v19  ;;  %vm1248_vm13 = vweird.f32 %v2383_v10 }
 0xe44   : > { %vm1249_vm15 = vmor %vm1247_vm14, %vm1248_vm13 }
 0xe45   : > { %v1244_v20 = vsub.f32 1.0, %v1243_v9 }
 0xe47   : > { %v1245_v22 = vmul.f32 %v2383_v10, %v1244_v20 }
 0xe49   : > { %v1246_v24 = vadd.f32 %v2383_v10, %v1245_v22 }
 0xe4b   : > { %v1250_v26 = vsel %vm1249_vm15, %v2383_v10, %v1246_v24 }
 0xe4c   : > { %v1255_v28 = vsel %vm1252_vm0, %v1254_v25, %v1250_v26 }
 0xe4d   : > { %v1260_v29 = vmul.f32 %v1258_v27, %v1255_v28  ;;  %v1267_v43 = vsub.f32 1.0, %v1255_v28  ;;  %v1273_v46 = vmul.f32 %v1255_v28, %v2765_v53  ;;  %v1294_v53 = vunpack.c.h.bf16 %v2776_v48 }
 0xe4e   : > { %v1296_v48 = vunpack.c.l.bf16 %v2780_v6 }
 0xe4f   : > { %1262 = vrot.lane.b32.xlu1 %v1260_v29, %s2485_s14 }
 0xea4   : > { %v1219_v30 = vpop.permute.xlu0 %1218 }
 0xea5   : > { %v1221_v31 = vadd.f32 %v1219_v30, %v1157_v59 }
 0xea7   : > { %2384 = vtanh.f32 %v1221_v31 }
 0xeac   : > { %v1230_v36 = vpop.permute.xlu0 %1229 }
 0xead   : > { %v2385_v32 = vpop.eup %2384  ;;  %v1232_v39 = vmul.f32 %v1230_v36, %v1210_v16 }
 0xeae   : > { %1225 = vrot.lane.b32.xlu2 %v2385_v32, %s2486_s16 }
 0xec1   : > { %v1263_v33 = vpop.permute.xlu1 %1262 }
 0xec2   : > { %v1265_v34 = vadd.f32 %v1263_v33, %v1160_v11 }
 0xec4   : > { %2386 = vtanh.f32 %v1265_v34 }
 0xeca   : > { %v2387_v35 = vpop.eup %2386 }
 0xecb   : > { %1269 = vrot.lane.b32.xlu1 %v2387_v35, %s2486_s16 }
 0xf08   : > { %v1226_v38 = vpop.permute.xlu2 %1225 }
 0xf09   : > { %v1228_v40 = vmul.f32 %v1226_v38, %v1223_v37 }
 0xf0b   : > { %v1233_v41 = vadd.f32 %v1232_v39, %v1228_v40 }
 0xf0d   : > { %1277 = vrot.lane.b32.xlu2 %v1233_v41, %s2486_s16 }
 0xf3d   : > { %v1270_v42 = vpop.permute.xlu1 %1269 }
 0xf3e   : > { %v1272_v44 = vmul.f32 %v1270_v42, %v1267_v43 }
 0xf40   : > { %v2791_v51 = vadd.f32 %v1273_v46, %v1272_v44 }
 0xf67   : > { %v1278_v49 = vpop.permute.xlu2 %1277 }
 0xf68   : > { %2230 = vst.msk [vmem:[%s2605_s18 + $0x30] sm:$0xff] %vm459_vm10, %v1278_v49  ;;  %v2797_v55 = vsel %vm459_vm10, %v1278_v49, %v2791_v51 }
 0xf69   : > { %2233 = vmatmul.msk.f32.vlgmr.msrb.gmra.mxu3 %vm346_vm1, %v2797_v55 }
 0xfec   : > { %v1325_v59 = vpop.f32.mrf.mxu3 }
 0xfed   : > { %v1326_v58 = vadd.f32 %v2303_v57, %v1325_v59 }
 0xfef   : > { %1393 = vrot.lane.b32.xlu2 %v1326_v58, %s2481_s10  ;;  %1349 = vrot.lane.b32.xlu1 %v1326_v58, %s2482_s11  ;;  %v1328_v60 = vadd.f32 %v1326_v58, %v1294_v53  ;;  %s461_s10 = ssub.s32 15, %s2548_s7  ;;  %s598_s11 = ssub.s32 14, %s2548_s7 }
 0xff0   : > { %1370 = vrot.lane.b32.xlu0 %v1326_v58, %s2483_s12  ;;  %s2177_s12 = sshll.u32 %s461_s10, 3  ;;  %s2231_s10 = sshll.u32 %s1283_s27, 3 }
 0xff1   : > { %v2234_v61 = vmul.f32 -1.442695, %v1328_v60 }
 0xff3   : > { %2388 = vpow2.f32 %v2234_v61 }
 0xff9   : > { %v2389_v0 = vpop.eup %2388 }
 0xffa   : > { %v1332_v1 = vadd.f32 1.0, %v2389_v0 }
 0xffc   : > { %2390 = vrcp.f32 %v1332_v1  ;;  %v1344_v8 = vand.u32 2147483648, %v1332_v1  ;;  %vm1338_vm3 = vweird.f32 %v1332_v1  ;;  %v1342_v11 = vand.u32 2147483647, %v1332_v1 }
 0xffe   : > { %v1345_v62 = vor.u32 1.1754944e-38, %v1344_v8  ;;  %vm1343_vm5 = vcmp.eq.f32.partialorder %v1342_v11, 8.507059e+37 }
0x1002   : > { %v2391_v2 = vpop.eup %2390 }
0x1003   : > { %v1334_v4 = vmul.f32 %v2391_v2, %v1332_v1  ;;  %vm1339_vm2 = vweird.f32 %v2391_v2 }
0x1004   : > { %vm1340_vm4 = vmor %vm1338_vm3, %vm1339_vm2 }
0x1005   : > { %v1335_v5 = vsub.f32 1.0, %v1334_v4 }
0x1007   : > { %v1336_v7 = vmul.f32 %v2391_v2, %v1335_v5 }
0x1009   : > { %v1337_v54 = vadd.f32 %v2391_v2, %v1336_v7 }
0x100b   : > { %v1341_v12 = vsel %vm1340_vm4, %v2391_v2, %v1337_v54 }
0x100c   : > { %v1346_v14 = vsel %vm1343_vm5, %v1345_v62, %v1341_v12 }
0x100d   : > { %v1359_v33 = vsub.f32 1.0, %v1346_v14 }
0x1049   : > { %v1394_v26 = vpop.permute.xlu2 %1393 }
0x1061   : > { %v1350_v13 = vpop.permute.xlu1 %1349 }
0x1062   : > { %v1352_v15 = vmul.f32 %v1350_v13, %v1346_v14  ;;  %v1371_v16 = vpop.permute.xlu0 %1370 }
0x1063   : > { %v1373_v3 = vadd.f32 %v1371_v16, %v1296_v48 }
0x1064   : > { %1354 = vrot.lane.b32.xlu0 %v1352_v15, %s2485_s14 }
0x1065   : > { %v2235_v17 = vmul.f32 -1.442695, %v1373_v3 }
0x1067   : > { %2392 = vpow2.f32 %v2235_v17 }
0x106c   : > { %1365 = vrot.lane.b32.xlu0 %v2797_v55, %s2484_s13  ;;  %s2186_s13 = sshll.u32 %s598_s11, 3  ;;  %s1289_s11 = scalar_lea.vmem [#allocation4], %s2231_s10 }
0x106d   : > { %v2393_v18 = vpop.eup %2392  ;;  %s604_s9 = scalar_lea.vmem [#allocation4], %s2186_s13 }
0x106e   : > { %v1377_v19 = vadd.f32 1.0, %v2393_v18 }
0x1070   : > { %2394 = vrcp.f32 %v1377_v19  ;;  %v1389_v20 = vand.u32 2147483648, %v1377_v19  ;;  %v1387_v22 = vand.u32 2147483647, %v1377_v19  ;;  %vm1383_vm7 = vweird.f32 %v1377_v19 }
0x1072   : > { %v1390_v24 = vor.u32 1.1754944e-38, %v1389_v20  ;;  %vm1388_vm9 = vcmp.eq.f32.partialorder %v1387_v22, 8.507059e+37 }
0x1074   : > { %600 = vrot.lane.b32.xlu0 %v2631_v56, %s2486_s16 }
0x1076   : > { %v2395_v6 = vpop.eup %2394 }
0x1077   : > { %v1379_v10 = vmul.f32 %v2395_v6, %v1377_v19  ;;  %vm1384_vm6 = vweird.f32 %v2395_v6 }
0x1078   : > { %vm1385_vm8 = vmor %vm1383_vm7, %vm1384_vm6 }
0x1079   : > { %v1380_v9 = vsub.f32 1.0, %v1379_v10 }
0x107b   : > { %v1381_v21 = vmul.f32 %v2395_v6, %v1380_v9 }
0x107c   : > { %1011 = vrot.lane.b32.xlu0 %v2721_v45, %s2486_s16 }
0x107d   : > { %v1382_v23 = vadd.f32 %v2395_v6, %v1381_v21 }
0x107f   : > { %v1386_v25 = vsel %vm1385_vm8, %v2395_v6, %v1382_v23 }
0x1080   : > { %v1391_v27 = vsel %vm1388_vm9, %v1390_v24, %v1386_v25 }
0x1081   : > { %v1396_v28 = vmul.f32 %v1394_v26, %v1391_v27  ;;  %v1409_v39 = vmul.f32 %v1391_v27, %v2797_v55 }
0x1083   : > { %1398 = vrot.lane.b32.xlu1 %v1396_v28, %s2485_s14  ;;  %s467_s14 = scalar_lea.vmem [#allocation4], %s2177_s12  ;;  %s1419_s12 = ssub.s32 8, %s2548_s7 }
0x1084   : > { %s2239_s13 = sshll.u32 %s1419_s12, 3 }
0x10d6   : > { %v1355_v56 = vpop.permute.xlu0 %1354 }
0x10d7   : > { %v1357_v29 = vadd.f32 %v1355_v56, %v1294_v53 }
0x10d9   : > { %2396 = vtanh.f32 %v1357_v29 }
0x10df   : > { %v2397_v30 = vpop.eup %2396 }
0x10e0   : > { %1361 = vrot.lane.b32.xlu2 %v2397_v30, %s2486_s16 }
0x10e8   : > { %463 = vrot.lane.b32.xlu2 %v2603_v63, %s2486_s16  ;;  %v1366_v63 = vpop.permute.xlu0 %1365 }
0x10f0   : > { %874 = vrot.lane.b32.xlu2 %v2689_v47, %s2486_s16  ;;  %v1368_v47 = vmul.f32 %v1366_v63, %v1346_v14 }
0x10f5   : > { %v1399_v45 = vpop.permute.xlu1 %1398 }
0x10f6   : > { %v1401_v31 = vadd.f32 %v1399_v45, %v1296_v48 }
0x10f8   : > { %2398 = vtanh.f32 %v1401_v31  ;;  %1285 = vrot.lane.b32.xlu2 %v2791_v51, %s2486_s16 }
0x10fe   : > { %v2399_v32 = vpop.eup %2398 }
0x10ff   : > { %1405 = vrot.lane.b32.xlu1 %v2399_v32, %s2486_s16 }
0x1107   : > { %737 = vrot.lane.b32.xlu1 %v2663_v52, %s2486_s16  ;;  %v601_v52 = vpop.permute.xlu0 %600 }
0x110f   : > { %1148 = vrot.lane.b32.xlu1 %v2759_v50, %s2486_s16  ;;  %v1403_v50 = vsub.f32 1.0, %v1391_v27  ;;  %v1012_v44 = vpop.permute.xlu0 %1011 }
0x113a   : > { %v1362_v34 = vpop.permute.xlu2 %1361 }
0x113b   : > { %v1364_v35 = vmul.f32 %v1362_v34, %v1359_v33 }
0x113d   : > { %v1369_v36 = vadd.f32 %v1368_v47, %v1364_v35 }
0x113f   : > { %1413 = vrot.lane.b32.xlu0 %v1369_v36, %s2486_s16 }
0x1142   : > { %v464_v37 = vpop.permute.xlu2 %463 }
0x1143   : > { %468 = vst.msk [vmem:[%s467_s14] sm:$0xff] %vm459_vm10, %v464_v37  ;;  %s1425_s14 = scalar_lea.vmem [#allocation4], %s2239_s13 }
0x1144   : > { %605 = vst.msk [vmem:[%s604_s9] sm:$0xff] %vm459_vm10, %v601_v52 }
0x114a   : > { %v875_v42 = vpop.permute.xlu2 %874 }
0x1152   : > { %v1286_v51 = vpop.permute.xlu2 %1285 }
0x1171   : > { %v1406_v38 = vpop.permute.xlu1 %1405 }
0x1172   : > { %v1408_v40 = vmul.f32 %v1406_v38, %v1403_v50 }
0x1174   : > { %v1410_v41 = vadd.f32 %v1409_v39, %v1408_v40 }
0x1176   : > { %1421 = vrot.lane.b32.xlu1 %v1410_v41, %s2486_s16  ;;  %s1152_s16 = scalar_lea.vmem [#allocation4], %s2222_s19 }
0x1179   : > { %v738_v43 = vpop.permute.xlu1 %737 }
0x117a   : > { %742 = vst.msk [vmem:[%s741_s26] sm:$0xff] %vm459_vm10, %v738_v43 }
0x117b   : > { %879 = vst.msk [vmem:[%s878_s28] sm:$0xff] %vm459_vm10, %v875_v42 }
0x117c   : > { %1016 = vst.msk [vmem:[%s1015_s15] sm:$0xff] %vm459_vm10, %v1012_v44 }
0x1181   : > { %v1149_v46 = vpop.permute.xlu1 %1148 }
0x1182   : > { %1153 = vst.msk [vmem:[%s1152_s16] sm:$0xff] %vm459_vm10, %v1149_v46 }
0x1183   : > { %1290 = vst.msk [vmem:[%s1289_s11] sm:$0xff] %vm459_vm10, %v1286_v51 }
0x11b1   : > { %v1414_v49 = vpop.permute.xlu0 %1413 }
0x11b2   : > { %2238 = vst.msk [vmem:[%s2605_s18 + $0x38] sm:$0xff] %vm459_vm10, %v1414_v49  ;;  %v1427_v55 = vsel %vm459_vm10, %v1414_v49, %v1410_v41 }
0x11b3   : > { %1428 = vst.msk [vmem:[#allocation2] sm:$0xff] %vm346_vm1, %v1427_v55 }
0x11e5   : > { %1432 = sbr.rel (%p2240_p6) target bundleno = 5233 (0x1471), region = 60 }
0x11e8   : > { %v1422_v57 = vpop.permute.xlu1 %1421 }
0x11e9   : > { %1426 = vst.msk [vmem:[%s1425_s14] sm:$0xff] %vm459_vm10, %v1422_v57 }
0x11ea   : > { %v2276_v59 = vld [vmem:[%s3235_s4 + $0x8] sm:$0xff]  ;;  %v2275_v58 = vld [vmem:[%s3235_s4] sm:$0xff]  ;;  %v2873_v5 = vld [vmem:[#allocation3 + $0x8] sm:$0xff]  ;;  %vm1767_vm11 = vcmask 7168   ;;  %s2488_s23 = smov 16  }
0x11eb   : > { %1522 = vmatpush.bf16.msra.mxu0 %v2276_v59  ;;  %2277 = vmatpush.bf16.msra.mxu2 %v2276_v59  ;;  %v2871_v4 = vld [vmem:[#allocation3] sm:$0xff]  ;;  %v2879_v8 = vld [vmem:[#allocation3 + $0x48] sm:$0xff]  ;;  %v2895_v14 = vld [vmem:[#allocation3 + $0x10] sm:$0xff] }
0x11ec   : > { %v2875_v7 = vld [vmem:[#allocation3 + $0x40] sm:$0xff]  ;;  %1601 = vmatpush.bf16.msra.mxu1 %v2275_v58  ;;  %2278 = vmatpush.bf16.msra.mxu3 %v2275_v58  ;;  %v1465_v54 = vpack.c.bf16 %v2873_v5, %v2871_v4  ;;  %v2897_v15 = vld [vmem:[#allocation3 + $0x18] sm:$0xff]  ;;  %v2899_v16 = vld [vmem:[#allocation3 + $0x50] sm:$0xff] }
0x11ed   : > { %v1469_v11 = vpack.c.bf16 %v2879_v8, %v2875_v7  ;;  %v2901_v3 = vld [vmem:[#allocation3 + $0x58] sm:$0xff]  ;;  %v1466_v19 = vpack.c.bf16 %v2897_v15, %v2895_v14  ;;  %v2923_v22 = vld [vmem:[#allocation3 + $0x20] sm:$0xff]  ;;  %v2925_v23 = vld [vmem:[#allocation3 + $0x28] sm:$0xff] }
0x11ee   : > { %v1470_v6 = vpack.c.bf16 %v2901_v3, %v2899_v16  ;;  %v2927_v24 = vld [vmem:[#allocation3 + $0x60] sm:$0xff]  ;;  %v2929_v25 = vld [vmem:[#allocation3 + $0x68] sm:$0xff]  ;;  %v1467_v28 = vpack.c.bf16 %v2925_v23, %v2923_v22  ;;  %v2951_v32 = vld [vmem:[#allocation3 + $0x30] sm:$0xff] }
0x11ef   : > { %2257 = vmatmul.msk.bf16.vlgmr.msra.gmra.mxu1 %vm459_vm10, %v1465_v54  ;;  %2261 = vmatmul.msk.bf16.vlgmr.msra.gmra.mxu3 %vm459_vm10, %v1469_v11  ;;  %3247 = vst [vmem:[#allocation7_spill] sm:$0xff] %v2929_v25  ;;  %v1471_v56 = vpack.c.bf16 %v2929_v25, %v2927_v24  ;;  %v2953_v63 = vld [vmem:[#allocation3 + $0x38] sm:$0xff]  ;;  %v2955_v33 = vld [vmem:[#allocation3 + $0x70] sm:$0xff] }
0x11f0   : > { %v2859_v53 = vld [vmem:[#allocation4] sm:$0xff]  ;;  %v2861_v60 = vld [vmem:[#allocation4 + $0x8] sm:$0xff]  ;;  %v2887_v12 = vld [vmem:[#allocation4 + $0x10] sm:$0xff]  ;;  %3250 = vst [vmem:[#allocation10_spill] sm:$0xff] %v2955_v33  ;;  %v1468_v36 = vpack.c.bf16 %v2953_v63, %v2951_v32 }
0x11f1   : > { %v2863_v61 = vld [vmem:[#allocation4 + $0x40] sm:$0xff]  ;;  %v2865_v0 = vld [vmem:[#allocation4 + $0x48] sm:$0xff]  ;;  %v1473_v1 = vpack.c.bf16 %v2861_v60, %v2859_v53  ;;  %v2889_v62 = vld [vmem:[#allocation4 + $0x18] sm:$0xff] }
0x11f2   : > { %v1477_v2 = vpack.c.bf16 %v2865_v0, %v2863_v61  ;;  %v2891_v48 = vld [vmem:[#allocation4 + $0x50] sm:$0xff]  ;;  %v2893_v13 = vld [vmem:[#allocation4 + $0x58] sm:$0xff]  ;;  %v1474_v17 = vpack.c.bf16 %v2889_v62, %v2887_v12  ;;  %v2915_v10 = vld [vmem:[#allocation4 + $0x20] sm:$0xff] }
0x11f3   : > { %2245 = vmatmul.msk.bf16.vlgmr.msra.gmra.mxu0 %vm459_vm10, %v1473_v1  ;;  %v1478_v18 = vpack.c.bf16 %v2893_v13, %v2891_v48  ;;  %v2917_v9 = vld [vmem:[#allocation4 + $0x28] sm:$0xff]  ;;  %v2919_v20 = vld [vmem:[#allocation4 + $0x60] sm:$0xff]  ;;  %v2943_v29 = vld [vmem:[#allocation4 + $0x30] sm:$0xff] }
0x11f4   : > { %2249 = vmatmul.msk.bf16.vlgmr.msra.gmra.mxu2 %vm459_vm10, %v1477_v2  ;;  %v2921_v21 = vld [vmem:[#allocation4 + $0x68] sm:$0xff]  ;;  %v1475_v26 = vpack.c.bf16 %v2917_v9, %v2915_v10  ;;  %v2945_v30 = vld [vmem:[#allocation4 + $0x38] sm:$0xff]  ;;  %v2947_v45 = vld [vmem:[#allocation4 + $0x70] sm:$0xff] }
0x11f5   : > { %3246 = vst [vmem:[#allocation6_spill] sm:$0xff] %v2921_v21  ;;  %v1479_v27 = vpack.c.bf16 %v2921_v21, %v2919_v20  ;;  %v2949_v31 = vld [vmem:[#allocation4 + $0x78] sm:$0xff]  ;;  %v1476_v47 = vpack.c.bf16 %v2945_v30, %v2943_v29 }
0x11f6   : > { %3248 = vst [vmem:[#allocation8_spill] sm:$0xff] %v2947_v45  ;;  %v2957_v34 = vld [vmem:[#allocation3 + $0x78] sm:$0xff]  ;;  %v1480_v35 = vpack.c.bf16 %v2949_v31, %v2947_v45 }
0x11f7   : > { %3249 = vst [vmem:[#allocation9_spill] sm:$0xff] %v2949_v31  ;;  %v1472_v37 = vpack.c.bf16 %v2957_v34, %v2955_v33  ;;  %v2974_v50 = vld [vmem:[%s3236_s5] ss:$0 sm:$0xff] }
0x11f8   : > { %3251 = vst [vmem:[#allocation11_spill] sm:$0xff] %v2957_v34  ;;  %v2980_v51 = vld [vmem:[%s3237_s6] ss:$0 sm:$0xff] }
0x11ff   : > { %2258 = vmatmul.msk.bf16.gmra.mxu1 %vm459_vm10, %v1466_v19  ;;  %2262 = vmatmul.msk.bf16.gmra.mxu3 %vm459_vm10, %v1470_v6 }
0x1203   : > { %2246 = vmatmul.msk.bf16.gmra.mxu0 %vm459_vm10, %v1474_v17 }
0x1204   : > { %2250 = vmatmul.msk.bf16.gmra.mxu2 %vm459_vm10, %v1478_v18 }
0x120f   : > { %2259 = vmatmul.msk.bf16.gmra.mxu1 %vm459_vm10, %v1467_v28  ;;  %2263 = vmatmul.msk.bf16.gmra.mxu3 %vm459_vm10, %v1471_v56 }
0x1213   : > { %2247 = vmatmul.msk.bf16.gmra.mxu0 %vm459_vm10, %v1475_v26 }
0x1214   : > { %2251 = vmatmul.msk.bf16.gmra.mxu2 %vm459_vm10, %v1479_v27 }
0x121f   : > { %2260 = vmatmul.msk.bf16.gmra.mxu1 %vm459_vm10, %v1468_v36  ;;  %2264 = vmatmul.msk.bf16.gmra.mxu3 %vm459_vm10, %v1472_v37 }
0x1223   : > { %2248 = vmatmul.msk.bf16.gmra.mxu0 %vm459_vm10, %v1476_v47 }
0x1224   : > { %2252 = vmatmul.msk.bf16.gmra.mxu2 %vm459_vm10, %v1480_v35 }
0x126c   : > { %v1603_v38 = vpop.f32.mrf.mxu1 }
0x1270   : > { %v1524_v52 = vpop.f32.mrf.mxu0 }
0x1271   : > { %v1604_v39 = vadd.f32 %v1603_v38, %v1524_v52 }
0x1272   : > { %v1623_v42 = vpop.f32.mrf.mxu3 }
0x1273   : > { %v1647_v40 = vadd.f32 %v2974_v50, %v1604_v39 }
0x1274   : > { %v1605_v46 = vpop.f32.mrf.mxu1 }
0x1275   : > { %2406 = vtanh.f32 %v1647_v40 }
0x1277   : > { %v1544_v41 = vpop.f32.mrf.mxu2 }
0x1278   : > { %v1624_v43 = vadd.f32 %v1623_v42, %v1544_v41  ;;  %v1526_v44 = vpop.f32.mrf.mxu0 }
0x1279   : > { %v1606_v55 = vadd.f32 %v1605_v46, %v1526_v44 }
0x127a   : > { %v1655_v49 = vadd.f32 %v2974_v50, %v1624_v43  ;;  %v1625_v2 = vpop.f32.mrf.mxu3 }
0x127b   : > { %v2407_v57 = vpop.eup %2406  ;;  %v1648_v59 = vadd.f32 %v2974_v50, %v1606_v55 }
0x127c   : > { %2408 = vtanh.f32 %v1655_v49  ;;  %v1683_v58 = vmul.f32 %v2407_v57, %v2980_v51  ;;  %v1608_v18 = vpop.f32.mrf.mxu1 }
0x127d   : > { %2410 = vtanh.f32 %v1648_v59 }
0x127e   : > { %v1699_v54 = vsel %vm459_vm10, %v1683_v58, 0.0 }
0x127f   : > { %v1546_v1 = vpop.f32.mrf.mxu2  ;;  %1700 = vadd.xlane.f32.xlu0 %v1699_v54 }
0x1280   : > { %v1626_v11 = vadd.f32 %v1625_v2, %v1546_v1  ;;  %v1529_v17 = vpop.f32.mrf.mxu0 }
0x1281   : > { %v1609_v26 = vadd.f32 %v1608_v18, %v1529_v17 }
0x1282   : > { %v2409_v19 = vpop.eup %2408  ;;  %v1656_v6 = vadd.f32 %v2974_v50, %v1626_v11  ;;  %v1628_v37 = vpop.f32.mrf.mxu3 }
0x1283   : > { %v1691_v27 = vmul.f32 %v2409_v19, %v2980_v51  ;;  %v2411_v28 = vpop.eup %2410  ;;  %v1649_v56 = vadd.f32 %v2974_v50, %v1609_v26 }
0x1284   : > { %2412 = vtanh.f32 %v1656_v6  ;;  %v1684_v35 = vmul.f32 %v2411_v28, %v2980_v51  ;;  %v1610_v40 = vpop.f32.mrf.mxu1 }
0x1285   : > { %v1723_v47 = vsel %vm459_vm10, %v1691_v27, 0.0  ;;  %2414 = vtanh.f32 %v1649_v56 }
0x1286   : > { %1724 = vadd.xlane.f32.xlu2 %v1723_v47  ;;  %v1702_v52 = vsel %vm459_vm10, %v1684_v35, 0.0 }
0x1287   : > { %v1549_v36 = vpop.f32.mrf.mxu2  ;;  %1703 = vadd.xlane.f32.xlu0 %v1702_v52 }
0x1288   : > { %v1629_v38 = vadd.f32 %v1628_v37, %v1549_v36  ;;  %v1531_v39 = vpop.f32.mrf.mxu0 }
0x1289   : > { %v1611_v43 = vadd.f32 %v1610_v40, %v1531_v39 }
0x128a   : > { %v2413_v41 = vpop.eup %2412  ;;  %v1657_v42 = vadd.f32 %v2974_v50, %v1629_v38  ;;  %v1630_v59 = vpop.f32.mrf.mxu3 }
0x128b   : > { %v1692_v44 = vmul.f32 %v2413_v41, %v2980_v51  ;;  %v2415_v46 = vpop.eup %2414  ;;  %v1650_v55 = vadd.f32 %v2974_v50, %v1611_v43 }
0x128c   : > { %2416 = vtanh.f32 %v1657_v42  ;;  %v1685_v49 = vmul.f32 %v2415_v46, %v2980_v51  ;;  %v1613_v11 = vpop.f32.mrf.mxu1 }
0x128d   : > { %v1726_v1 = vsel %vm459_vm10, %v1692_v44, 0.0  ;;  %2418 = vtanh.f32 %v1650_v55 }
0x128e   : > { %v1705_v58 = vsel %vm459_vm10, %v1685_v49, 0.0 }
0x128f   : > { %v1551_v57 = vpop.f32.mrf.mxu2  ;;  %1706 = vadd.xlane.f32.xlu1 %v1705_v58  ;;  %1727 = vadd.xlane.f32.xlu0 %v1726_v1 }
0x1290   : > { %v1631_v2 = vadd.f32 %v1630_v59, %v1551_v57  ;;  %v1534_v54 = vpop.f32.mrf.mxu0 }
0x1291   : > { %v1614_v19 = vadd.f32 %v1613_v11, %v1534_v54 }
0x1292   : > { %v2417_v17 = vpop.eup %2416  ;;  %v1658_v18 = vadd.f32 %v2974_v50, %v1631_v2  ;;  %v1633_v56 = vpop.f32.mrf.mxu3 }
0x1293   : > { %v1693_v6 = vmul.f32 %v2417_v17, %v2980_v51  ;;  %v1651_v26 = vadd.f32 %v2974_v50, %v1614_v19  ;;  %v2419_v47 = vpop.eup %2418 }
0x1294   : > { %2420 = vtanh.f32 %v1658_v18  ;;  %v1615_v37 = vpop.f32.mrf.mxu1  ;;  %v1686_v41 = vmul.f32 %v2419_v47, %v2980_v51 }
0x1295   : > { %v1729_v27 = vsel %vm459_vm10, %v1693_v6, 0.0  ;;  %2422 = vtanh.f32 %v1651_v26 }
0x1296   : > { %v1708_v55 = vsel %vm459_vm10, %v1686_v41, 0.0 }
0x1297   : > { %v1554_v28 = vpop.f32.mrf.mxu2  ;;  %1730 = vadd.xlane.f32.xlu1 %v1729_v27 }
0x1298   : > { %v1634_v35 = vadd.f32 %v1633_v56, %v1554_v28  ;;  %v1536_v36 = vpop.f32.mrf.mxu0 }
0x1299   : > { %v1616_v39 = vadd.f32 %v1615_v37, %v1536_v36 }
0x129a   : > { %v2421_v52 = vpop.eup %2420  ;;  %v1659_v38 = vadd.f32 %v2974_v50, %v1634_v35  ;;  %v1635_v49 = vpop.f32.mrf.mxu3 }
0x129b   : > { %v1694_v40 = vmul.f32 %v2421_v52, %v2980_v51  ;;  %v1652_v42 = vadd.f32 %v2974_v50, %v1616_v39  ;;  %v2423_v44 = vpop.eup %2422 }
0x129c   : > { %2424 = vtanh.f32 %v1659_v38  ;;  %v1618_v58 = vpop.f32.mrf.mxu1  ;;  %v1687_v1 = vmul.f32 %v2423_v44, %v2980_v51 }
0x129d   : > { %v1732_v43 = vsel %vm459_vm10, %v1694_v40, 0.0  ;;  %2426 = vtanh.f32 %v1652_v42 }
0x129e   : > { %1733 = vadd.xlane.f32.xlu2 %v1732_v43  ;;  %v1711_v19 = vsel %vm459_vm10, %v1687_v1, 0.0 }
0x129f   : > { %v1556_v46 = vpop.f32.mrf.mxu2  ;;  %1709 = vadd.xlane.f32.xlu1 %v1708_v55 }
0x12a0   : > { %v1636_v57 = vadd.f32 %v1635_v49, %v1556_v46  ;;  %v1539_v59 = vpop.f32.mrf.mxu0 }
0x12a1   : > { %v1619_v11 = vadd.f32 %v1618_v58, %v1539_v59 }
0x12a2   : > { %v2425_v2 = vpop.eup %2424  ;;  %v1660_v54 = vadd.f32 %v2974_v50, %v1636_v57  ;;  %v1638_v28 = vpop.f32.mrf.mxu3 }
0x12a3   : > { %v1695_v17 = vmul.f32 %v2425_v2, %v2980_v51  ;;  %v1653_v18 = vadd.f32 %v2974_v50, %v1619_v11  ;;  %v2427_v26 = vpop.eup %2426 }
0x12a4   : > { %2428 = vtanh.f32 %v1660_v54  ;;  %v1620_v35 = vpop.f32.mrf.mxu1  ;;  %v1688_v36 = vmul.f32 %v2427_v26, %v2980_v51 }
0x12a5   : > { %v1735_v6 = vsel %vm459_vm10, %v1695_v17, 0.0  ;;  %2430 = vtanh.f32 %v1653_v18 }
0x12a6   : > { %1712 = vadd.xlane.f32.xlu2 %v1711_v19  ;;  %1736 = vadd.xlane.f32.xlu0 %v1735_v6  ;;  %v1714_v42 = vsel %vm459_vm10, %v1688_v36, 0.0 }
0x12a7   : > { %v1559_v27 = vpop.f32.mrf.mxu2 }
0x12a8   : > { %v1639_v56 = vadd.f32 %v1638_v28, %v1559_v27  ;;  %v1541_v47 = vpop.f32.mrf.mxu0 }
0x12a9   : > { %v1621_v38 = vadd.f32 %v1620_v35, %v1541_v47 }
0x12aa   : > { %v2429_v37 = vpop.eup %2428  ;;  %v1661_v52 = vadd.f32 %v2974_v50, %v1639_v56  ;;  %v1640_v46 = vpop.f32.mrf.mxu3 }
0x12ab   : > { %v1696_v39 = vmul.f32 %v2429_v37, %v2980_v51  ;;  %v2431_v40 = vpop.eup %2430  ;;  %v1654_v41 = vadd.f32 %v2974_v50, %v1621_v38 }
0x12ac   : > { %2432 = vtanh.f32 %v1661_v52  ;;  %v1689_v43 = vmul.f32 %v2431_v40, %v2980_v51  ;;  %v2405_v40 = vld [vmem:[#allocation5] ss:$0 sm:$0xff] }
0x12ad   : > { %2434 = vtanh.f32 %v1654_v41 }
0x12ae   : > { %1715 = vadd.xlane.f32.xlu2 %v1714_v42  ;;  %v1717_v49 = vsel %vm459_vm10, %v1689_v43, 0.0  ;;  %v2487_v43 = vmov 0  }
0x12af   : > { %v1561_v44 = vpop.f32.mrf.mxu2  ;;  %1718 = vadd.xlane.f32.xlu0 %v1717_v49  ;;  %2401 = vset.pattern.permute.xlu2 %v2487_v43 }
0x12b0   : > { %v1641_v55 = vadd.f32 %v1640_v46, %v1561_v44  ;;  %2402 = vset.pattern.permute.xlu0 %v2487_v43  ;;  %2400 = vset.pattern.permute.xlu1 %v2487_v43 }
0x12b2   : > { %v2433_v57 = vpop.eup %2432  ;;  %v1662_v59 = vadd.f32 %v2974_v50, %v1641_v55  ;;  %v1738_v50 = vsel %vm459_vm10, %v1696_v39, 0.0 }
0x12b3   : > { %v1697_v58 = vmul.f32 %v2433_v57, %v2980_v51  ;;  %v2435_v1 = vpop.eup %2434 }
0x12b4   : > { %2436 = vtanh.f32 %v1662_v59  ;;  %v1690_v54 = vmul.f32 %v2435_v1, %v2980_v51 }
0x12b5   : > { %v1741_v2 = vsel %vm459_vm10, %v1697_v58, 0.0 }
0x12b6   : > { %1742 = vadd.xlane.f32.xlu2 %v1741_v2  ;;  %v1720_v11 = vsel %vm459_vm10, %v1690_v54, 0.0 }
0x12b7   : > { %1721 = vadd.xlane.f32.xlu1 %v1720_v11 }
0x12ba   : > { %v2437_v17 = vpop.eup %2436 }
0x12bb   : > { %v1698_v18 = vmul.f32 %v2437_v17, %v2980_v51 }
0x12bd   : > { %v1744_v19 = vsel %vm459_vm10, %v1698_v18, 0.0 }
0x12be   : > { %1745 = vadd.xlane.f32.xlu0 %v1744_v19 }
0x12bf   : > { %1739 = vadd.xlane.f32.xlu1 %v1738_v50 }
0x12f2   : > { %v1701_v6 = vpop.xlane.xlu0 %1700 }
0x12f3   : > { %v1751_v42 = vadd.f32 %v2405_v40, %v1701_v6 }
0x12f5   : > { %v1768_v1 = vsel %vm1767_vm11, %v1751_v42, -inf }
0x12f9   : > { %v1725_v26 = vpop.xlane.xlu2 %1724 }
0x12fa   : > { %v1704_v27 = vpop.xlane.xlu0 %1703  ;;  %v3040_v2 = vadd.f32 %v2405_v40, %v1725_v26 }
0x12fb   : > { %v1752_v55 = vadd.f32 %v2405_v40, %v1704_v27 }
0x12fd   : > { %v1769_v26 = vsel %vm1767_vm11, %v1752_v55, -inf }
0x1302   : > { %v1707_v28 = vpop.xlane.xlu1 %1706  ;;  %v1728_v47 = vpop.xlane.xlu0 %1727 }
0x1303   : > { %v1753_v57 = vadd.f32 %v2405_v40, %v1707_v28  ;;  %v3051_v6 = vadd.f32 %v2405_v40, %v1728_v47 }
0x130a   : > { %v1731_v35 = vpop.xlane.xlu1 %1730 }
0x1311   : > { %v1734_v56 = vpop.xlane.xlu2 %1733 }
0x1312   : > { %v1710_v52 = vpop.xlane.xlu1 %1709  ;;  %v3042_v54 = vadd.f32 %v2405_v40, %v1734_v56  ;;  %v1770_v56 = vsel %vm1767_vm11, %v1753_v57, -inf }
0x1313   : > { %v1754_v39 = vadd.f32 %v2405_v40, %v1710_v52 }
0x1314   : > { %v1786_v47 = vsel %vm1767_vm11, %v3042_v54, -inf }
0x1315   : > { %v1771_v17 = vsel %vm1767_vm11, %v1754_v39, -inf }
0x1319   : > { %v1713_v36 = vpop.xlane.xlu2 %1712  ;;  %v1737_v37 = vpop.xlane.xlu0 %1736 }
0x131a   : > { %v3029_v51 = vadd.f32 %v2405_v40, %v1713_v36  ;;  %v3055_v36 = vadd.f32 %v2405_v40, %v1731_v35  ;;  %v3063_v45 = vadd.f32 %v2405_v40, %v1737_v37 }
0x131c   : > { %v1772_v59 = vsel %vm1767_vm11, %v3029_v51, -inf  ;;  %v1788_v33 = vsel %vm1767_vm11, %v3063_v45, -inf }
0x131d   : > { %v1773_v27 = vmax.f32 %v1768_v1, %v1772_v59  ;;  %v1782_v1 = vsel %vm1767_vm11, %v3051_v6, -inf }
0x1321   : > { %v1716_v38 = vpop.xlane.xlu2 %1715 }
0x1322   : > { %v1719_v41 = vpop.xlane.xlu0 %1718  ;;  %v3031_v44 = vadd.f32 %v2405_v40, %v1716_v38 }
0x1323   : > { %v3033_v46 = vadd.f32 %v2405_v40, %v1719_v41 }
0x1324   : > { %v1774_v18 = vsel %vm1767_vm11, %v3031_v44, -inf }
0x1325   : > { %v1776_v19 = vsel %vm1767_vm11, %v3033_v46, -inf  ;;  %v1775_v38 = vmax.f32 %v1769_v26, %v1774_v18  ;;  %v1784_v18 = vsel %vm1767_vm11, %v3055_v36, -inf }
0x1326   : > { %v1777_v41 = vmax.f32 %v1770_v56, %v1776_v19 }
0x1328   : > { %v1785_v37 = vmax.f32 %v1777_v41, %v1784_v18 }
0x1329   : > { %v1743_v11 = vpop.xlane.xlu2 %1742 }
0x132a   : > { %v1722_v49 = vpop.xlane.xlu1 %1721  ;;  %v3057_v52 = vadd.f32 %v2405_v40, %v1743_v11 }
0x132b   : > { %v3037_v58 = vadd.f32 %v2405_v40, %v1722_v49  ;;  %v1780_v49 = vsel %vm1767_vm11, %v3040_v2, -inf }
0x132c   : > { %v1781_v35 = vmax.f32 %v1773_v27, %v1780_v49  ;;  %v1792_v19 = vsel %vm1767_vm11, %v3057_v52, -inf }
0x132d   : > { %v1778_v50 = vsel %vm1767_vm11, %v3037_v58, -inf  ;;  %v1793_v49 = vmax.f32 %v1785_v37, %v1792_v19 }
0x132e   : > { %v1779_v28 = vmax.f32 %v1771_v17, %v1778_v50 }
0x1330   : > { %v1787_v17 = vmax.f32 %v1779_v28, %v1786_v47  ;;  %v1789_v28 = vmax.f32 %v1781_v35, %v1788_v33 }
0x1331   : > { %v1746_v43 = vpop.xlane.xlu0 %1745 }
0x1332   : > { %v3065_v59 = vadd.f32 %v2405_v40, %v1746_v43  ;;  %v1740_v11 = vpop.xlane.xlu1 %1739  ;;  %v1783_v43 = vmax.f32 %v1775_v38, %v1782_v1 }
0x1333   : > { %v3075_v26 = vadd.f32 %v2405_v40, %v1740_v11 }
0x1334   : > { %v1794_v50 = vsel %vm1767_vm11, %v3065_v59, -inf }
0x1335   : > { %v1795_v56 = vmax.f32 %v1787_v17, %v1794_v50  ;;  %v1790_v27 = vsel %vm1767_vm11, %v3075_v26, -inf }
0x1336   : > { %v1791_v47 = vmax.f32 %v1783_v43, %v1790_v27 }
0x1337   : > { %v1797_v31 = vmax.f32 %v1793_v49, %v1795_v56 }
0x1338   : > { %v1796_v34 = vmax.f32 %v1789_v28, %v1791_v47 }
0x133a   : > { %v3081_v21 = vmax.f32 %v1796_v34, %v1797_v31 }
0x133c   : > { %v1799_v25 = vsub.f32 %v1751_v42, %v3081_v21  ;;  %v1800_v40 = vsub.f32 %v1752_v55, %v3081_v21  ;;  %v1801_v41 = vsub.f32 %v1753_v57, %v3081_v21  ;;  %v1802_v38 = vsub.f32 %v1754_v39, %v3081_v21 }
0x133d   : > { %v1803_v1 = vsub.f32 %v3029_v51, %v3081_v21  ;;  %v1804_v33 = vsub.f32 %v3031_v44, %v3081_v21  ;;  %v1805_v31 = vsub.f32 %v3033_v46, %v3081_v21  ;;  %v1806_v42 = vsub.f32 %v3037_v58, %v3081_v21 }
0x133e   : > { %v1815_v17 = vmul.f32 1.442695, %v1799_v25  ;;  %v1817_v11 = vmul.f32 1.442695, %v1800_v40  ;;  %v1819_v35 = vmul.f32 1.442695, %v1801_v41  ;;  %v1807_v25 = vsub.f32 %v3040_v2, %v3081_v21 }
0x133f   : > { %v1821_v18 = vmul.f32 1.442695, %v1802_v38  ;;  %v1823_v34 = vmul.f32 1.442695, %v1803_v1  ;;  %v1825_v39 = vmul.f32 1.442695, %v1804_v33  ;;  %v1808_v46 = vsub.f32 %v3051_v6, %v3081_v21 }
0x1340   : > { %2438 = vpow2.f32 %v1815_v17  ;;  %v1827_v51 = vmul.f32 1.442695, %v1805_v31  ;;  %v1829_v57 = vmul.f32 1.442695, %v1806_v42  ;;  %v1809_v37 = vsub.f32 %v3055_v36, %v3081_v21 }
0x1341   : > { %2440 = vpow2.f32 %v1817_v11  ;;  %v1831_v56 = vmul.f32 1.442695, %v1807_v25  ;;  %v1810_v28 = vsub.f32 %v3042_v54, %v3081_v21  ;;  %v1833_v49 = vmul.f32 1.442695, %v1808_v46 }
0x1342   : > { %2442 = vpow2.f32 %v1819_v35  ;;  %v1811_v36 = vsub.f32 %v3063_v45, %v3081_v21  ;;  %v1835_v38 = vmul.f32 1.442695, %v1809_v37  ;;  %v1812_v54 = vsub.f32 %v3075_v26, %v3081_v21 }
0x1343   : > { %2444 = vpow2.f32 %v1821_v18  ;;  %v1837_v33 = vmul.f32 1.442695, %v1810_v28  ;;  %v1813_v45 = vsub.f32 %v3057_v52, %v3081_v21  ;;  %v1814_v26 = vsub.f32 %v3065_v59, %v3081_v21 }
0x1344   : > { %2446 = vpow2.f32 %v1823_v34  ;;  %v1839_v34 = vmul.f32 1.442695, %v1811_v36 }
0x1345   : > { %2448 = vpow2.f32 %v1825_v39 }
0x1346   : > { %v3097_v44 = vpop.eup %2438  ;;  %2450 = vpow2.f32 %v1827_v51  ;;  %v1841_v51 = vmul.f32 1.442695, %v1812_v54 }
0x1347   : > { %v3099_v55 = vpop.eup %2440  ;;  %v1847_v19 = vsel %vm1767_vm11, %v3097_v44, 0.0  ;;  %2452 = vpow2.f32 %v1829_v57 }
0x1348   : > { %v3105_v58 = vpop.eup %2442  ;;  %v1848_v50 = vsel %vm1767_vm11, %v3099_v55, 0.0  ;;  %2454 = vpow2.f32 %v1831_v56 }
0x1349   : > { %v3109_v2 = vpop.eup %2444  ;;  %v1849_v43 = vadd.f32 %v1848_v50, %v1847_v19  ;;  %v1850_v6 = vsel %vm1767_vm11, %v3105_v58, 0.0  ;;  %2456 = vpow2.f32 %v1833_v49  ;;  %v1843_v50 = vmul.f32 1.442695, %v1813_v45 }
0x134a   : > { %v3115_v27 = vpop.eup %2446  ;;  %v1852_v40 = vsel %vm1767_vm11, %v3109_v2, 0.0  ;;  %2458 = vpow2.f32 %v1835_v38 }
0x134b   : > { %v1851_v47 = vadd.f32 %v1850_v6, %v1849_v43  ;;  %v3121_v41 = vpop.eup %2448  ;;  %v1854_v17 = vsel %vm1767_vm11, %v3115_v27, 0.0  ;;  %2460 = vpow2.f32 %v1837_v33  ;;  %v1845_v43 = vmul.f32 1.442695, %v1814_v26 }
0x134c   : > { %v3127_v11 = vpop.eup %2450  ;;  %v1856_v18 = vsel %vm1767_vm11, %v3121_v41, 0.0  ;;  %2462 = vpow2.f32 %v1839_v34 }
0x134d   : > { %v1853_v1 = vadd.f32 %v1852_v40, %v1851_v47  ;;  %v3133_v31 = vpop.eup %2452  ;;  %v1858_v39 = vsel %vm1767_vm11, %v3127_v11, 0.0  ;;  %2464 = vpow2.f32 %v1841_v51 }
0x134e   : > { %v2455_v25 = vpop.eup %2454  ;;  %v1860_v57 = vsel %vm1767_vm11, %v3133_v31, 0.0  ;;  %2466 = vpow2.f32 %v1843_v50 }
0x134f   : > { %v1855_v35 = vadd.f32 %v1854_v17, %v1853_v1  ;;  %v2457_v19 = vpop.eup %2456  ;;  %v1862_v37 = vsel %vm1767_vm11, %v2455_v25, 0.0  ;;  %2468 = vpow2.f32 %v1845_v43 }
0x1350   : > { %v2459_v56 = vpop.eup %2458  ;;  %v1864_v28 = vsel %vm1767_vm11, %v2457_v19, 0.0 }
0x1351   : > { %v1857_v42 = vadd.f32 %v1856_v18, %v1855_v35  ;;  %v2461_v49 = vpop.eup %2460  ;;  %v1866_v59 = vsel %vm1767_vm11, %v2459_v56, 0.0 }
0x1352   : > { %v2463_v47 = vpop.eup %2462  ;;  %v1868_v36 = vsel %vm1767_vm11, %v2461_v49, 0.0 }
0x1353   : > { %v1859_v46 = vadd.f32 %v1858_v39, %v1857_v42  ;;  %v2465_v38 = vpop.eup %2464  ;;  %v1870_v17 = vsel %vm1767_vm11, %v2463_v47, 0.0 }
0x1354   : > { %v2467_v54 = vpop.eup %2466  ;;  %v1872_v35 = vsel %vm1767_vm11, %v2465_v38, 0.0 }
0x1355   : > { %v1861_v52 = vadd.f32 %v1860_v57, %v1859_v46  ;;  %v2469_v18 = vpop.eup %2468  ;;  %v1874_v34 = vsel %vm1767_vm11, %v2467_v54, 0.0 }
0x1356   : > { %v1876_v39 = vsel %vm1767_vm11, %v2469_v18, 0.0 }
0x1357   : > { %v1863_v6 = vadd.f32 %v1862_v37, %v1861_v52 }
0x1359   : > { %v1865_v21 = vadd.f32 %v1864_v28, %v1863_v6 }
0x135b   : > { %v1867_v40 = vadd.f32 %v1866_v59, %v1865_v21 }
0x135d   : > { %v1869_v1 = vadd.f32 %v1868_v36, %v1867_v40 }
0x135f   : > { %v1871_v33 = vadd.f32 %v1870_v17, %v1869_v1 }
0x1361   : > { %v1873_v45 = vadd.f32 %v1872_v35, %v1871_v33 }
0x1363   : > { %v1875_v42 = vadd.f32 %v1874_v34, %v1873_v45 }
0x1365   : > { %v1877_v51 = vadd.f32 %v1876_v39, %v1875_v42 }
0x1367   : > { %2470 = vrcp.f32 %v1877_v51 }
0x136d   : > { %v2471_v26 = vpop.eup %2470 }
0x136e   : > { %v1881_v46 = vmul.f32 %v2471_v26, %v3105_v58  ;;  %v1880_v57 = vmul.f32 %v2471_v26, %v3099_v55  ;;  %v1879_v50 = vmul.f32 %v2471_v26, %v3097_v44  ;;  %v1888_v52 = vmul.f32 %v2471_v26, %v2457_v19 }
0x136f   : > { %v1882_v37 = vmul.f32 %v2471_v26, %v3109_v2  ;;  %v1883_v43 = vmul.f32 %v2471_v26, %v3115_v27  ;;  %v1891_v6 = vmul.f32 %v2471_v26, %v2463_v47  ;;  %v1884_v28 = vmul.f32 %v2471_v26, %v3121_v41 }
0x1370   : > { %1907 = vperm.xlu0 %2402, %v1881_v46   ;;  %1902 = vperm.xlu2 %2401, %v1880_v57   ;;  %v1885_v58 = vmul.f32 %v2471_v26, %v3127_v11  ;;  %v1894_v44 = vmul.f32 %v2471_v26, %v2469_v18  ;;  %v1886_v55 = vmul.f32 %v2471_v26, %v3133_v31 }
0x1371   : > { %1897 = vperm.xlu1 %2400, %v1879_v50   ;;  %v1887_v21 = vmul.f32 %v2471_v26, %v2455_v25  ;;  %v1889_v2 = vmul.f32 %v2471_v26, %v2459_v56  ;;  %v1890_v27 = vmul.f32 %v2471_v26, %v2461_v49  ;;  %v1892_v19 = vmul.f32 %v2471_v26, %v2465_v38 }
0x1372   : > { %v1893_v59 = vmul.f32 %v2471_v26, %v2467_v54 }
0x1378   : > { %1942 = vperm.xlu0 %2402, %v1888_v52   ;;  %1912 = vperm.xlu2 %2401, %v1882_v37  }
0x1379   : > { %1917 = vperm.xlu1 %2400, %v1883_v43  }
0x1380   : > { %1957 = vperm.xlu0 %2402, %v1891_v6   ;;  %1922 = vperm.xlu2 %2401, %v1884_v28  }
0x1381   : > { %1927 = vperm.xlu1 %2400, %v1885_v58  }
0x1388   : > { %1972 = vperm.xlu0 %2402, %v1894_v44   ;;  %1932 = vperm.xlu2 %2401, %v1886_v55  }
0x1389   : > { %1937 = vperm.xlu1 %2400, %v1887_v21  }
0x1390   : > { %1947 = vperm.xlu2 %2401, %v1889_v2  }
0x1391   : > { %1952 = vperm.xlu1 %2400, %v1890_v27  }
0x1398   : > { %1962 = vperm.xlu2 %2401, %v1892_v19  }
0x1399   : > { %1967 = vperm.xlu1 %2400, %v1893_v59  }
0x13ca   : > { %v1903_v41 = vpop.permute.xlu2 %1902 }
0x13cb   : > { %v1976_v47 = vmul.f32 %v1903_v41, %v2873_v5  ;;  %v2023_v31 = vmul.f32 %v1903_v41, %v2861_v60 }
0x13cd   : > { %v1992_v49 = vsel %vm459_vm10, %v1976_v47, 0.0  ;;  %v2039_v35 = vsel %vm459_vm10, %v2023_v31, 0.0 }
0x13d2   : > { %v1913_v11 = vpop.permute.xlu2 %1912 }
0x13d3   : > { %v1978_v33 = vmul.f32 %v1913_v11, %v2897_v15  ;;  %v2025_v45 = vmul.f32 %v1913_v11, %v2889_v62 }
0x13d5   : > { %v2043_v50 = vsel %vm459_vm10, %v2025_v45, 0.0 }
0x13da   : > { %v1923_v38 = vpop.permute.xlu2 %1922 }
0x13db   : > { %v1980_v34 = vmul.f32 %v1923_v38, %v2925_v23  ;;  %v2027_v6 = vmul.f32 %v1923_v38, %v2917_v9 }
0x13dd   : > { %v2000_v52 = vsel %vm459_vm10, %v1980_v34, 0.0  ;;  %v2047_v21 = vsel %vm459_vm10, %v2027_v6, 0.0 }
0x13e2   : > { %v1908_v40 = vpop.permute.xlu0 %1907  ;;  %v1933_v37 = vpop.permute.xlu2 %1932 }
0x13e3   : > { %v1898_v36 = vpop.permute.xlu1 %1897  ;;  %v1977_v25 = vmul.f32 %v1908_v40, %v2895_v14  ;;  %v2024_v14 = vmul.f32 %v1908_v40, %v2887_v12  ;;  %v2029_v19 = vmul.f32 %v1933_v37, %v2945_v30 }
0x13e4   : > { %v1975_v1 = vmul.f32 %v1898_v36, %v2871_v4  ;;  %v2022_v56 = vmul.f32 %v1898_v36, %v2859_v53  ;;  %v1996_v53 = vsel %vm459_vm10, %v1978_v33, 0.0 }
0x13e5   : > { %v1994_v60 = vsel %vm459_vm10, %v1977_v25, 0.0  ;;  %v2041_v39 = vsel %vm459_vm10, %v2024_v14, 0.0 }
0x13e6   : > { %v1991_v17 = vsel %vm459_vm10, %v1975_v1, 0.0  ;;  %v2038_v54 = vsel %vm459_vm10, %v2022_v56, 0.0 }
0x13e7   : > { %v1993_v5 = vadd.f32 %v1992_v49, %v1991_v17  ;;  %v2040_v4 = vadd.f32 %v2039_v35, %v2038_v54 }
0x13e9   : > { %v1995_v18 = vadd.f32 %v1994_v60, %v1993_v5  ;;  %v2042_v46 = vadd.f32 %v2041_v39, %v2040_v4  ;;  %v3252_v39 = vld [vmem:[#allocation7_spill] sm:$0xff] }
0x13ea   : > { %v1943_v55 = vpop.permute.xlu0 %1942 }
0x13eb   : > { %v1918_v42 = vpop.permute.xlu1 %1917  ;;  %v1997_v51 = vadd.f32 %v1996_v53, %v1995_v18  ;;  %v2044_v23 = vadd.f32 %v2043_v50, %v2042_v46  ;;  %v2031_v36 = vmul.f32 %v1943_v55, %v2865_v0 }
0x13ec   : > { %v1979_v15 = vmul.f32 %v1918_v42, %v2923_v22  ;;  %v2026_v26 = vmul.f32 %v1918_v42, %v2915_v10  ;;  %v1982_v22 = vmul.f32 %v1933_v37, %v2953_v63  ;;  %v1948_v63 = vpop.permute.xlu2 %1947 }
0x13ed   : > { %v1985_v30 = vmul.f32 %v1948_v63, %v2899_v16  ;;  %v2032_v38 = vmul.f32 %v1948_v63, %v2891_v48  ;;  %v2055_v0 = vsel %vm459_vm10, %v2031_v36, 0.0 }
0x13ee   : > { %v1998_v57 = vsel %vm459_vm10, %v1979_v15, 0.0  ;;  %v2045_v62 = vsel %vm459_vm10, %v2026_v26, 0.0  ;;  %v2004_v9 = vsel %vm459_vm10, %v1982_v22, 0.0  ;;  %v3253_v15 = vld [vmem:[#allocation6_spill] sm:$0xff]  ;;  %v3257_v22 = vld [vmem:[#allocation8_spill] sm:$0xff] }
0x13ef   : > { %v1999_v12 = vadd.f32 %v1998_v57, %v1997_v51  ;;  %v2046_v28 = vadd.f32 %v2045_v62, %v2044_v23  ;;  %v2057_v35 = vsel %vm459_vm10, %v2032_v38, 0.0  ;;  %v3254_v62 = vld [vmem:[#allocation11_spill] sm:$0xff] }
0x13f1   : > { %v2001_v43 = vadd.f32 %v2000_v52, %v1999_v12  ;;  %v2048_v59 = vadd.f32 %v2047_v21, %v2046_v28  ;;  %v3256_v28 = vld [vmem:[#allocation10_spill] sm:$0xff] }
0x13f2   : > { %v1958_v17 = vpop.permute.xlu0 %1957 }
0x13f3   : > { %v1928_v58 = vpop.permute.xlu1 %1927  ;;  %v1987_v14 = vmul.f32 %v1958_v17, %v2927_v24  ;;  %v2034_v18 = vmul.f32 %v1958_v17, %v2919_v20 }
0x13f4   : > { %v1981_v10 = vmul.f32 %v1928_v58, %v2951_v32  ;;  %v2028_v44 = vmul.f32 %v1928_v58, %v2943_v29  ;;  %v2051_v32 = vsel %vm459_vm10, %v2029_v19, 0.0  ;;  %v1984_v29 = vmul.f32 %v1943_v55, %v2879_v8  ;;  %v1963_v48 = vpop.permute.xlu2 %1962 }
0x13f5   : > { %v1988_v51 = vmul.f32 %v1963_v48, %v3252_v39  ;;  %v2035_v26 = vmul.f32 %v1963_v48, %v3253_v15  ;;  %v2014_v24 = vsel %vm459_vm10, %v1987_v14, 0.0  ;;  %v2061_v20 = vsel %vm459_vm10, %v2034_v18, 0.0 }
0x13f6   : > { %v2002_v2 = vsel %vm459_vm10, %v1981_v10, 0.0  ;;  %v2049_v27 = vsel %vm459_vm10, %v2028_v44, 0.0  ;;  %v2008_v8 = vsel %vm459_vm10, %v1984_v29, 0.0 }
0x13f7   : > { %v2003_v41 = vadd.f32 %v2002_v2, %v2001_v43  ;;  %v2050_v11 = vadd.f32 %v2049_v27, %v2048_v59  ;;  %v2063_v52 = vsel %vm459_vm10, %v2035_v26, 0.0  ;;  %v3255_v43 = vld [vmem:[#allocation9_spill] sm:$0xff] }
0x13f9   : > { %v2005_v47 = vadd.f32 %v2004_v9, %v2003_v41  ;;  %v2052_v1 = vadd.f32 %v2051_v32, %v2050_v11 }
0x13fa   : > { %v1973_v12 = vpop.permute.xlu0 %1972 }
0x13fb   : > { %v1938_v40 = vpop.permute.xlu1 %1937  ;;  %v1990_v23 = vmul.f32 %v1973_v12, %v3254_v62  ;;  %v2037_v6 = vmul.f32 %v1973_v12, %v3255_v43 }
0x13fc   : > { %v1983_v31 = vmul.f32 %v1938_v40, %v2875_v7  ;;  %v2030_v25 = vmul.f32 %v1938_v40, %v2863_v61  ;;  %v2010_v61 = vsel %vm459_vm10, %v1985_v30, 0.0 }
0x13fd   : > { %v2020_v59 = vsel %vm459_vm10, %v1990_v23, 0.0  ;;  %v2067_v41 = vsel %vm459_vm10, %v2037_v6, 0.0 }
0x13fe   : > { %v2006_v56 = vsel %vm459_vm10, %v1983_v31, 0.0  ;;  %v2053_v49 = vsel %vm459_vm10, %v2030_v25, 0.0 }
0x13ff   : > { %v2007_v54 = vadd.f32 %v2006_v56, %v2005_v47  ;;  %v2054_v33 = vadd.f32 %v2053_v49, %v2052_v1 }
0x1401   : > { %v2009_v5 = vadd.f32 %v2008_v8, %v2007_v54  ;;  %v2056_v7 = vadd.f32 %v2055_v0, %v2054_v33 }
0x1403   : > { %v2011_v16 = vadd.f32 %v2010_v61, %v2009_v5  ;;  %v1953_v60 = vpop.permute.xlu1 %1952  ;;  %v2058_v45 = vadd.f32 %v2057_v35, %v2056_v7 }
0x1404   : > { %v1986_v4 = vmul.f32 %v1953_v60, %v2901_v3  ;;  %v2033_v53 = vmul.f32 %v1953_v60, %v2893_v13  ;;  %v2016_v13 = vsel %vm459_vm10, %v1988_v51, 0.0 }
0x1406   : > { %v2012_v34 = vsel %vm459_vm10, %v1986_v4, 0.0  ;;  %v2059_v42 = vsel %vm459_vm10, %v2033_v53, 0.0 }
0x1407   : > { %v2013_v46 = vadd.f32 %v2012_v34, %v2011_v16  ;;  %v2060_v57 = vadd.f32 %v2059_v42, %v2058_v45 }
0x1409   : > { %v2015_v50 = vadd.f32 %v2014_v24, %v2013_v46  ;;  %v2062_v3 = vadd.f32 %v2061_v20, %v2060_v57 }
0x140b   : > { %v1968_v37 = vpop.permute.xlu1 %1967  ;;  %v2017_v44 = vadd.f32 %v2016_v13, %v2015_v50  ;;  %v2064_v55 = vadd.f32 %v2063_v52, %v2062_v3 }
0x140c   : > { %v1989_v58 = vmul.f32 %v1968_v37, %v3256_v28  ;;  %v2036_v10 = vmul.f32 %v1968_v37, %v3257_v22 }
0x140e   : > { %v2018_v21 = vsel %vm459_vm10, %v1989_v58, 0.0  ;;  %v2065_v2 = vsel %vm459_vm10, %v2036_v10, 0.0 }
0x140f   : > { %v2019_v27 = vadd.f32 %v2018_v21, %v2017_v44  ;;  %v2066_v19 = vadd.f32 %v2065_v2, %v2064_v55 }
0x1411   : > { %v2068_v9 = vadd.f32 %v2067_v41, %v2066_v19  ;;  %v2021_v11 = vadd.f32 %v2020_v59, %v2019_v27 }
0x1413   : > { %2070 = vrot.lane.b32.xlu2 %v2068_v9, %s2488_s23 }
0x146d   : > { %v2071_v47 = vpop.permute.xlu2 %2070 }
0x146e   : > { %v2073_v63 = vsel %vm459_vm10, %v2021_v11, %v2071_v47 }
0x146f   : > { %v2074_v32 = vsel %vm346_vm1, %v2073_v63, 0.0 }
0x1470   : > { %2075 = vst [vmem:[%s3239_s8] sm:$0xff] %v2074_v32 }
0x1471 PF: > { %s20_s29 = sadd.s32 1, %s2478_s29  }
0x1472   : > { %p17_p7 = scmp.ge.s32.totalorder %s20_s29, 4  }
0x1474   :  { %19 = sbr.rel (!%p17_p7) target bundleno = 3 (0x3), region = 119 }

</bundles_post_ra>
